<compile_context>
chip_gen: v5e
topology: v5e:2x2
jax: 0.10.0
libtpu: 0.0.40
codegen_flags: <defaults>
</compile_context>

<pallas_src>
import functools

import jax
import jax.numpy as jnp
from jax.experimental import pallas as pl
from jax.experimental.pallas import tpu as pltpu


# ----------------------------- Pallas kernel ------------------------------- #

def _bilstm_kernel(x_ref,
                   wef_ref, bef_ref, wgf_ref, bgf_ref, wof_ref, bof_ref,
                   web_ref, beb_ref, wgb_ref, bgb_ref, wob_ref, bob_ref,
                   y_ref,
                   *, n_layers, hidden, batch, time):
    """Whole BidirectionalLSTM forward in one invocation (no grid)."""
    L, H, B, T = n_layers, hidden, batch, time

    def rollout(emb_all, wg_ref, bg_ref, reverse_time):
        """One CustomLSTM rollout over T steps.

        emb_all: [T*B, H] embedded inputs indexed by *forward* time.
        Returns a list of per-forward-time final-layer hiddens ([B, H] each),
        ordered by forward time regardless of rollout direction, so the
        caller never needs an explicit flip.
        """
        # cell.reset(): initial hidden/cell state is zeros; kept as values.
        hs = [jnp.zeros((B, H), jnp.float32) for _ in range(L)]
        cs = [jnp.zeros((B, H), jnp.float32) for _ in range(L)]
        outs = [None] * T
        for s in range(T):                       # static unroll (serial recurrence)
            t = (T - 1 - s) if reverse_time else s
            h_in = emb_all[t * B:(t + 1) * B, :]               # [B, H]
            for l in range(L):                                 # static unroll
                z = jnp.concatenate([h_in, hs[l]], axis=1)     # [B, 2H]
                gates = (jnp.dot(z, wg_ref[l],
                                 preferred_element_type=jnp.float32)
                         + bg_ref[l])                          # [B, 4H] order i,f,o,g
                ifo = jax.nn.sigmoid(gates[:, :3 * H])
                g_g = jnp.tanh(gates[:, 3 * H:])
                i_g = ifo[:, 0 * H:1 * H]
                f_g = ifo[:, 1 * H:2 * H]
                o_g = ifo[:, 2 * H:3 * H]
                c_new = f_g * cs[l] + i_g * g_g
                h_new = o_g * jnp.tanh(c_new)
                hs[l] = h_new
                cs[l] = c_new
                h_in = h_new
            outs[t] = h_in
        return outs

    x_all = x_ref[...]                                         # [T*B, Din]

    # ---- forward direction -------------------------------------------------
    # embed hoisted out of the recurrence: one [T*B, Din] @ [Din, H] matmul
    ef_all = (jnp.dot(x_all, wef_ref[...], preferred_element_type=jnp.float32)
              + bef_ref[...])
    hf = rollout(ef_all, wgf_ref, bgf_ref, reverse_time=False)
    hf_all = jnp.concatenate(hf, axis=0)                       # [T*B, H]
    # output projection hoisted out of the recurrence
    outf_all = (jnp.dot(hf_all, wof_ref[...], preferred_element_type=jnp.float32)
                + bof_ref[...])                                # out_f, forward-time order

    # ---- backward direction (consumes out_f in reversed time) --------------
    eb_all = (jnp.dot(outf_all, web_ref[...], preferred_element_type=jnp.float32)
              + beb_ref[...])
    hb = rollout(eb_all, wgb_ref, bgb_ref, reverse_time=True)  # forward-time order
    hb_all = jnp.concatenate(hb, axis=0)                       # [T*B, H]
    y_ref[...] = (jnp.dot(hb_all, wob_ref[...], preferred_element_type=jnp.float32)
                  + bob_ref[...])                              # [T*B, Dout]


# ------------------------------ wrapper ------------------------------------ #

def pack_for_kernel(p):
    """Fuse gate weights/biases and reorder gate columns (i,f,g,o)->(i,f,o,g)."""
    L, H, _ = p["wih"].shape
    wg = jnp.concatenate([p["wih"], p["whh"]], axis=1)         # [L, 2H, 4H]
    bg = p["bih"] + p["bhh"]                                   # [L, 1, 4H]
    perm = jnp.concatenate([jnp.arange(0, 2 * H),              # i, f
                            jnp.arange(3 * H, 4 * H),          # o
                            jnp.arange(2 * H, 3 * H)])         # g
    wg = wg[:, :, perm]
    bg = bg[:, :, perm]
    return {"we": p["we"], "be": p["be"], "wg": wg, "bg": bg,
            "wo": p["wo"], "bo": p["bo"]}


@jax.jit
def bidirectional_lstm(x, fwd_params, bwd_params):
    """BidirectionalLSTM.forward. x: [B, T, in_dim] -> [B, T, out_dim]."""
    B, T, Din = x.shape
    L, H, _ = fwd_params["wih"].shape
    Dout = fwd_params["wo"].shape[1]

    pf = pack_for_kernel(fwd_params)
    pb = pack_for_kernel(bwd_params)

    # time-major, flattened to a lane-friendly 2D slab: row index = t*B + b
    x2d = jnp.transpose(x, (1, 0, 2)).reshape(T * B, Din)

    kernel = functools.partial(_bilstm_kernel,
                               n_layers=L, hidden=H, batch=B, time=T)
    vmem = pl.BlockSpec(memory_space=pltpu.MemorySpace.VMEM)
    y2d = pl.pallas_call(
        kernel,
        out_shape=jax.ShapeDtypeStruct((T * B, Dout), jnp.float32),
        in_specs=[vmem] * 13,
        out_specs=pl.BlockSpec(memory_space=pltpu.MemorySpace.VMEM),
    )(x2d,
      pf["we"], pf["be"], pf["wg"], pf["bg"], pf["wo"], pf["bo"],
      pb["we"], pb["be"], pb["wg"], pb["bg"], pb["wo"], pb["bo"])

    return jnp.transpose(y2d.reshape(T, B, Dout), (1, 0, 2))


# ------------------------ deterministic parameter init --------------------- #

def init_cell_params(key, input_size, hidden, output_size, n_layers):
    """Mirrors CustomLSTMCell.__init__ (Linear path) with PyTorch-style init."""
    keys = jax.random.split(key, 4 + 4 * n_layers)
    kidx = 0

    def uni(k, shape, bound):
        return jax.random.uniform(k, shape, jnp.float32, -bound, bound)

    # embed = nn.Linear(input_size, hidden)
    b_e = 1.0 / jnp.sqrt(input_size)
    we = uni(keys[kidx], (hidden, input_size), b_e); kidx += 1
    be = uni(keys[kidx], (hidden,), b_e); kidx += 1
    # output = nn.Linear(hidden, output_size)
    b_o = 1.0 / jnp.sqrt(hidden)
    wo = uni(keys[kidx], (output_size, hidden), b_o); kidx += 1
    bo = uni(keys[kidx], (output_size,), b_o); kidx += 1

    wih, whh, bih, bhh = [], [], [], []
    b_l = 1.0 / jnp.sqrt(hidden)
    for _ in range(n_layers):
        w_ih = uni(keys[kidx], (4 * hidden, hidden), b_l); kidx += 1
        w_hh = uni(keys[kidx], (4 * hidden, hidden), b_l); kidx += 1
        b_ih = uni(keys[kidx], (4 * hidden,), b_l); kidx += 1
        b_hh = uni(keys[kidx], (4 * hidden,), b_l); kidx += 1
        # init_bias: forget-gate bias segment [n//4 : n//2] -> 1.0 on BOTH biases
        b_ih = b_ih.at[hidden:2 * hidden].set(1.0)
        b_hh = b_hh.at[hidden:2 * hidden].set(1.0)
        wih.append(w_ih.T); whh.append(w_hh.T)
        bih.append(b_ih[None, :]); bhh.append(b_hh[None, :])

    return {
        "we": we.T, "be": be[None, :],
        "wih": jnp.stack(wih), "whh": jnp.stack(whh),
        "bih": jnp.stack(bih), "bhh": jnp.stack(bhh),
        "wo": wo.T, "bo": bo[None, :],
    }


# ------------------------------ JAX reference ------------------------------ #

def ref_custom_lstm(x, p):
    B, T, _ = x.shape
    L, H, _ = p["wih"].shape
    h = jnp.zeros((L, B, H), jnp.float32)
    c = jnp.zeros((L, B, H), jnp.float32)
    outs = []
    for t in range(T):
        h_in = x[:, t] @ p["we"] + p["be"]
        new_h, new_c = [], []
        for l in range(L):
            gates = h_in @ p["wih"][l] + p["bih"][l] + h[l] @ p["whh"][l] + p["bhh"][l]
            i_g = jax.nn.sigmoid(gates[:, :H])
            f_g = jax.nn.sigmoid(gates[:, H:2 * H])
            g_g = jnp.tanh(gates[:, 2 * H:3 * H])
            o_g = jax.nn.sigmoid(gates[:, 3 * H:])
            cn = f_g * c[l] + i_g * g_g
            hn = o_g * jnp.tanh(cn)
            new_h.append(hn); new_c.append(cn)
            h_in = hn
        h, c = jnp.stack(new_h), jnp.stack(new_c)
        outs.append(h_in @ p["wo"] + p["bo"])
    return jnp.stack(outs, axis=1)


def ref_bidirectional(x, fwd_params, bwd_params):
    out_f = jnp.flip(ref_custom_lstm(x, fwd_params), axis=1)
    return jnp.flip(ref_custom_lstm(out_f, bwd_params), axis=1)


# ----------------------------------- main ----------------------------------- #

if __name__ == "__main__":
    # hp: nz_mid_lstm=32, n_lstm_layers=2, use_conv_lstm=False, batch_size=4
    B, T = 4, 6
    IN_DIM, OUT_DIM, HIDDEN, N_LAYERS = 8, 16, 32, 2

    root = jax.random.PRNGKey(0)
    k_x, k_f, k_b = jax.random.split(root, 3)

    x = jax.random.normal(k_x, (B, T, IN_DIM), jnp.float32)
    fwd_params = init_cell_params(k_f, IN_DIM, HIDDEN, OUT_DIM, N_LAYERS)
    bwd_params = init_cell_params(k_b, OUT_DIM, HIDDEN, OUT_DIM, N_LAYERS)

    out = bidirectional_lstm(x, fwd_params, bwd_params)
    out = jax.block_until_ready(out)

    ref = ref_bidirectional(x, fwd_params, bwd_params)
    assert out.shape == (B, T, OUT_DIM), out.shape
    assert jnp.allclose(out, ref, atol=1e-3, rtol=1e-3), float(jnp.max(jnp.abs(out - ref)))

    print("KERNEL_OK")
</pallas_src>

<mosaic_0001>
module attributes {stable_mosaic.version = 11 : i64} {
  func.func @_bilstm_kernel(%arg0: memref<24x8xf32, #tpu.memory_space<vmem>>, %arg1: memref<8x32xf32, #tpu.memory_space<vmem>>, %arg2: memref<1x32xf32, #tpu.memory_space<vmem>>, %arg3: memref<2x64x128xf32, #tpu.memory_space<vmem>>, %arg4: memref<2x1x128xf32, #tpu.memory_space<vmem>>, %arg5: memref<32x16xf32, #tpu.memory_space<vmem>>, %arg6: memref<1x16xf32, #tpu.memory_space<vmem>>, %arg7: memref<16x32xf32, #tpu.memory_space<vmem>>, %arg8: memref<1x32xf32, #tpu.memory_space<vmem>>, %arg9: memref<2x64x128xf32, #tpu.memory_space<vmem>>, %arg10: memref<2x1x128xf32, #tpu.memory_space<vmem>>, %arg11: memref<32x16xf32, #tpu.memory_space<vmem>>, %arg12: memref<1x16xf32, #tpu.memory_space<vmem>>, %arg13: memref<24x16xf32, #tpu.memory_space<vmem>>) attributes {dimension_semantics = [], scalar_prefetch = 0 : i64, scratch_operands = 0 : i64, tpu.core_type = #tpu.core_type<tc>} {
    %c0 = arith.constant 0 : index
    %c0_0 = arith.constant 0 : index
    %0 = vector.load %arg0[%c0, %c0_0] : memref<24x8xf32, #tpu.memory_space<vmem>>, vector<24x8xf32>
    %c0_1 = arith.constant 0 : index
    %c0_2 = arith.constant 0 : index
    %1 = vector.load %arg1[%c0_1, %c0_2] : memref<8x32xf32, #tpu.memory_space<vmem>>, vector<8x32xf32>
    %cst = arith.constant dense<0.000000e+00> : vector<24x32xf32>
    %2 = tpu.matmul %0, %1, %cst {dimension_numbers = #tpu.dot_dimension_numbers<[1], [0], [0], [1], [0, 0, 1, 1], [], []>} : vector<24x8xf32>, vector<8x32xf32>, vector<24x32xf32> -> vector<24x32xf32>
    %c0_3 = arith.constant 0 : index
    %c0_4 = arith.constant 0 : index
    %3 = vector.load %arg2[%c0_3, %c0_4] : memref<1x32xf32, #tpu.memory_space<vmem>>, vector<1x32xf32>
    %4 = vector.broadcast %3 : vector<1x32xf32> to vector<24x32xf32>
    %5 = arith.addf %2, %4 : vector<24x32xf32>
    %cst_5 = arith.constant 0.000000e+00 : f32
    %6 = vector.broadcast %cst_5 : f32 to vector<4x32xf32>
    %cst_6 = arith.constant 0.000000e+00 : f32
    %7 = vector.broadcast %cst_6 : f32 to vector<4x32xf32>
    %cst_7 = arith.constant 0.000000e+00 : f32
    %8 = vector.broadcast %cst_7 : f32 to vector<4x32xf32>
    %cst_8 = arith.constant 0.000000e+00 : f32
    %9 = vector.broadcast %cst_8 : f32 to vector<4x32xf32>
    %10 = vector.extract_strided_slice %5 {offsets = [0, 0], sizes = [4, 32], strides = [1, 1]} : vector<24x32xf32> to vector<4x32xf32>
    %11 = tpu.concatenate %10, %6 in 1 : vector<4x32xf32>, vector<4x32xf32> -> vector<4x64xf32>
    %c0_9 = arith.constant 0 : index
    %c0_10 = arith.constant 0 : index
    %c0_11 = arith.constant 0 : index
    %12 = vector.load %arg3[%c0_9, %c0_10, %c0_11] : memref<2x64x128xf32, #tpu.memory_space<vmem>>, vector<1x64x128xf32>
    %13 = vector.shape_cast %12 : vector<1x64x128xf32> to vector<64x128xf32>
    %cst_12 = arith.constant dense<0.000000e+00> : vector<4x128xf32>
    %14 = tpu.matmul %11, %13, %cst_12 {dimension_numbers = #tpu.dot_dimension_numbers<[1], [0], [0], [1], [0, 0, 1, 1], [], []>} : vector<4x64xf32>, vector<64x128xf32>, vector<4x128xf32> -> vector<4x128xf32>
    %c0_13 = arith.constant 0 : index
    %c0_14 = arith.constant 0 : index
    %c0_15 = arith.constant 0 : index
    %15 = vector.load %arg4[%c0_13, %c0_14, %c0_15] : memref<2x1x128xf32, #tpu.memory_space<vmem>>, vector<1x1x128xf32>
    %16 = vector.shape_cast %15 : vector<1x1x128xf32> to vector<1x128xf32>
    %17 = vector.broadcast %16 : vector<1x128xf32> to vector<4x128xf32>
    %18 = arith.addf %14, %17 : vector<4x128xf32>
    %19 = vector.extract_strided_slice %18 {offsets = [0, 0], sizes = [4, 96], strides = [1, 1]} : vector<4x128xf32> to vector<4x96xf32>
    %20 = arith.negf %19 : vector<4x96xf32>
    %21 = math.exp %20 : vector<4x96xf32>
    %cst_16 = arith.constant 1.000000e+00 : f32
    %22 = vector.broadcast %cst_16 : f32 to vector<4x96xf32>
    %23 = arith.addf %22, %21 : vector<4x96xf32>
    %24 = arith.divf %22, %23 : vector<4x96xf32>
    %25 = vector.extract_strided_slice %18 {offsets = [0, 96], sizes = [4, 32], strides = [1, 1]} : vector<4x128xf32> to vector<4x32xf32>
    %26 = math.tanh %25 : vector<4x32xf32>
    %27 = vector.extract_strided_slice %24 {offsets = [0, 0], sizes = [4, 32], strides = [1, 1]} : vector<4x96xf32> to vector<4x32xf32>
    %28 = vector.extract_strided_slice %24 {offsets = [0, 32], sizes = [4, 32], strides = [1, 1]} : vector<4x96xf32> to vector<4x32xf32>
    %29 = vector.extract_strided_slice %24 {offsets = [0, 64], sizes = [4, 32], strides = [1, 1]} : vector<4x96xf32> to vector<4x32xf32>
    %30 = arith.mulf %28, %8 : vector<4x32xf32>
    %31 = arith.mulf %27, %26 : vector<4x32xf32>
    %32 = arith.addf %30, %31 : vector<4x32xf32>
    %33 = math.tanh %32 : vector<4x32xf32>
    %34 = arith.mulf %29, %33 : vector<4x32xf32>
    %35 = tpu.concatenate %34, %7 in 1 : vector<4x32xf32>, vector<4x32xf32> -> vector<4x64xf32>
    %c1 = arith.constant 1 : index
    %c0_17 = arith.constant 0 : index
    %c0_18 = arith.constant 0 : index
    %36 = vector.load %arg3[%c1, %c0_17, %c0_18] : memref<2x64x128xf32, #tpu.memory_space<vmem>>, vector<1x64x128xf32>
    %37 = vector.shape_cast %36 : vector<1x64x128xf32> to vector<64x128xf32>
    %cst_19 = arith.constant dense<0.000000e+00> : vector<4x128xf32>
    %38 = tpu.matmul %35, %37, %cst_19 {dimension_numbers = #tpu.dot_dimension_numbers<[1], [0], [0], [1], [0, 0, 1, 1], [], []>} : vector<4x64xf32>, vector<64x128xf32>, vector<4x128xf32> -> vector<4x128xf32>
    %c1_20 = arith.constant 1 : index
    %c0_21 = arith.constant 0 : index
    %c0_22 = arith.constant 0 : index
    %39 = vector.load %arg4[%c1_20, %c0_21, %c0_22] : memref<2x1x128xf32, #tpu.memory_space<vmem>>, vector<1x1x128xf32>
    %40 = vector.shape_cast %39 : vector<1x1x128xf32> to vector<1x128xf32>
    %41 = vector.broadcast %40 : vector<1x128xf32> to vector<4x128xf32>
    %42 = arith.addf %38, %41 : vector<4x128xf32>
    %43 = vector.extract_strided_slice %42 {offsets = [0, 0], sizes = [4, 96], strides = [1, 1]} : vector<4x128xf32> to vector<4x96xf32>
    %44 = arith.negf %43 : vector<4x96xf32>
    %45 = math.exp %44 : vector<4x96xf32>
    %cst_23 = arith.constant 1.000000e+00 : f32
    %46 = vector.broadcast %cst_23 : f32 to vector<4x96xf32>
    %47 = arith.addf %46, %45 : vector<4x96xf32>
    %48 = arith.divf %46, %47 : vector<4x96xf32>
    %49 = vector.extract_strided_slice %42 {offsets = [0, 96], sizes = [4, 32], strides = [1, 1]} : vector<4x128xf32> to vector<4x32xf32>
    %50 = math.tanh %49 : vector<4x32xf32>
    %51 = vector.extract_strided_slice %48 {offsets = [0, 0], sizes = [4, 32], strides = [1, 1]} : vector<4x96xf32> to vector<4x32xf32>
    %52 = vector.extract_strided_slice %48 {offsets = [0, 32], sizes = [4, 32], strides = [1, 1]} : vector<4x96xf32> to vector<4x32xf32>
    %53 = vector.extract_strided_slice %48 {offsets = [0, 64], sizes = [4, 32], strides = [1, 1]} : vector<4x96xf32> to vector<4x32xf32>
    %54 = arith.mulf %52, %9 : vector<4x32xf32>
    %55 = arith.mulf %51, %50 : vector<4x32xf32>
    %56 = arith.addf %54, %55 : vector<4x32xf32>
    %57 = math.tanh %56 : vector<4x32xf32>
    %58 = arith.mulf %53, %57 : vector<4x32xf32>
    %59 = vector.extract_strided_slice %5 {offsets = [4, 0], sizes = [4, 32], strides = [1, 1]} : vector<24x32xf32> to vector<4x32xf32>
    %60 = tpu.concatenate %59, %34 in 1 : vector<4x32xf32>, vector<4x32xf32> -> vector<4x64xf32>
    %c0_24 = arith.constant 0 : index
    %c0_25 = arith.constant 0 : index
    %c0_26 = arith.constant 0 : index
    %61 = vector.load %arg3[%c0_24, %c0_25, %c0_26] : memref<2x64x128xf32, #tpu.memory_space<vmem>>, vector<1x64x128xf32>
    %62 = vector.shape_cast %61 : vector<1x64x128xf32> to vector<64x128xf32>
    %cst_27 = arith.constant dense<0.000000e+00> : vector<4x128xf32>
    %63 = tpu.matmul %60, %62, %cst_27 {dimension_numbers = #tpu.dot_dimension_numbers<[1], [0], [0], [1], [0, 0, 1, 1], [], []>} : vector<4x64xf32>, vector<64x128xf32>, vector<4x128xf32> -> vector<4x128xf32>
    %c0_28 = arith.constant 0 : index
    %c0_29 = arith.constant 0 : index
    %c0_30 = arith.constant 0 : index
    %64 = vector.load %arg4[%c0_28, %c0_29, %c0_30] : memref<2x1x128xf32, #tpu.memory_space<vmem>>, vector<1x1x128xf32>
    %65 = vector.shape_cast %64 : vector<1x1x128xf32> to vector<1x128xf32>
    %66 = vector.broadcast %65 : vector<1x128xf32> to vector<4x128xf32>
    %67 = arith.addf %63, %66 : vector<4x128xf32>
    %68 = vector.extract_strided_slice %67 {offsets = [0, 0], sizes = [4, 96], strides = [1, 1]} : vector<4x128xf32> to vector<4x96xf32>
    %69 = arith.negf %68 : vector<4x96xf32>
    %70 = math.exp %69 : vector<4x96xf32>
    %cst_31 = arith.constant 1.000000e+00 : f32
    %71 = vector.broadcast %cst_31 : f32 to vector<4x96xf32>
    %72 = arith.addf %71, %70 : vector<4x96xf32>
    %73 = arith.divf %71, %72 : vector<4x96xf32>
    %74 = vector.extract_strided_slice %67 {offsets = [0, 96], sizes = [4, 32], strides = [1, 1]} : vector<4x128xf32> to vector<4x32xf32>
    %75 = math.tanh %74 : vector<4x32xf32>
    %76 = vector.extract_strided_slice %73 {offsets = [0, 0], sizes = [4, 32], strides = [1, 1]} : vector<4x96xf32> to vector<4x32xf32>
    %77 = vector.extract_strided_slice %73 {offsets = [0, 32], sizes = [4, 32], strides = [1, 1]} : vector<4x96xf32> to vector<4x32xf32>
    %78 = vector.extract_strided_slice %73 {offsets = [0, 64], sizes = [4, 32], strides = [1, 1]} : vector<4x96xf32> to vector<4x32xf32>
    %79 = arith.mulf %77, %32 : vector<4x32xf32>
    %80 = arith.mulf %76, %75 : vector<4x32xf32>
    %81 = arith.addf %79, %80 : vector<4x32xf32>
    %82 = math.tanh %81 : vector<4x32xf32>
    %83 = arith.mulf %78, %82 : vector<4x32xf32>
    %84 = tpu.concatenate %83, %58 in 1 : vector<4x32xf32>, vector<4x32xf32> -> vector<4x64xf32>
    %c1_32 = arith.constant 1 : index
    %c0_33 = arith.constant 0 : index
    %c0_34 = arith.constant 0 : index
    %85 = vector.load %arg3[%c1_32, %c0_33, %c0_34] : memref<2x64x128xf32, #tpu.memory_space<vmem>>, vector<1x64x128xf32>
    %86 = vector.shape_cast %85 : vector<1x64x128xf32> to vector<64x128xf32>
    %cst_35 = arith.constant dense<0.000000e+00> : vector<4x128xf32>
    %87 = tpu.matmul %84, %86, %cst_35 {dimension_numbers = #tpu.dot_dimension_numbers<[1], [0], [0], [1], [0, 0, 1, 1], [], []>} : vector<4x64xf32>, vector<64x128xf32>, vector<4x128xf32> -> vector<4x128xf32>
    %c1_36 = arith.constant 1 : index
    %c0_37 = arith.constant 0 : index
    %c0_38 = arith.constant 0 : index
    %88 = vector.load %arg4[%c1_36, %c0_37, %c0_38] : memref<2x1x128xf32, #tpu.memory_space<vmem>>, vector<1x1x128xf32>
    %89 = vector.shape_cast %88 : vector<1x1x128xf32> to vector<1x128xf32>
    %90 = vector.broadcast %89 : vector<1x128xf32> to vector<4x128xf32>
    %91 = arith.addf %87, %90 : vector<4x128xf32>
    %92 = vector.extract_strided_slice %91 {offsets = [0, 0], sizes = [4, 96], strides = [1, 1]} : vector<4x128xf32> to vector<4x96xf32>
    %93 = arith.negf %92 : vector<4x96xf32>
    %94 = math.exp %93 : vector<4x96xf32>
    %cst_39 = arith.constant 1.000000e+00 : f32
    %95 = vector.broadcast %cst_39 : f32 to vector<4x96xf32>
    %96 = arith.addf %95, %94 : vector<4x96xf32>
    %97 = arith.divf %95, %96 : vector<4x96xf32>
    %98 = vector.extract_strided_slice %91 {offsets = [0, 96], sizes = [4, 32], strides = [1, 1]} : vector<4x128xf32> to vector<4x32xf32>
    %99 = math.tanh %98 : vector<4x32xf32>
    %100 = vector.extract_strided_slice %97 {offsets = [0, 0], sizes = [4, 32], strides = [1, 1]} : vector<4x96xf32> to vector<4x32xf32>
    %101 = vector.extract_strided_slice %97 {offsets = [0, 32], sizes = [4, 32], strides = [1, 1]} : vector<4x96xf32> to vector<4x32xf32>
    %102 = vector.extract_strided_slice %97 {offsets = [0, 64], sizes = [4, 32], strides = [1, 1]} : vector<4x96xf32> to vector<4x32xf32>
    %103 = arith.mulf %101, %56 : vector<4x32xf32>
    %104 = arith.mulf %100, %99 : vector<4x32xf32>
    %105 = arith.addf %103, %104 : vector<4x32xf32>
    %106 = math.tanh %105 : vector<4x32xf32>
    %107 = arith.mulf %102, %106 : vector<4x32xf32>
    %108 = vector.extract_strided_slice %5 {offsets = [8, 0], sizes = [4, 32], strides = [1, 1]} : vector<24x32xf32> to vector<4x32xf32>
    %109 = tpu.concatenate %108, %83 in 1 : vector<4x32xf32>, vector<4x32xf32> -> vector<4x64xf32>
    %c0_40 = arith.constant 0 : index
    %c0_41 = arith.constant 0 : index
    %c0_42 = arith.constant 0 : index
    %110 = vector.load %arg3[%c0_40, %c0_41, %c0_42] : memref<2x64x128xf32, #tpu.memory_space<vmem>>, vector<1x64x128xf32>
    %111 = vector.shape_cast %110 : vector<1x64x128xf32> to vector<64x128xf32>
    %cst_43 = arith.constant dense<0.000000e+00> : vector<4x128xf32>
    %112 = tpu.matmul %109, %111, %cst_43 {dimension_numbers = #tpu.dot_dimension_numbers<[1], [0], [0], [1], [0, 0, 1, 1], [], []>} : vector<4x64xf32>, vector<64x128xf32>, vector<4x128xf32> -> vector<4x128xf32>
    %c0_44 = arith.constant 0 : index
    %c0_45 = arith.constant 0 : index
    %c0_46 = arith.constant 0 : index
    %113 = vector.load %arg4[%c0_44, %c0_45, %c0_46] : memref<2x1x128xf32, #tpu.memory_space<vmem>>, vector<1x1x128xf32>
    %114 = vector.shape_cast %113 : vector<1x1x128xf32> to vector<1x128xf32>
    %115 = vector.broadcast %114 : vector<1x128xf32> to vector<4x128xf32>
    %116 = arith.addf %112, %115 : vector<4x128xf32>
    %117 = vector.extract_strided_slice %116 {offsets = [0, 0], sizes = [4, 96], strides = [1, 1]} : vector<4x128xf32> to vector<4x96xf32>
    %118 = arith.negf %117 : vector<4x96xf32>
    %119 = math.exp %118 : vector<4x96xf32>
    %cst_47 = arith.constant 1.000000e+00 : f32
    %120 = vector.broadcast %cst_47 : f32 to vector<4x96xf32>
    %121 = arith.addf %120, %119 : vector<4x96xf32>
    %122 = arith.divf %120, %121 : vector<4x96xf32>
    %123 = vector.extract_strided_slice %116 {offsets = [0, 96], sizes = [4, 32], strides = [1, 1]} : vector<4x128xf32> to vector<4x32xf32>
    %124 = math.tanh %123 : vector<4x32xf32>
    %125 = vector.extract_strided_slice %122 {offsets = [0, 0], sizes = [4, 32], strides = [1, 1]} : vector<4x96xf32> to vector<4x32xf32>
    %126 = vector.extract_strided_slice %122 {offsets = [0, 32], sizes = [4, 32], strides = [1, 1]} : vector<4x96xf32> to vector<4x32xf32>
    %127 = vector.extract_strided_slice %122 {offsets = [0, 64], sizes = [4, 32], strides = [1, 1]} : vector<4x96xf32> to vector<4x32xf32>
    %128 = arith.mulf %126, %81 : vector<4x32xf32>
    %129 = arith.mulf %125, %124 : vector<4x32xf32>
    %130 = arith.addf %128, %129 : vector<4x32xf32>
    %131 = math.tanh %130 : vector<4x32xf32>
    %132 = arith.mulf %127, %131 : vector<4x32xf32>
    %133 = tpu.concatenate %132, %107 in 1 : vector<4x32xf32>, vector<4x32xf32> -> vector<4x64xf32>
    %c1_48 = arith.constant 1 : index
    %c0_49 = arith.constant 0 : index
    %c0_50 = arith.constant 0 : index
    %134 = vector.load %arg3[%c1_48, %c0_49, %c0_50] : memref<2x64x128xf32, #tpu.memory_space<vmem>>, vector<1x64x128xf32>
    %135 = vector.shape_cast %134 : vector<1x64x128xf32> to vector<64x128xf32>
    %cst_51 = arith.constant dense<0.000000e+00> : vector<4x128xf32>
    %136 = tpu.matmul %133, %135, %cst_51 {dimension_numbers = #tpu.dot_dimension_numbers<[1], [0], [0], [1], [0, 0, 1, 1], [], []>} : vector<4x64xf32>, vector<64x128xf32>, vector<4x128xf32> -> vector<4x128xf32>
    %c1_52 = arith.constant 1 : index
    %c0_53 = arith.constant 0 : index
    %c0_54 = arith.constant 0 : index
    %137 = vector.load %arg4[%c1_52, %c0_53, %c0_54] : memref<2x1x128xf32, #tpu.memory_space<vmem>>, vector<1x1x128xf32>
    %138 = vector.shape_cast %137 : vector<1x1x128xf32> to vector<1x128xf32>
    %139 = vector.broadcast %138 : vector<1x128xf32> to vector<4x128xf32>
    %140 = arith.addf %136, %139 : vector<4x128xf32>
    %141 = vector.extract_strided_slice %140 {offsets = [0, 0], sizes = [4, 96], strides = [1, 1]} : vector<4x128xf32> to vector<4x96xf32>
    %142 = arith.negf %141 : vector<4x96xf32>
    %143 = math.exp %142 : vector<4x96xf32>
    %cst_55 = arith.constant 1.000000e+00 : f32
    %144 = vector.broadcast %cst_55 : f32 to vector<4x96xf32>
    %145 = arith.addf %144, %143 : vector<4x96xf32>
    %146 = arith.divf %144, %145 : vector<4x96xf32>
    %147 = vector.extract_strided_slice %140 {offsets = [0, 96], sizes = [4, 32], strides = [1, 1]} : vector<4x128xf32> to vector<4x32xf32>
    %148 = math.tanh %147 : vector<4x32xf32>
    %149 = vector.extract_strided_slice %146 {offsets = [0, 0], sizes = [4, 32], strides = [1, 1]} : vector<4x96xf32> to vector<4x32xf32>
    %150 = vector.extract_strided_slice %146 {offsets = [0, 32], sizes = [4, 32], strides = [1, 1]} : vector<4x96xf32> to vector<4x32xf32>
    %151 = vector.extract_strided_slice %146 {offsets = [0, 64], sizes = [4, 32], strides = [1, 1]} : vector<4x96xf32> to vector<4x32xf32>
    %152 = arith.mulf %150, %105 : vector<4x32xf32>
    %153 = arith.mulf %149, %148 : vector<4x32xf32>
    %154 = arith.addf %152, %153 : vector<4x32xf32>
    %155 = math.tanh %154 : vector<4x32xf32>
    %156 = arith.mulf %151, %155 : vector<4x32xf32>
    %157 = vector.extract_strided_slice %5 {offsets = [12, 0], sizes = [4, 32], strides = [1, 1]} : vector<24x32xf32> to vector<4x32xf32>
    %158 = tpu.concatenate %157, %132 in 1 : vector<4x32xf32>, vector<4x32xf32> -> vector<4x64xf32>
    %c0_56 = arith.constant 0 : index
    %c0_57 = arith.constant 0 : index
    %c0_58 = arith.constant 0 : index
    %159 = vector.load %arg3[%c0_56, %c0_57, %c0_58] : memref<2x64x128xf32, #tpu.memory_space<vmem>>, vector<1x64x128xf32>
    %160 = vector.shape_cast %159 : vector<1x64x128xf32> to vector<64x128xf32>
    %cst_59 = arith.constant dense<0.000000e+00> : vector<4x128xf32>
    %161 = tpu.matmul %158, %160, %cst_59 {dimension_numbers = #tpu.dot_dimension_numbers<[1], [0], [0], [1], [0, 0, 1, 1], [], []>} : vector<4x64xf32>, vector<64x128xf32>, vector<4x128xf32> -> vector<4x128xf32>
    %c0_60 = arith.constant 0 : index
    %c0_61 = arith.constant 0 : index
    %c0_62 = arith.constant 0 : index
    %162 = vector.load %arg4[%c0_60, %c0_61, %c0_62] : memref<2x1x128xf32, #tpu.memory_space<vmem>>, vector<1x1x128xf32>
    %163 = vector.shape_cast %162 : vector<1x1x128xf32> to vector<1x128xf32>
    %164 = vector.broadcast %163 : vector<1x128xf32> to vector<4x128xf32>
    %165 = arith.addf %161, %164 : vector<4x128xf32>
    %166 = vector.extract_strided_slice %165 {offsets = [0, 0], sizes = [4, 96], strides = [1, 1]} : vector<4x128xf32> to vector<4x96xf32>
    %167 = arith.negf %166 : vector<4x96xf32>
    %168 = math.exp %167 : vector<4x96xf32>
    %cst_63 = arith.constant 1.000000e+00 : f32
    %169 = vector.broadcast %cst_63 : f32 to vector<4x96xf32>
    %170 = arith.addf %169, %168 : vector<4x96xf32>
    %171 = arith.divf %169, %170 : vector<4x96xf32>
    %172 = vector.extract_strided_slice %165 {offsets = [0, 96], sizes = [4, 32], strides = [1, 1]} : vector<4x128xf32> to vector<4x32xf32>
    %173 = math.tanh %172 : vector<4x32xf32>
    %174 = vector.extract_strided_slice %171 {offsets = [0, 0], sizes = [4, 32], strides = [1, 1]} : vector<4x96xf32> to vector<4x32xf32>
    %175 = vector.extract_strided_slice %171 {offsets = [0, 32], sizes = [4, 32], strides = [1, 1]} : vector<4x96xf32> to vector<4x32xf32>
    %176 = vector.extract_strided_slice %171 {offsets = [0, 64], sizes = [4, 32], strides = [1, 1]} : vector<4x96xf32> to vector<4x32xf32>
    %177 = arith.mulf %175, %130 : vector<4x32xf32>
    %178 = arith.mulf %174, %173 : vector<4x32xf32>
    %179 = arith.addf %177, %178 : vector<4x32xf32>
    %180 = math.tanh %179 : vector<4x32xf32>
    %181 = arith.mulf %176, %180 : vector<4x32xf32>
    %182 = tpu.concatenate %181, %156 in 1 : vector<4x32xf32>, vector<4x32xf32> -> vector<4x64xf32>
    %c1_64 = arith.constant 1 : index
    %c0_65 = arith.constant 0 : index
    %c0_66 = arith.constant 0 : index
    %183 = vector.load %arg3[%c1_64, %c0_65, %c0_66] : memref<2x64x128xf32, #tpu.memory_space<vmem>>, vector<1x64x128xf32>
    %184 = vector.shape_cast %183 : vector<1x64x128xf32> to vector<64x128xf32>
    %cst_67 = arith.constant dense<0.000000e+00> : vector<4x128xf32>
    %185 = tpu.matmul %182, %184, %cst_67 {dimension_numbers = #tpu.dot_dimension_numbers<[1], [0], [0], [1], [0, 0, 1, 1], [], []>} : vector<4x64xf32>, vector<64x128xf32>, vector<4x128xf32> -> vector<4x128xf32>
    %c1_68 = arith.constant 1 : index
    %c0_69 = arith.constant 0 : index
    %c0_70 = arith.constant 0 : index
    %186 = vector.load %arg4[%c1_68, %c0_69, %c0_70] : memref<2x1x128xf32, #tpu.memory_space<vmem>>, vector<1x1x128xf32>
    %187 = vector.shape_cast %186 : vector<1x1x128xf32> to vector<1x128xf32>
    %188 = vector.broadcast %187 : vector<1x128xf32> to vector<4x128xf32>
    %189 = arith.addf %185, %188 : vector<4x128xf32>
    %190 = vector.extract_strided_slice %189 {offsets = [0, 0], sizes = [4, 96], strides = [1, 1]} : vector<4x128xf32> to vector<4x96xf32>
    %191 = arith.negf %190 : vector<4x96xf32>
    %192 = math.exp %191 : vector<4x96xf32>
    %cst_71 = arith.constant 1.000000e+00 : f32
    %193 = vector.broadcast %cst_71 : f32 to vector<4x96xf32>
    %194 = arith.addf %193, %192 : vector<4x96xf32>
    %195 = arith.divf %193, %194 : vector<4x96xf32>
    %196 = vector.extract_strided_slice %189 {offsets = [0, 96], sizes = [4, 32], strides = [1, 1]} : vector<4x128xf32> to vector<4x32xf32>
    %197 = math.tanh %196 : vector<4x32xf32>
    %198 = vector.extract_strided_slice %195 {offsets = [0, 0], sizes = [4, 32], strides = [1, 1]} : vector<4x96xf32> to vector<4x32xf32>
    %199 = vector.extract_strided_slice %195 {offsets = [0, 32], sizes = [4, 32], strides = [1, 1]} : vector<4x96xf32> to vector<4x32xf32>
    %200 = vector.extract_strided_slice %195 {offsets = [0, 64], sizes = [4, 32], strides = [1, 1]} : vector<4x96xf32> to vector<4x32xf32>
    %201 = arith.mulf %199, %154 : vector<4x32xf32>
    %202 = arith.mulf %198, %197 : vector<4x32xf32>
    %203 = arith.addf %201, %202 : vector<4x32xf32>
    %204 = math.tanh %203 : vector<4x32xf32>
    %205 = arith.mulf %200, %204 : vector<4x32xf32>
    %206 = vector.extract_strided_slice %5 {offsets = [16, 0], sizes = [4, 32], strides = [1, 1]} : vector<24x32xf32> to vector<4x32xf32>
    %207 = tpu.concatenate %206, %181 in 1 : vector<4x32xf32>, vector<4x32xf32> -> vector<4x64xf32>
    %c0_72 = arith.constant 0 : index
    %c0_73 = arith.constant 0 : index
    %c0_74 = arith.constant 0 : index
    %208 = vector.load %arg3[%c0_72, %c0_73, %c0_74] : memref<2x64x128xf32, #tpu.memory_space<vmem>>, vector<1x64x128xf32>
    %209 = vector.shape_cast %208 : vector<1x64x128xf32> to vector<64x128xf32>
    %cst_75 = arith.constant dense<0.000000e+00> : vector<4x128xf32>
    %210 = tpu.matmul %207, %209, %cst_75 {dimension_numbers = #tpu.dot_dimension_numbers<[1], [0], [0], [1], [0, 0, 1, 1], [], []>} : vector<4x64xf32>, vector<64x128xf32>, vector<4x128xf32> -> vector<4x128xf32>
    %c0_76 = arith.constant 0 : index
    %c0_77 = arith.constant 0 : index
    %c0_78 = arith.constant 0 : index
    %211 = vector.load %arg4[%c0_76, %c0_77, %c0_78] : memref<2x1x128xf32, #tpu.memory_space<vmem>>, vector<1x1x128xf32>
    %212 = vector.shape_cast %211 : vector<1x1x128xf32> to vector<1x128xf32>
    %213 = vector.broadcast %212 : vector<1x128xf32> to vector<4x128xf32>
    %214 = arith.addf %210, %213 : vector<4x128xf32>
    %215 = vector.extract_strided_slice %214 {offsets = [0, 0], sizes = [4, 96], strides = [1, 1]} : vector<4x128xf32> to vector<4x96xf32>
    %216 = arith.negf %215 : vector<4x96xf32>
    %217 = math.exp %216 : vector<4x96xf32>
    %cst_79 = arith.constant 1.000000e+00 : f32
    %218 = vector.broadcast %cst_79 : f32 to vector<4x96xf32>
    %219 = arith.addf %218, %217 : vector<4x96xf32>
    %220 = arith.divf %218, %219 : vector<4x96xf32>
    %221 = vector.extract_strided_slice %214 {offsets = [0, 96], sizes = [4, 32], strides = [1, 1]} : vector<4x128xf32> to vector<4x32xf32>
    %222 = math.tanh %221 : vector<4x32xf32>
    %223 = vector.extract_strided_slice %220 {offsets = [0, 0], sizes = [4, 32], strides = [1, 1]} : vector<4x96xf32> to vector<4x32xf32>
    %224 = vector.extract_strided_slice %220 {offsets = [0, 32], sizes = [4, 32], strides = [1, 1]} : vector<4x96xf32> to vector<4x32xf32>
    %225 = vector.extract_strided_slice %220 {offsets = [0, 64], sizes = [4, 32], strides = [1, 1]} : vector<4x96xf32> to vector<4x32xf32>
    %226 = arith.mulf %224, %179 : vector<4x32xf32>
    %227 = arith.mulf %223, %222 : vector<4x32xf32>
    %228 = arith.addf %226, %227 : vector<4x32xf32>
    %229 = math.tanh %228 : vector<4x32xf32>
    %230 = arith.mulf %225, %229 : vector<4x32xf32>
    %231 = tpu.concatenate %230, %205 in 1 : vector<4x32xf32>, vector<4x32xf32> -> vector<4x64xf32>
    %c1_80 = arith.constant 1 : index
    %c0_81 = arith.constant 0 : index
    %c0_82 = arith.constant 0 : index
    %232 = vector.load %arg3[%c1_80, %c0_81, %c0_82] : memref<2x64x128xf32, #tpu.memory_space<vmem>>, vector<1x64x128xf32>
    %233 = vector.shape_cast %232 : vector<1x64x128xf32> to vector<64x128xf32>
    %cst_83 = arith.constant dense<0.000000e+00> : vector<4x128xf32>
    %234 = tpu.matmul %231, %233, %cst_83 {dimension_numbers = #tpu.dot_dimension_numbers<[1], [0], [0], [1], [0, 0, 1, 1], [], []>} : vector<4x64xf32>, vector<64x128xf32>, vector<4x128xf32> -> vector<4x128xf32>
    %c1_84 = arith.constant 1 : index
    %c0_85 = arith.constant 0 : index
    %c0_86 = arith.constant 0 : index
    %235 = vector.load %arg4[%c1_84, %c0_85, %c0_86] : memref<2x1x128xf32, #tpu.memory_space<vmem>>, vector<1x1x128xf32>
    %236 = vector.shape_cast %235 : vector<1x1x128xf32> to vector<1x128xf32>
    %237 = vector.broadcast %236 : vector<1x128xf32> to vector<4x128xf32>
    %238 = arith.addf %234, %237 : vector<4x128xf32>
    %239 = vector.extract_strided_slice %238 {offsets = [0, 0], sizes = [4, 96], strides = [1, 1]} : vector<4x128xf32> to vector<4x96xf32>
    %240 = arith.negf %239 : vector<4x96xf32>
    %241 = math.exp %240 : vector<4x96xf32>
    %cst_87 = arith.constant 1.000000e+00 : f32
    %242 = vector.broadcast %cst_87 : f32 to vector<4x96xf32>
    %243 = arith.addf %242, %241 : vector<4x96xf32>
    %244 = arith.divf %242, %243 : vector<4x96xf32>
    %245 = vector.extract_strided_slice %238 {offsets = [0, 96], sizes = [4, 32], strides = [1, 1]} : vector<4x128xf32> to vector<4x32xf32>
    %246 = math.tanh %245 : vector<4x32xf32>
    %247 = vector.extract_strided_slice %244 {offsets = [0, 0], sizes = [4, 32], strides = [1, 1]} : vector<4x96xf32> to vector<4x32xf32>
    %248 = vector.extract_strided_slice %244 {offsets = [0, 32], sizes = [4, 32], strides = [1, 1]} : vector<4x96xf32> to vector<4x32xf32>
    %249 = vector.extract_strided_slice %244 {offsets = [0, 64], sizes = [4, 32], strides = [1, 1]} : vector<4x96xf32> to vector<4x32xf32>
    %250 = arith.mulf %248, %203 : vector<4x32xf32>
    %251 = arith.mulf %247, %246 : vector<4x32xf32>
    %252 = arith.addf %250, %251 : vector<4x32xf32>
    %253 = math.tanh %252 : vector<4x32xf32>
    %254 = arith.mulf %249, %253 : vector<4x32xf32>
    %255 = vector.extract_strided_slice %5 {offsets = [20, 0], sizes = [4, 32], strides = [1, 1]} : vector<24x32xf32> to vector<4x32xf32>
    %256 = tpu.concatenate %255, %230 in 1 : vector<4x32xf32>, vector<4x32xf32> -> vector<4x64xf32>
    %c0_88 = arith.constant 0 : index
    %c0_89 = arith.constant 0 : index
    %c0_90 = arith.constant 0 : index
    %257 = vector.load %arg3[%c0_88, %c0_89, %c0_90] : memref<2x64x128xf32, #tpu.memory_space<vmem>>, vector<1x64x128xf32>
    %258 = vector.shape_cast %257 : vector<1x64x128xf32> to vector<64x128xf32>
    %cst_91 = arith.constant dense<0.000000e+00> : vector<4x128xf32>
    %259 = tpu.matmul %256, %258, %cst_91 {dimension_numbers = #tpu.dot_dimension_numbers<[1], [0], [0], [1], [0, 0, 1, 1], [], []>} : vector<4x64xf32>, vector<64x128xf32>, vector<4x128xf32> -> vector<4x128xf32>
    %c0_92 = arith.constant 0 : index
    %c0_93 = arith.constant 0 : index
    %c0_94 = arith.constant 0 : index
    %260 = vector.load %arg4[%c0_92, %c0_93, %c0_94] : memref<2x1x128xf32, #tpu.memory_space<vmem>>, vector<1x1x128xf32>
    %261 = vector.shape_cast %260 : vector<1x1x128xf32> to vector<1x128xf32>
    %262 = vector.broadcast %261 : vector<1x128xf32> to vector<4x128xf32>
    %263 = arith.addf %259, %262 : vector<4x128xf32>
    %264 = vector.extract_strided_slice %263 {offsets = [0, 0], sizes = [4, 96], strides = [1, 1]} : vector<4x128xf32> to vector<4x96xf32>
    %265 = arith.negf %264 : vector<4x96xf32>
    %266 = math.exp %265 : vector<4x96xf32>
    %cst_95 = arith.constant 1.000000e+00 : f32
    %267 = vector.broadcast %cst_95 : f32 to vector<4x96xf32>
    %268 = arith.addf %267, %266 : vector<4x96xf32>
    %269 = arith.divf %267, %268 : vector<4x96xf32>
    %270 = vector.extract_strided_slice %263 {offsets = [0, 96], sizes = [4, 32], strides = [1, 1]} : vector<4x128xf32> to vector<4x32xf32>
    %271 = math.tanh %270 : vector<4x32xf32>
    %272 = vector.extract_strided_slice %269 {offsets = [0, 0], sizes = [4, 32], strides = [1, 1]} : vector<4x96xf32> to vector<4x32xf32>
    %273 = vector.extract_strided_slice %269 {offsets = [0, 32], sizes = [4, 32], strides = [1, 1]} : vector<4x96xf32> to vector<4x32xf32>
    %274 = vector.extract_strided_slice %269 {offsets = [0, 64], sizes = [4, 32], strides = [1, 1]} : vector<4x96xf32> to vector<4x32xf32>
    %275 = arith.mulf %273, %228 : vector<4x32xf32>
    %276 = arith.mulf %272, %271 : vector<4x32xf32>
    %277 = arith.addf %275, %276 : vector<4x32xf32>
    %278 = math.tanh %277 : vector<4x32xf32>
    %279 = arith.mulf %274, %278 : vector<4x32xf32>
    %280 = tpu.concatenate %279, %254 in 1 : vector<4x32xf32>, vector<4x32xf32> -> vector<4x64xf32>
    %c1_96 = arith.constant 1 : index
    %c0_97 = arith.constant 0 : index
    %c0_98 = arith.constant 0 : index
    %281 = vector.load %arg3[%c1_96, %c0_97, %c0_98] : memref<2x64x128xf32, #tpu.memory_space<vmem>>, vector<1x64x128xf32>
    %282 = vector.shape_cast %281 : vector<1x64x128xf32> to vector<64x128xf32>
    %cst_99 = arith.constant dense<0.000000e+00> : vector<4x128xf32>
    %283 = tpu.matmul %280, %282, %cst_99 {dimension_numbers = #tpu.dot_dimension_numbers<[1], [0], [0], [1], [0, 0, 1, 1], [], []>} : vector<4x64xf32>, vector<64x128xf32>, vector<4x128xf32> -> vector<4x128xf32>
    %c1_100 = arith.constant 1 : index
    %c0_101 = arith.constant 0 : index
    %c0_102 = arith.constant 0 : index
    %284 = vector.load %arg4[%c1_100, %c0_101, %c0_102] : memref<2x1x128xf32, #tpu.memory_space<vmem>>, vector<1x1x128xf32>
    %285 = vector.shape_cast %284 : vector<1x1x128xf32> to vector<1x128xf32>
    %286 = vector.broadcast %285 : vector<1x128xf32> to vector<4x128xf32>
    %287 = arith.addf %283, %286 : vector<4x128xf32>
    %288 = vector.extract_strided_slice %287 {offsets = [0, 0], sizes = [4, 96], strides = [1, 1]} : vector<4x128xf32> to vector<4x96xf32>
    %289 = arith.negf %288 : vector<4x96xf32>
    %290 = math.exp %289 : vector<4x96xf32>
    %cst_103 = arith.constant 1.000000e+00 : f32
    %291 = vector.broadcast %cst_103 : f32 to vector<4x96xf32>
    %292 = arith.addf %291, %290 : vector<4x96xf32>
    %293 = arith.divf %291, %292 : vector<4x96xf32>
    %294 = vector.extract_strided_slice %287 {offsets = [0, 96], sizes = [4, 32], strides = [1, 1]} : vector<4x128xf32> to vector<4x32xf32>
    %295 = math.tanh %294 : vector<4x32xf32>
    %296 = vector.extract_strided_slice %293 {offsets = [0, 0], sizes = [4, 32], strides = [1, 1]} : vector<4x96xf32> to vector<4x32xf32>
    %297 = vector.extract_strided_slice %293 {offsets = [0, 32], sizes = [4, 32], strides = [1, 1]} : vector<4x96xf32> to vector<4x32xf32>
    %298 = vector.extract_strided_slice %293 {offsets = [0, 64], sizes = [4, 32], strides = [1, 1]} : vector<4x96xf32> to vector<4x32xf32>
    %299 = arith.mulf %297, %252 : vector<4x32xf32>
    %300 = arith.mulf %296, %295 : vector<4x32xf32>
    %301 = arith.addf %299, %300 : vector<4x32xf32>
    %302 = math.tanh %301 : vector<4x32xf32>
    %303 = arith.mulf %298, %302 : vector<4x32xf32>
    %304 = tpu.concatenate %58, %107, %156, %205, %254, %303 in 0 : vector<4x32xf32>, vector<4x32xf32>, vector<4x32xf32>, vector<4x32xf32>, vector<4x32xf32>, vector<4x32xf32> -> vector<24x32xf32>
    %c0_104 = arith.constant 0 : index
    %c0_105 = arith.constant 0 : index
    %305 = vector.load %arg5[%c0_104, %c0_105] : memref<32x16xf32, #tpu.memory_space<vmem>>, vector<32x16xf32>
    %cst_106 = arith.constant dense<0.000000e+00> : vector<24x16xf32>
    %306 = tpu.matmul %304, %305, %cst_106 {dimension_numbers = #tpu.dot_dimension_numbers<[1], [0], [0], [1], [0, 0, 1, 1], [], []>} : vector<24x32xf32>, vector<32x16xf32>, vector<24x16xf32> -> vector<24x16xf32>
    %c0_107 = arith.constant 0 : index
    %c0_108 = arith.constant 0 : index
    %307 = vector.load %arg6[%c0_107, %c0_108] : memref<1x16xf32, #tpu.memory_space<vmem>>, vector<1x16xf32>
    %308 = vector.broadcast %307 : vector<1x16xf32> to vector<24x16xf32>
    %309 = arith.addf %306, %308 : vector<24x16xf32>
    %c0_109 = arith.constant 0 : index
    %c0_110 = arith.constant 0 : index
    %310 = vector.load %arg7[%c0_109, %c0_110] : memref<16x32xf32, #tpu.memory_space<vmem>>, vector<16x32xf32>
    %cst_111 = arith.constant dense<0.000000e+00> : vector<24x32xf32>
    %311 = tpu.matmul %309, %310, %cst_111 {dimension_numbers = #tpu.dot_dimension_numbers<[1], [0], [0], [1], [0, 0, 1, 1], [], []>} : vector<24x16xf32>, vector<16x32xf32>, vector<24x32xf32> -> vector<24x32xf32>
    %c0_112 = arith.constant 0 : index
    %c0_113 = arith.constant 0 : index
    %312 = vector.load %arg8[%c0_112, %c0_113] : memref<1x32xf32, #tpu.memory_space<vmem>>, vector<1x32xf32>
    %313 = vector.broadcast %312 : vector<1x32xf32> to vector<24x32xf32>
    %314 = arith.addf %311, %313 : vector<24x32xf32>
    %cst_114 = arith.constant 0.000000e+00 : f32
    %315 = vector.broadcast %cst_114 : f32 to vector<4x32xf32>
    %cst_115 = arith.constant 0.000000e+00 : f32
    %316 = vector.broadcast %cst_115 : f32 to vector<4x32xf32>
    %cst_116 = arith.constant 0.000000e+00 : f32
    %317 = vector.broadcast %cst_116 : f32 to vector<4x32xf32>
    %cst_117 = arith.constant 0.000000e+00 : f32
    %318 = vector.broadcast %cst_117 : f32 to vector<4x32xf32>
    %319 = vector.extract_strided_slice %314 {offsets = [20, 0], sizes = [4, 32], strides = [1, 1]} : vector<24x32xf32> to vector<4x32xf32>
    %320 = tpu.concatenate %319, %315 in 1 : vector<4x32xf32>, vector<4x32xf32> -> vector<4x64xf32>
    %c0_118 = arith.constant 0 : index
    %c0_119 = arith.constant 0 : index
    %c0_120 = arith.constant 0 : index
    %321 = vector.load %arg9[%c0_118, %c0_119, %c0_120] : memref<2x64x128xf32, #tpu.memory_space<vmem>>, vector<1x64x128xf32>
    %322 = vector.shape_cast %321 : vector<1x64x128xf32> to vector<64x128xf32>
    %cst_121 = arith.constant dense<0.000000e+00> : vector<4x128xf32>
    %323 = tpu.matmul %320, %322, %cst_121 {dimension_numbers = #tpu.dot_dimension_numbers<[1], [0], [0], [1], [0, 0, 1, 1], [], []>} : vector<4x64xf32>, vector<64x128xf32>, vector<4x128xf32> -> vector<4x128xf32>
    %c0_122 = arith.constant 0 : index
    %c0_123 = arith.constant 0 : index
    %c0_124 = arith.constant 0 : index
    %324 = vector.load %arg10[%c0_122, %c0_123, %c0_124] : memref<2x1x128xf32, #tpu.memory_space<vmem>>, vector<1x1x128xf32>
    %325 = vector.shape_cast %324 : vector<1x1x128xf32> to vector<1x128xf32>
    %326 = vector.broadcast %325 : vector<1x128xf32> to vector<4x128xf32>
    %327 = arith.addf %323, %326 : vector<4x128xf32>
    %328 = vector.extract_strided_slice %327 {offsets = [0, 0], sizes = [4, 96], strides = [1, 1]} : vector<4x128xf32> to vector<4x96xf32>
    %329 = arith.negf %328 : vector<4x96xf32>
    %330 = math.exp %329 : vector<4x96xf32>
    %cst_125 = arith.constant 1.000000e+00 : f32
    %331 = vector.broadcast %cst_125 : f32 to vector<4x96xf32>
    %332 = arith.addf %331, %330 : vector<4x96xf32>
    %333 = arith.divf %331, %332 : vector<4x96xf32>
    %334 = vector.extract_strided_slice %327 {offsets = [0, 96], sizes = [4, 32], strides = [1, 1]} : vector<4x128xf32> to vector<4x32xf32>
    %335 = math.tanh %334 : vector<4x32xf32>
    %336 = vector.extract_strided_slice %333 {offsets = [0, 0], sizes = [4, 32], strides = [1, 1]} : vector<4x96xf32> to vector<4x32xf32>
    %337 = vector.extract_strided_slice %333 {offsets = [0, 32], sizes = [4, 32], strides = [1, 1]} : vector<4x96xf32> to vector<4x32xf32>
    %338 = vector.extract_strided_slice %333 {offsets = [0, 64], sizes = [4, 32], strides = [1, 1]} : vector<4x96xf32> to vector<4x32xf32>
    %339 = arith.mulf %337, %317 : vector<4x32xf32>
    %340 = arith.mulf %336, %335 : vector<4x32xf32>
    %341 = arith.addf %339, %340 : vector<4x32xf32>
    %342 = math.tanh %341 : vector<4x32xf32>
    %343 = arith.mulf %338, %342 : vector<4x32xf32>
    %344 = tpu.concatenate %343, %316 in 1 : vector<4x32xf32>, vector<4x32xf32> -> vector<4x64xf32>
    %c1_126 = arith.constant 1 : index
    %c0_127 = arith.constant 0 : index
    %c0_128 = arith.constant 0 : index
    %345 = vector.load %arg9[%c1_126, %c0_127, %c0_128] : memref<2x64x128xf32, #tpu.memory_space<vmem>>, vector<1x64x128xf32>
    %346 = vector.shape_cast %345 : vector<1x64x128xf32> to vector<64x128xf32>
    %cst_129 = arith.constant dense<0.000000e+00> : vector<4x128xf32>
    %347 = tpu.matmul %344, %346, %cst_129 {dimension_numbers = #tpu.dot_dimension_numbers<[1], [0], [0], [1], [0, 0, 1, 1], [], []>} : vector<4x64xf32>, vector<64x128xf32>, vector<4x128xf32> -> vector<4x128xf32>
    %c1_130 = arith.constant 1 : index
    %c0_131 = arith.constant 0 : index
    %c0_132 = arith.constant 0 : index
    %348 = vector.load %arg10[%c1_130, %c0_131, %c0_132] : memref<2x1x128xf32, #tpu.memory_space<vmem>>, vector<1x1x128xf32>
    %349 = vector.shape_cast %348 : vector<1x1x128xf32> to vector<1x128xf32>
    %350 = vector.broadcast %349 : vector<1x128xf32> to vector<4x128xf32>
    %351 = arith.addf %347, %350 : vector<4x128xf32>
    %352 = vector.extract_strided_slice %351 {offsets = [0, 0], sizes = [4, 96], strides = [1, 1]} : vector<4x128xf32> to vector<4x96xf32>
    %353 = arith.negf %352 : vector<4x96xf32>
    %354 = math.exp %353 : vector<4x96xf32>
    %cst_133 = arith.constant 1.000000e+00 : f32
    %355 = vector.broadcast %cst_133 : f32 to vector<4x96xf32>
    %356 = arith.addf %355, %354 : vector<4x96xf32>
    %357 = arith.divf %355, %356 : vector<4x96xf32>
    %358 = vector.extract_strided_slice %351 {offsets = [0, 96], sizes = [4, 32], strides = [1, 1]} : vector<4x128xf32> to vector<4x32xf32>
    %359 = math.tanh %358 : vector<4x32xf32>
    %360 = vector.extract_strided_slice %357 {offsets = [0, 0], sizes = [4, 32], strides = [1, 1]} : vector<4x96xf32> to vector<4x32xf32>
    %361 = vector.extract_strided_slice %357 {offsets = [0, 32], sizes = [4, 32], strides = [1, 1]} : vector<4x96xf32> to vector<4x32xf32>
    %362 = vector.extract_strided_slice %357 {offsets = [0, 64], sizes = [4, 32], strides = [1, 1]} : vector<4x96xf32> to vector<4x32xf32>
    %363 = arith.mulf %361, %318 : vector<4x32xf32>
    %364 = arith.mulf %360, %359 : vector<4x32xf32>
    %365 = arith.addf %363, %364 : vector<4x32xf32>
    %366 = math.tanh %365 : vector<4x32xf32>
    %367 = arith.mulf %362, %366 : vector<4x32xf32>
    %368 = vector.extract_strided_slice %314 {offsets = [16, 0], sizes = [4, 32], strides = [1, 1]} : vector<24x32xf32> to vector<4x32xf32>
    %369 = tpu.concatenate %368, %343 in 1 : vector<4x32xf32>, vector<4x32xf32> -> vector<4x64xf32>
    %c0_134 = arith.constant 0 : index
    %c0_135 = arith.constant 0 : index
    %c0_136 = arith.constant 0 : index
    %370 = vector.load %arg9[%c0_134, %c0_135, %c0_136] : memref<2x64x128xf32, #tpu.memory_space<vmem>>, vector<1x64x128xf32>
    %371 = vector.shape_cast %370 : vector<1x64x128xf32> to vector<64x128xf32>
    %cst_137 = arith.constant dense<0.000000e+00> : vector<4x128xf32>
    %372 = tpu.matmul %369, %371, %cst_137 {dimension_numbers = #tpu.dot_dimension_numbers<[1], [0], [0], [1], [0, 0, 1, 1], [], []>} : vector<4x64xf32>, vector<64x128xf32>, vector<4x128xf32> -> vector<4x128xf32>
    %c0_138 = arith.constant 0 : index
    %c0_139 = arith.constant 0 : index
    %c0_140 = arith.constant 0 : index
    %373 = vector.load %arg10[%c0_138, %c0_139, %c0_140] : memref<2x1x128xf32, #tpu.memory_space<vmem>>, vector<1x1x128xf32>
    %374 = vector.shape_cast %373 : vector<1x1x128xf32> to vector<1x128xf32>
    %375 = vector.broadcast %374 : vector<1x128xf32> to vector<4x128xf32>
    %376 = arith.addf %372, %375 : vector<4x128xf32>
    %377 = vector.extract_strided_slice %376 {offsets = [0, 0], sizes = [4, 96], strides = [1, 1]} : vector<4x128xf32> to vector<4x96xf32>
    %378 = arith.negf %377 : vector<4x96xf32>
    %379 = math.exp %378 : vector<4x96xf32>
    %cst_141 = arith.constant 1.000000e+00 : f32
    %380 = vector.broadcast %cst_141 : f32 to vector<4x96xf32>
    %381 = arith.addf %380, %379 : vector<4x96xf32>
    %382 = arith.divf %380, %381 : vector<4x96xf32>
    %383 = vector.extract_strided_slice %376 {offsets = [0, 96], sizes = [4, 32], strides = [1, 1]} : vector<4x128xf32> to vector<4x32xf32>
    %384 = math.tanh %383 : vector<4x32xf32>
    %385 = vector.extract_strided_slice %382 {offsets = [0, 0], sizes = [4, 32], strides = [1, 1]} : vector<4x96xf32> to vector<4x32xf32>
    %386 = vector.extract_strided_slice %382 {offsets = [0, 32], sizes = [4, 32], strides = [1, 1]} : vector<4x96xf32> to vector<4x32xf32>
    %387 = vector.extract_strided_slice %382 {offsets = [0, 64], sizes = [4, 32], strides = [1, 1]} : vector<4x96xf32> to vector<4x32xf32>
    %388 = arith.mulf %386, %341 : vector<4x32xf32>
    %389 = arith.mulf %385, %384 : vector<4x32xf32>
    %390 = arith.addf %388, %389 : vector<4x32xf32>
    %391 = math.tanh %390 : vector<4x32xf32>
    %392 = arith.mulf %387, %391 : vector<4x32xf32>
    %393 = tpu.concatenate %392, %367 in 1 : vector<4x32xf32>, vector<4x32xf32> -> vector<4x64xf32>
    %c1_142 = arith.constant 1 : index
    %c0_143 = arith.constant 0 : index
    %c0_144 = arith.constant 0 : index
    %394 = vector.load %arg9[%c1_142, %c0_143, %c0_144] : memref<2x64x128xf32, #tpu.memory_space<vmem>>, vector<1x64x128xf32>
    %395 = vector.shape_cast %394 : vector<1x64x128xf32> to vector<64x128xf32>
    %cst_145 = arith.constant dense<0.000000e+00> : vector<4x128xf32>
    %396 = tpu.matmul %393, %395, %cst_145 {dimension_numbers = #tpu.dot_dimension_numbers<[1], [0], [0], [1], [0, 0, 1, 1], [], []>} : vector<4x64xf32>, vector<64x128xf32>, vector<4x128xf32> -> vector<4x128xf32>
    %c1_146 = arith.constant 1 : index
    %c0_147 = arith.constant 0 : index
    %c0_148 = arith.constant 0 : index
    %397 = vector.load %arg10[%c1_146, %c0_147, %c0_148] : memref<2x1x128xf32, #tpu.memory_space<vmem>>, vector<1x1x128xf32>
    %398 = vector.shape_cast %397 : vector<1x1x128xf32> to vector<1x128xf32>
    %399 = vector.broadcast %398 : vector<1x128xf32> to vector<4x128xf32>
    %400 = arith.addf %396, %399 : vector<4x128xf32>
    %401 = vector.extract_strided_slice %400 {offsets = [0, 0], sizes = [4, 96], strides = [1, 1]} : vector<4x128xf32> to vector<4x96xf32>
    %402 = arith.negf %401 : vector<4x96xf32>
    %403 = math.exp %402 : vector<4x96xf32>
    %cst_149 = arith.constant 1.000000e+00 : f32
    %404 = vector.broadcast %cst_149 : f32 to vector<4x96xf32>
    %405 = arith.addf %404, %403 : vector<4x96xf32>
    %406 = arith.divf %404, %405 : vector<4x96xf32>
    %407 = vector.extract_strided_slice %400 {offsets = [0, 96], sizes = [4, 32], strides = [1, 1]} : vector<4x128xf32> to vector<4x32xf32>
    %408 = math.tanh %407 : vector<4x32xf32>
    %409 = vector.extract_strided_slice %406 {offsets = [0, 0], sizes = [4, 32], strides = [1, 1]} : vector<4x96xf32> to vector<4x32xf32>
    %410 = vector.extract_strided_slice %406 {offsets = [0, 32], sizes = [4, 32], strides = [1, 1]} : vector<4x96xf32> to vector<4x32xf32>
    %411 = vector.extract_strided_slice %406 {offsets = [0, 64], sizes = [4, 32], strides = [1, 1]} : vector<4x96xf32> to vector<4x32xf32>
    %412 = arith.mulf %410, %365 : vector<4x32xf32>
    %413 = arith.mulf %409, %408 : vector<4x32xf32>
    %414 = arith.addf %412, %413 : vector<4x32xf32>
    %415 = math.tanh %414 : vector<4x32xf32>
    %416 = arith.mulf %411, %415 : vector<4x32xf32>
    %417 = vector.extract_strided_slice %314 {offsets = [12, 0], sizes = [4, 32], strides = [1, 1]} : vector<24x32xf32> to vector<4x32xf32>
    %418 = tpu.concatenate %417, %392 in 1 : vector<4x32xf32>, vector<4x32xf32> -> vector<4x64xf32>
    %c0_150 = arith.constant 0 : index
    %c0_151 = arith.constant 0 : index
    %c0_152 = arith.constant 0 : index
    %419 = vector.load %arg9[%c0_150, %c0_151, %c0_152] : memref<2x64x128xf32, #tpu.memory_space<vmem>>, vector<1x64x128xf32>
    %420 = vector.shape_cast %419 : vector<1x64x128xf32> to vector<64x128xf32>
    %cst_153 = arith.constant dense<0.000000e+00> : vector<4x128xf32>
    %421 = tpu.matmul %418, %420, %cst_153 {dimension_numbers = #tpu.dot_dimension_numbers<[1], [0], [0], [1], [0, 0, 1, 1], [], []>} : vector<4x64xf32>, vector<64x128xf32>, vector<4x128xf32> -> vector<4x128xf32>
    %c0_154 = arith.constant 0 : index
    %c0_155 = arith.constant 0 : index
    %c0_156 = arith.constant 0 : index
    %422 = vector.load %arg10[%c0_154, %c0_155, %c0_156] : memref<2x1x128xf32, #tpu.memory_space<vmem>>, vector<1x1x128xf32>
    %423 = vector.shape_cast %422 : vector<1x1x128xf32> to vector<1x128xf32>
    %424 = vector.broadcast %423 : vector<1x128xf32> to vector<4x128xf32>
    %425 = arith.addf %421, %424 : vector<4x128xf32>
    %426 = vector.extract_strided_slice %425 {offsets = [0, 0], sizes = [4, 96], strides = [1, 1]} : vector<4x128xf32> to vector<4x96xf32>
    %427 = arith.negf %426 : vector<4x96xf32>
    %428 = math.exp %427 : vector<4x96xf32>
    %cst_157 = arith.constant 1.000000e+00 : f32
    %429 = vector.broadcast %cst_157 : f32 to vector<4x96xf32>
    %430 = arith.addf %429, %428 : vector<4x96xf32>
    %431 = arith.divf %429, %430 : vector<4x96xf32>
    %432 = vector.extract_strided_slice %425 {offsets = [0, 96], sizes = [4, 32], strides = [1, 1]} : vector<4x128xf32> to vector<4x32xf32>
    %433 = math.tanh %432 : vector<4x32xf32>
    %434 = vector.extract_strided_slice %431 {offsets = [0, 0], sizes = [4, 32], strides = [1, 1]} : vector<4x96xf32> to vector<4x32xf32>
    %435 = vector.extract_strided_slice %431 {offsets = [0, 32], sizes = [4, 32], strides = [1, 1]} : vector<4x96xf32> to vector<4x32xf32>
    %436 = vector.extract_strided_slice %431 {offsets = [0, 64], sizes = [4, 32], strides = [1, 1]} : vector<4x96xf32> to vector<4x32xf32>
    %437 = arith.mulf %435, %390 : vector<4x32xf32>
    %438 = arith.mulf %434, %433 : vector<4x32xf32>
    %439 = arith.addf %437, %438 : vector<4x32xf32>
    %440 = math.tanh %439 : vector<4x32xf32>
    %441 = arith.mulf %436, %440 : vector<4x32xf32>
    %442 = tpu.concatenate %441, %416 in 1 : vector<4x32xf32>, vector<4x32xf32> -> vector<4x64xf32>
    %c1_158 = arith.constant 1 : index
    %c0_159 = arith.constant 0 : index
    %c0_160 = arith.constant 0 : index
    %443 = vector.load %arg9[%c1_158, %c0_159, %c0_160] : memref<2x64x128xf32, #tpu.memory_space<vmem>>, vector<1x64x128xf32>
    %444 = vector.shape_cast %443 : vector<1x64x128xf32> to vector<64x128xf32>
    %cst_161 = arith.constant dense<0.000000e+00> : vector<4x128xf32>
    %445 = tpu.matmul %442, %444, %cst_161 {dimension_numbers = #tpu.dot_dimension_numbers<[1], [0], [0], [1], [0, 0, 1, 1], [], []>} : vector<4x64xf32>, vector<64x128xf32>, vector<4x128xf32> -> vector<4x128xf32>
    %c1_162 = arith.constant 1 : index
    %c0_163 = arith.constant 0 : index
    %c0_164 = arith.constant 0 : index
    %446 = vector.load %arg10[%c1_162, %c0_163, %c0_164] : memref<2x1x128xf32, #tpu.memory_space<vmem>>, vector<1x1x128xf32>
    %447 = vector.shape_cast %446 : vector<1x1x128xf32> to vector<1x128xf32>
    %448 = vector.broadcast %447 : vector<1x128xf32> to vector<4x128xf32>
    %449 = arith.addf %445, %448 : vector<4x128xf32>
    %450 = vector.extract_strided_slice %449 {offsets = [0, 0], sizes = [4, 96], strides = [1, 1]} : vector<4x128xf32> to vector<4x96xf32>
    %451 = arith.negf %450 : vector<4x96xf32>
    %452 = math.exp %451 : vector<4x96xf32>
    %cst_165 = arith.constant 1.000000e+00 : f32
    %453 = vector.broadcast %cst_165 : f32 to vector<4x96xf32>
    %454 = arith.addf %453, %452 : vector<4x96xf32>
    %455 = arith.divf %453, %454 : vector<4x96xf32>
    %456 = vector.extract_strided_slice %449 {offsets = [0, 96], sizes = [4, 32], strides = [1, 1]} : vector<4x128xf32> to vector<4x32xf32>
    %457 = math.tanh %456 : vector<4x32xf32>
    %458 = vector.extract_strided_slice %455 {offsets = [0, 0], sizes = [4, 32], strides = [1, 1]} : vector<4x96xf32> to vector<4x32xf32>
    %459 = vector.extract_strided_slice %455 {offsets = [0, 32], sizes = [4, 32], strides = [1, 1]} : vector<4x96xf32> to vector<4x32xf32>
    %460 = vector.extract_strided_slice %455 {offsets = [0, 64], sizes = [4, 32], strides = [1, 1]} : vector<4x96xf32> to vector<4x32xf32>
    %461 = arith.mulf %459, %414 : vector<4x32xf32>
    %462 = arith.mulf %458, %457 : vector<4x32xf32>
    %463 = arith.addf %461, %462 : vector<4x32xf32>
    %464 = math.tanh %463 : vector<4x32xf32>
    %465 = arith.mulf %460, %464 : vector<4x32xf32>
    %466 = vector.extract_strided_slice %314 {offsets = [8, 0], sizes = [4, 32], strides = [1, 1]} : vector<24x32xf32> to vector<4x32xf32>
    %467 = tpu.concatenate %466, %441 in 1 : vector<4x32xf32>, vector<4x32xf32> -> vector<4x64xf32>
    %c0_166 = arith.constant 0 : index
    %c0_167 = arith.constant 0 : index
    %c0_168 = arith.constant 0 : index
    %468 = vector.load %arg9[%c0_166, %c0_167, %c0_168] : memref<2x64x128xf32, #tpu.memory_space<vmem>>, vector<1x64x128xf32>
    %469 = vector.shape_cast %468 : vector<1x64x128xf32> to vector<64x128xf32>
    %cst_169 = arith.constant dense<0.000000e+00> : vector<4x128xf32>
    %470 = tpu.matmul %467, %469, %cst_169 {dimension_numbers = #tpu.dot_dimension_numbers<[1], [0], [0], [1], [0, 0, 1, 1], [], []>} : vector<4x64xf32>, vector<64x128xf32>, vector<4x128xf32> -> vector<4x128xf32>
    %c0_170 = arith.constant 0 : index
    %c0_171 = arith.constant 0 : index
    %c0_172 = arith.constant 0 : index
    %471 = vector.load %arg10[%c0_170, %c0_171, %c0_172] : memref<2x1x128xf32, #tpu.memory_space<vmem>>, vector<1x1x128xf32>
    %472 = vector.shape_cast %471 : vector<1x1x128xf32> to vector<1x128xf32>
    %473 = vector.broadcast %472 : vector<1x128xf32> to vector<4x128xf32>
    %474 = arith.addf %470, %473 : vector<4x128xf32>
    %475 = vector.extract_strided_slice %474 {offsets = [0, 0], sizes = [4, 96], strides = [1, 1]} : vector<4x128xf32> to vector<4x96xf32>
    %476 = arith.negf %475 : vector<4x96xf32>
    %477 = math.exp %476 : vector<4x96xf32>
    %cst_173 = arith.constant 1.000000e+00 : f32
    %478 = vector.broadcast %cst_173 : f32 to vector<4x96xf32>
    %479 = arith.addf %478, %477 : vector<4x96xf32>
    %480 = arith.divf %478, %479 : vector<4x96xf32>
    %481 = vector.extract_strided_slice %474 {offsets = [0, 96], sizes = [4, 32], strides = [1, 1]} : vector<4x128xf32> to vector<4x32xf32>
    %482 = math.tanh %481 : vector<4x32xf32>
    %483 = vector.extract_strided_slice %480 {offsets = [0, 0], sizes = [4, 32], strides = [1, 1]} : vector<4x96xf32> to vector<4x32xf32>
    %484 = vector.extract_strided_slice %480 {offsets = [0, 32], sizes = [4, 32], strides = [1, 1]} : vector<4x96xf32> to vector<4x32xf32>
    %485 = vector.extract_strided_slice %480 {offsets = [0, 64], sizes = [4, 32], strides = [1, 1]} : vector<4x96xf32> to vector<4x32xf32>
    %486 = arith.mulf %484, %439 : vector<4x32xf32>
    %487 = arith.mulf %483, %482 : vector<4x32xf32>
    %488 = arith.addf %486, %487 : vector<4x32xf32>
    %489 = math.tanh %488 : vector<4x32xf32>
    %490 = arith.mulf %485, %489 : vector<4x32xf32>
    %491 = tpu.concatenate %490, %465 in 1 : vector<4x32xf32>, vector<4x32xf32> -> vector<4x64xf32>
    %c1_174 = arith.constant 1 : index
    %c0_175 = arith.constant 0 : index
    %c0_176 = arith.constant 0 : index
    %492 = vector.load %arg9[%c1_174, %c0_175, %c0_176] : memref<2x64x128xf32, #tpu.memory_space<vmem>>, vector<1x64x128xf32>
    %493 = vector.shape_cast %492 : vector<1x64x128xf32> to vector<64x128xf32>
    %cst_177 = arith.constant dense<0.000000e+00> : vector<4x128xf32>
    %494 = tpu.matmul %491, %493, %cst_177 {dimension_numbers = #tpu.dot_dimension_numbers<[1], [0], [0], [1], [0, 0, 1, 1], [], []>} : vector<4x64xf32>, vector<64x128xf32>, vector<4x128xf32> -> vector<4x128xf32>
    %c1_178 = arith.constant 1 : index
    %c0_179 = arith.constant 0 : index
    %c0_180 = arith.constant 0 : index
    %495 = vector.load %arg10[%c1_178, %c0_179, %c0_180] : memref<2x1x128xf32, #tpu.memory_space<vmem>>, vector<1x1x128xf32>
    %496 = vector.shape_cast %495 : vector<1x1x128xf32> to vector<1x128xf32>
    %497 = vector.broadcast %496 : vector<1x128xf32> to vector<4x128xf32>
    %498 = arith.addf %494, %497 : vector<4x128xf32>
    %499 = vector.extract_strided_slice %498 {offsets = [0, 0], sizes = [4, 96], strides = [1, 1]} : vector<4x128xf32> to vector<4x96xf32>
    %500 = arith.negf %499 : vector<4x96xf32>
    %501 = math.exp %500 : vector<4x96xf32>
    %cst_181 = arith.constant 1.000000e+00 : f32
    %502 = vector.broadcast %cst_181 : f32 to vector<4x96xf32>
    %503 = arith.addf %502, %501 : vector<4x96xf32>
    %504 = arith.divf %502, %503 : vector<4x96xf32>
    %505 = vector.extract_strided_slice %498 {offsets = [0, 96], sizes = [4, 32], strides = [1, 1]} : vector<4x128xf32> to vector<4x32xf32>
    %506 = math.tanh %505 : vector<4x32xf32>
    %507 = vector.extract_strided_slice %504 {offsets = [0, 0], sizes = [4, 32], strides = [1, 1]} : vector<4x96xf32> to vector<4x32xf32>
    %508 = vector.extract_strided_slice %504 {offsets = [0, 32], sizes = [4, 32], strides = [1, 1]} : vector<4x96xf32> to vector<4x32xf32>
    %509 = vector.extract_strided_slice %504 {offsets = [0, 64], sizes = [4, 32], strides = [1, 1]} : vector<4x96xf32> to vector<4x32xf32>
    %510 = arith.mulf %508, %463 : vector<4x32xf32>
    %511 = arith.mulf %507, %506 : vector<4x32xf32>
    %512 = arith.addf %510, %511 : vector<4x32xf32>
    %513 = math.tanh %512 : vector<4x32xf32>
    %514 = arith.mulf %509, %513 : vector<4x32xf32>
    %515 = vector.extract_strided_slice %314 {offsets = [4, 0], sizes = [4, 32], strides = [1, 1]} : vector<24x32xf32> to vector<4x32xf32>
    %516 = tpu.concatenate %515, %490 in 1 : vector<4x32xf32>, vector<4x32xf32> -> vector<4x64xf32>
    %c0_182 = arith.constant 0 : index
    %c0_183 = arith.constant 0 : index
    %c0_184 = arith.constant 0 : index
    %517 = vector.load %arg9[%c0_182, %c0_183, %c0_184] : memref<2x64x128xf32, #tpu.memory_space<vmem>>, vector<1x64x128xf32>
    %518 = vector.shape_cast %517 : vector<1x64x128xf32> to vector<64x128xf32>
    %cst_185 = arith.constant dense<0.000000e+00> : vector<4x128xf32>
    %519 = tpu.matmul %516, %518, %cst_185 {dimension_numbers = #tpu.dot_dimension_numbers<[1], [0], [0], [1], [0, 0, 1, 1], [], []>} : vector<4x64xf32>, vector<64x128xf32>, vector<4x128xf32> -> vector<4x128xf32>
    %c0_186 = arith.constant 0 : index
    %c0_187 = arith.constant 0 : index
    %c0_188 = arith.constant 0 : index
    %520 = vector.load %arg10[%c0_186, %c0_187, %c0_188] : memref<2x1x128xf32, #tpu.memory_space<vmem>>, vector<1x1x128xf32>
    %521 = vector.shape_cast %520 : vector<1x1x128xf32> to vector<1x128xf32>
    %522 = vector.broadcast %521 : vector<1x128xf32> to vector<4x128xf32>
    %523 = arith.addf %519, %522 : vector<4x128xf32>
    %524 = vector.extract_strided_slice %523 {offsets = [0, 0], sizes = [4, 96], strides = [1, 1]} : vector<4x128xf32> to vector<4x96xf32>
    %525 = arith.negf %524 : vector<4x96xf32>
    %526 = math.exp %525 : vector<4x96xf32>
    %cst_189 = arith.constant 1.000000e+00 : f32
    %527 = vector.broadcast %cst_189 : f32 to vector<4x96xf32>
    %528 = arith.addf %527, %526 : vector<4x96xf32>
    %529 = arith.divf %527, %528 : vector<4x96xf32>
    %530 = vector.extract_strided_slice %523 {offsets = [0, 96], sizes = [4, 32], strides = [1, 1]} : vector<4x128xf32> to vector<4x32xf32>
    %531 = math.tanh %530 : vector<4x32xf32>
    %532 = vector.extract_strided_slice %529 {offsets = [0, 0], sizes = [4, 32], strides = [1, 1]} : vector<4x96xf32> to vector<4x32xf32>
    %533 = vector.extract_strided_slice %529 {offsets = [0, 32], sizes = [4, 32], strides = [1, 1]} : vector<4x96xf32> to vector<4x32xf32>
    %534 = vector.extract_strided_slice %529 {offsets = [0, 64], sizes = [4, 32], strides = [1, 1]} : vector<4x96xf32> to vector<4x32xf32>
    %535 = arith.mulf %533, %488 : vector<4x32xf32>
    %536 = arith.mulf %532, %531 : vector<4x32xf32>
    %537 = arith.addf %535, %536 : vector<4x32xf32>
    %538 = math.tanh %537 : vector<4x32xf32>
    %539 = arith.mulf %534, %538 : vector<4x32xf32>
    %540 = tpu.concatenate %539, %514 in 1 : vector<4x32xf32>, vector<4x32xf32> -> vector<4x64xf32>
    %c1_190 = arith.constant 1 : index
    %c0_191 = arith.constant 0 : index
    %c0_192 = arith.constant 0 : index
    %541 = vector.load %arg9[%c1_190, %c0_191, %c0_192] : memref<2x64x128xf32, #tpu.memory_space<vmem>>, vector<1x64x128xf32>
    %542 = vector.shape_cast %541 : vector<1x64x128xf32> to vector<64x128xf32>
    %cst_193 = arith.constant dense<0.000000e+00> : vector<4x128xf32>
    %543 = tpu.matmul %540, %542, %cst_193 {dimension_numbers = #tpu.dot_dimension_numbers<[1], [0], [0], [1], [0, 0, 1, 1], [], []>} : vector<4x64xf32>, vector<64x128xf32>, vector<4x128xf32> -> vector<4x128xf32>
    %c1_194 = arith.constant 1 : index
    %c0_195 = arith.constant 0 : index
    %c0_196 = arith.constant 0 : index
    %544 = vector.load %arg10[%c1_194, %c0_195, %c0_196] : memref<2x1x128xf32, #tpu.memory_space<vmem>>, vector<1x1x128xf32>
    %545 = vector.shape_cast %544 : vector<1x1x128xf32> to vector<1x128xf32>
    %546 = vector.broadcast %545 : vector<1x128xf32> to vector<4x128xf32>
    %547 = arith.addf %543, %546 : vector<4x128xf32>
    %548 = vector.extract_strided_slice %547 {offsets = [0, 0], sizes = [4, 96], strides = [1, 1]} : vector<4x128xf32> to vector<4x96xf32>
    %549 = arith.negf %548 : vector<4x96xf32>
    %550 = math.exp %549 : vector<4x96xf32>
    %cst_197 = arith.constant 1.000000e+00 : f32
    %551 = vector.broadcast %cst_197 : f32 to vector<4x96xf32>
    %552 = arith.addf %551, %550 : vector<4x96xf32>
    %553 = arith.divf %551, %552 : vector<4x96xf32>
    %554 = vector.extract_strided_slice %547 {offsets = [0, 96], sizes = [4, 32], strides = [1, 1]} : vector<4x128xf32> to vector<4x32xf32>
    %555 = math.tanh %554 : vector<4x32xf32>
    %556 = vector.extract_strided_slice %553 {offsets = [0, 0], sizes = [4, 32], strides = [1, 1]} : vector<4x96xf32> to vector<4x32xf32>
    %557 = vector.extract_strided_slice %553 {offsets = [0, 32], sizes = [4, 32], strides = [1, 1]} : vector<4x96xf32> to vector<4x32xf32>
    %558 = vector.extract_strided_slice %553 {offsets = [0, 64], sizes = [4, 32], strides = [1, 1]} : vector<4x96xf32> to vector<4x32xf32>
    %559 = arith.mulf %557, %512 : vector<4x32xf32>
    %560 = arith.mulf %556, %555 : vector<4x32xf32>
    %561 = arith.addf %559, %560 : vector<4x32xf32>
    %562 = math.tanh %561 : vector<4x32xf32>
    %563 = arith.mulf %558, %562 : vector<4x32xf32>
    %564 = vector.extract_strided_slice %314 {offsets = [0, 0], sizes = [4, 32], strides = [1, 1]} : vector<24x32xf32> to vector<4x32xf32>
    %565 = tpu.concatenate %564, %539 in 1 : vector<4x32xf32>, vector<4x32xf32> -> vector<4x64xf32>
    %c0_198 = arith.constant 0 : index
    %c0_199 = arith.constant 0 : index
    %c0_200 = arith.constant 0 : index
    %566 = vector.load %arg9[%c0_198, %c0_199, %c0_200] : memref<2x64x128xf32, #tpu.memory_space<vmem>>, vector<1x64x128xf32>
    %567 = vector.shape_cast %566 : vector<1x64x128xf32> to vector<64x128xf32>
    %cst_201 = arith.constant dense<0.000000e+00> : vector<4x128xf32>
    %568 = tpu.matmul %565, %567, %cst_201 {dimension_numbers = #tpu.dot_dimension_numbers<[1], [0], [0], [1], [0, 0, 1, 1], [], []>} : vector<4x64xf32>, vector<64x128xf32>, vector<4x128xf32> -> vector<4x128xf32>
    %c0_202 = arith.constant 0 : index
    %c0_203 = arith.constant 0 : index
    %c0_204 = arith.constant 0 : index
    %569 = vector.load %arg10[%c0_202, %c0_203, %c0_204] : memref<2x1x128xf32, #tpu.memory_space<vmem>>, vector<1x1x128xf32>
    %570 = vector.shape_cast %569 : vector<1x1x128xf32> to vector<1x128xf32>
    %571 = vector.broadcast %570 : vector<1x128xf32> to vector<4x128xf32>
    %572 = arith.addf %568, %571 : vector<4x128xf32>
    %573 = vector.extract_strided_slice %572 {offsets = [0, 0], sizes = [4, 96], strides = [1, 1]} : vector<4x128xf32> to vector<4x96xf32>
    %574 = arith.negf %573 : vector<4x96xf32>
    %575 = math.exp %574 : vector<4x96xf32>
    %cst_205 = arith.constant 1.000000e+00 : f32
    %576 = vector.broadcast %cst_205 : f32 to vector<4x96xf32>
    %577 = arith.addf %576, %575 : vector<4x96xf32>
    %578 = arith.divf %576, %577 : vector<4x96xf32>
    %579 = vector.extract_strided_slice %572 {offsets = [0, 96], sizes = [4, 32], strides = [1, 1]} : vector<4x128xf32> to vector<4x32xf32>
    %580 = math.tanh %579 : vector<4x32xf32>
    %581 = vector.extract_strided_slice %578 {offsets = [0, 0], sizes = [4, 32], strides = [1, 1]} : vector<4x96xf32> to vector<4x32xf32>
    %582 = vector.extract_strided_slice %578 {offsets = [0, 32], sizes = [4, 32], strides = [1, 1]} : vector<4x96xf32> to vector<4x32xf32>
    %583 = vector.extract_strided_slice %578 {offsets = [0, 64], sizes = [4, 32], strides = [1, 1]} : vector<4x96xf32> to vector<4x32xf32>
    %584 = arith.mulf %582, %537 : vector<4x32xf32>
    %585 = arith.mulf %581, %580 : vector<4x32xf32>
    %586 = arith.addf %584, %585 : vector<4x32xf32>
    %587 = math.tanh %586 : vector<4x32xf32>
    %588 = arith.mulf %583, %587 : vector<4x32xf32>
    %589 = tpu.concatenate %588, %563 in 1 : vector<4x32xf32>, vector<4x32xf32> -> vector<4x64xf32>
    %c1_206 = arith.constant 1 : index
    %c0_207 = arith.constant 0 : index
    %c0_208 = arith.constant 0 : index
    %590 = vector.load %arg9[%c1_206, %c0_207, %c0_208] : memref<2x64x128xf32, #tpu.memory_space<vmem>>, vector<1x64x128xf32>
    %591 = vector.shape_cast %590 : vector<1x64x128xf32> to vector<64x128xf32>
    %cst_209 = arith.constant dense<0.000000e+00> : vector<4x128xf32>
    %592 = tpu.matmul %589, %591, %cst_209 {dimension_numbers = #tpu.dot_dimension_numbers<[1], [0], [0], [1], [0, 0, 1, 1], [], []>} : vector<4x64xf32>, vector<64x128xf32>, vector<4x128xf32> -> vector<4x128xf32>
    %c1_210 = arith.constant 1 : index
    %c0_211 = arith.constant 0 : index
    %c0_212 = arith.constant 0 : index
    %593 = vector.load %arg10[%c1_210, %c0_211, %c0_212] : memref<2x1x128xf32, #tpu.memory_space<vmem>>, vector<1x1x128xf32>
    %594 = vector.shape_cast %593 : vector<1x1x128xf32> to vector<1x128xf32>
    %595 = vector.broadcast %594 : vector<1x128xf32> to vector<4x128xf32>
    %596 = arith.addf %592, %595 : vector<4x128xf32>
    %597 = vector.extract_strided_slice %596 {offsets = [0, 0], sizes = [4, 96], strides = [1, 1]} : vector<4x128xf32> to vector<4x96xf32>
    %598 = arith.negf %597 : vector<4x96xf32>
    %599 = math.exp %598 : vector<4x96xf32>
    %cst_213 = arith.constant 1.000000e+00 : f32
    %600 = vector.broadcast %cst_213 : f32 to vector<4x96xf32>
    %601 = arith.addf %600, %599 : vector<4x96xf32>
    %602 = arith.divf %600, %601 : vector<4x96xf32>
    %603 = vector.extract_strided_slice %596 {offsets = [0, 96], sizes = [4, 32], strides = [1, 1]} : vector<4x128xf32> to vector<4x32xf32>
    %604 = math.tanh %603 : vector<4x32xf32>
    %605 = vector.extract_strided_slice %602 {offsets = [0, 0], sizes = [4, 32], strides = [1, 1]} : vector<4x96xf32> to vector<4x32xf32>
    %606 = vector.extract_strided_slice %602 {offsets = [0, 32], sizes = [4, 32], strides = [1, 1]} : vector<4x96xf32> to vector<4x32xf32>
    %607 = vector.extract_strided_slice %602 {offsets = [0, 64], sizes = [4, 32], strides = [1, 1]} : vector<4x96xf32> to vector<4x32xf32>
    %608 = arith.mulf %606, %561 : vector<4x32xf32>
    %609 = arith.mulf %605, %604 : vector<4x32xf32>
    %610 = arith.addf %608, %609 : vector<4x32xf32>
    %611 = math.tanh %610 : vector<4x32xf32>
    %612 = arith.mulf %607, %611 : vector<4x32xf32>
    %613 = tpu.concatenate %612, %563, %514, %465, %416, %367 in 0 : vector<4x32xf32>, vector<4x32xf32>, vector<4x32xf32>, vector<4x32xf32>, vector<4x32xf32>, vector<4x32xf32> -> vector<24x32xf32>
    %c0_214 = arith.constant 0 : index
    %c0_215 = arith.constant 0 : index
    %614 = vector.load %arg11[%c0_214, %c0_215] : memref<32x16xf32, #tpu.memory_space<vmem>>, vector<32x16xf32>
    %cst_216 = arith.constant dense<0.000000e+00> : vector<24x16xf32>
    %615 = tpu.matmul %613, %614, %cst_216 {dimension_numbers = #tpu.dot_dimension_numbers<[1], [0], [0], [1], [0, 0, 1, 1], [], []>} : vector<24x32xf32>, vector<32x16xf32>, vector<24x16xf32> -> vector<24x16xf32>
    %c0_217 = arith.constant 0 : index
    %c0_218 = arith.constant 0 : index
    %616 = vector.load %arg12[%c0_217, %c0_218] : memref<1x16xf32, #tpu.memory_space<vmem>>, vector<1x16xf32>
    %617 = vector.broadcast %616 : vector<1x16xf32> to vector<24x16xf32>
    %618 = arith.addf %615, %617 : vector<24x16xf32>
    %c0_219 = arith.constant 0 : index
    %c0_220 = arith.constant 0 : index
    %619 = vector.load %arg13[%c0_219, %c0_220] : memref<24x16xf32, #tpu.memory_space<vmem>>, vector<24x16xf32>
    tpu.vector_store %arg13[%c0_219, %c0_220], %618 {strides = array<i32>} : memref<24x16xf32, #tpu.memory_space<vmem>>, vector<24x16xf32>,
    return
  }
}

</mosaic_0001>

<bundles_post_ra>
// kernel: bidirectional_lstm.1
= control target key start
LH: loop header
LB: loop body
LE: loop exit
PB: predicated region body
PF: predicated region fallthrough
CT: control target
= control target key end

     0   :  { %vm53_vm0 = vcmask 64512   ;;  %s3092_s0 = inlined_call_operand.vmem [shape: f32[24,8], index: 0, kind: input, shape index: {}]   ;;  %s3093_s1 = inlined_call_operand.vmem [shape: f32[8,32], index: 1, kind: input, shape index: {}]   ;;  %s3094_s2 = inlined_call_operand.vmem [shape: f32[1,32], index: 2, kind: input, shape index: {}]   ;;  %s3095_s3 = inlined_call_operand.vmem [shape: f32[2,64,128], index: 3, kind: input, shape index: {}]   ;;  %s3096_s4 = inlined_call_operand.vmem [shape: f32[2,1,128], index: 4, kind: input, shape index: {}]   ;;  %s3097_s5 = inlined_call_operand.vmem [shape: f32[32,16], index: 5, kind: input, shape index: {}]   ;;  %s3098_s6 = inlined_call_operand.vmem [shape: f32[1,16], index: 6, kind: input, shape index: {}]   ;;  %s3099_s7 = inlined_call_operand.vmem [shape: f32[16,32], index: 7, kind: input, shape index: {}]   ;;  %s3100_s8 = inlined_call_operand.vmem [shape: f32[1,32], index: 8, kind: input, shape index: {}]   ;;  %s3101_s9 = inlined_call_operand.vmem [shape: f32[2,64,128], index: 9, kind: input, shape index: {}]   ;;  %s3102_s10 = inlined_call_operand.vmem [shape: f32[2,1,128], index: 10, kind: input, shape index: {}]   ;;  %s3103_s11 = inlined_call_operand.vmem [shape: f32[32,16], index: 11, kind: input, shape index: {}]   ;;  %s3104_s12 = inlined_call_operand.vmem [shape: f32[1,16], index: 12, kind: input, shape index: {}]   ;;  %s3105_s13 = inlined_call_operand.hbm [shape: f32[24,16], index: 13, kind: output, shape index: {}]  }
   0x1   :  { %v48_v0 = vld [vmem:[%s3093_s1] sm:$0xff]  ;;  %v2316_v2 = vld [vmem:[%s3095_s3 + $0x38] sm:$0xff]  ;;  %v2322_v3 = vld [vmem:[%s3095_s3 + $0x30] sm:$0xff] }
   0x2   :  { %v45_v1 = vld [vmem:[%s3092_s0] sm:$0xff]  ;;  %78 = vmatpush.msra.mxu0 %v48_v0  ;;  %115 = vmatpush.msra.mxu1 %v2316_v2  ;;  %v2328_v4 = vld [vmem:[%s3095_s3 + $0x28] sm:$0xff] }
   0x3   :  { %1917 = vmatmul.msk.f32.vlgmr.msra.gmra.mxu0 %vm53_vm0, %v45_v1  ;;  %260 = vmatpush.msra.mxu3 %v2316_v2  ;;  %v2335_v5 = vld [vmem:[%s3095_s3 + $0x20] sm:$0xff] }
   0x4   :  { %116 = vmatpush.msra.mxu1 %v2322_v3 }
   0x5   :  { %261 = vmatpush.msra.mxu3 %v2322_v3 }
   0x6   :  { %117 = vmatpush.msra.mxu1 %v2328_v4 }
   0x7   :  { %18 = vsyncpa [#allocation3], 0  ;;  %v2342_v6 = vld [vmem:[%s3095_s3 + $0x18] sm:$0xff]  ;;  %262 = vmatpush.msra.mxu3 %v2328_v4  ;;  %v2349_v7 = vld [vmem:[%s3095_s3 + $0x10] sm:$0xff]  ;;  %vm89_vm1 = vcmask 261120   ;;  %vm103_vm2 = vcmask 523264  }
   0x8   :  { %118 = vmatpush.msra.mxu1 %v2335_v5  ;;  %v2359_v8 = vld [vmem:[%s3095_s3 + $0x8] sm:$0xff]  ;;  %v2365_v9 = vld [vmem:[%s3095_s3] sm:$0xff]  ;;  %s2231_s30 = smov 32   ;;  %v2420_v37 = vld [vmem:[%s3095_s3 + $0x78] sm:$0xff]  ;;  %s2232_s27 = smov 64  }
   0x9   :  { %263 = vmatpush.msra.mxu3 %v2335_v5  ;;  %v2389_v10 = vld [vmem:[%s3094_s2] ss:$0 sm:$0xff]  ;;  %v2425_v38 = vld [vmem:[%s3095_s3 + $0x70] sm:$0xff]  ;;  %194 = vmatpush.msra.mxu2 %v2420_v37  ;;  %v2432_v39 = vld [vmem:[%s3095_s3 + $0x68] sm:$0xff]  ;;  %s2233_s28 = smov 96  }
   0xa   :  { %119 = vmatpush.msra.mxu1 %v2342_v6  ;;  %v2408_v14 = vld [vmem:[%s3096_s4] ss:$0 sm:$0xff]  ;;  %329 = vmatpush.msrb.mxu0 %v2420_v37  ;;  %v2446_v41 = vld [vmem:[%s3095_s3 + $0x58] sm:$0xff]  ;;  %v2453_v42 = vld [vmem:[%s3095_s3 + $0x50] sm:$0xff] }
   0xb   :  { %264 = vmatpush.msra.mxu3 %v2342_v6  ;;  %195 = vmatpush.msra.mxu2 %v2425_v38  ;;  %v2439_v40 = vld [vmem:[%s3095_s3 + $0x60] sm:$0xff]  ;;  %v2460_v43 = vld [vmem:[%s3095_s3 + $0x48] sm:$0xff] }
   0xc   :  { %120 = vmatpush.msra.mxu1 %v2349_v7  ;;  %330 = vmatpush.msrb.mxu0 %v2425_v38  ;;  %v2471_v47 = vld [vmem:[%s3095_s3 + $0x40] sm:$0xff] }
   0xd   :  { %265 = vmatpush.msra.mxu3 %v2349_v7  ;;  %196 = vmatpush.msra.mxu2 %v2432_v39  ;;  %v2515_v53 = vld [vmem:[%s3096_s4 + $0x1] ss:$0 sm:$0xff] }
   0xe   :  { %121 = vmatpush.msra.mxu1 %v2359_v8  ;;  %331 = vmatpush.msrb.mxu0 %v2432_v39 }
   0xf   :  { %266 = vmatpush.msra.mxu3 %v2359_v8  ;;  %197 = vmatpush.msra.mxu2 %v2439_v40 }
  0x10   :  { %122 = vmatpush.msra.mxu1 %v2365_v9  ;;  %332 = vmatpush.msrb.mxu0 %v2439_v40 }
  0x11   :  { %267 = vmatpush.msra.mxu3 %v2365_v9  ;;  %198 = vmatpush.msra.mxu2 %v2446_v41 }
  0x12   :  { %393 = vmatpush.msrb.mxu1 %v2316_v2  ;;  %333 = vmatpush.msrb.mxu0 %v2446_v41 }
  0x13   :  { %528 = vmatpush.msrb.mxu3 %v2316_v2  ;;  %199 = vmatpush.msra.mxu2 %v2453_v42 }
  0x14   :  { %394 = vmatpush.msrb.mxu1 %v2322_v3  ;;  %334 = vmatpush.msrb.mxu0 %v2453_v42 }
  0x15   :  { %529 = vmatpush.msrb.mxu3 %v2322_v3  ;;  %200 = vmatpush.msra.mxu2 %v2460_v43 }
  0x16   :  { %395 = vmatpush.msrb.mxu1 %v2328_v4  ;;  %335 = vmatpush.msrb.mxu0 %v2460_v43 }
  0x17   :  { %530 = vmatpush.msrb.mxu3 %v2328_v4  ;;  %201 = vmatpush.msra.mxu2 %v2471_v47 }
  0x18   :  { %396 = vmatpush.msrb.mxu1 %v2335_v5  ;;  %336 = vmatpush.msrb.mxu0 %v2471_v47 }
  0x19   :  { %531 = vmatpush.msrb.mxu3 %v2335_v5  ;;  %462 = vmatpush.msrb.mxu2 %v2420_v37 }
  0x1a   :  { %397 = vmatpush.msrb.mxu1 %v2342_v6  ;;  %597 = vmatpush.msra.mxu0 %v2420_v37 }
  0x1b   :  { %532 = vmatpush.msrb.mxu3 %v2342_v6  ;;  %463 = vmatpush.msrb.mxu2 %v2425_v38 }
  0x1c   :  { %398 = vmatpush.msrb.mxu1 %v2349_v7  ;;  %598 = vmatpush.msra.mxu0 %v2425_v38 }
  0x1d   :  { %533 = vmatpush.msrb.mxu3 %v2349_v7  ;;  %464 = vmatpush.msrb.mxu2 %v2432_v39 }
  0x1e   :  { %399 = vmatpush.msrb.mxu1 %v2359_v8  ;;  %599 = vmatpush.msra.mxu0 %v2432_v39 }
  0x1f   :  { %534 = vmatpush.msrb.mxu3 %v2359_v8  ;;  %465 = vmatpush.msrb.mxu2 %v2439_v40 }
  0x20   :  { %400 = vmatpush.msrb.mxu1 %v2365_v9  ;;  %600 = vmatpush.msra.mxu0 %v2439_v40 }
  0x21   :  { %535 = vmatpush.msrb.mxu3 %v2365_v9  ;;  %466 = vmatpush.msrb.mxu2 %v2446_v41 }
  0x22   :  { %601 = vmatpush.msra.mxu0 %v2446_v41 }
  0x23   :  { %467 = vmatpush.msrb.mxu2 %v2453_v42 }
  0x24   :  { %602 = vmatpush.msra.mxu0 %v2453_v42 }
  0x25   :  { %468 = vmatpush.msrb.mxu2 %v2460_v43 }
  0x26   :  { %603 = vmatpush.msra.mxu0 %v2460_v43 }
  0x27   :  { %469 = vmatpush.msrb.mxu2 %v2471_v47 }
  0x28   :  { %604 = vmatpush.msra.mxu0 %v2471_v47 }
  0x80   :  { %v80_v11 = vpop.f32.mrf.mxu0 }
  0x81   :  { %v2392_v12 = vadd.f32 %v2389_v10, %v80_v11 }
  0x83   :  { %v90_v13 = vsel %vm89_vm1, %v2392_v12, 0.0 }
  0x84   :  { %1920 = vmatmul.msk.f32.vlgmr.msra.gmra.mxu1 %vm103_vm2, %v90_v13 }
  0x85   :  { %661 = vmatpush.msra.mxu1 %v2316_v2 }
  0x87   :  { %662 = vmatpush.msra.mxu1 %v2322_v3 }
  0x89   :  { %663 = vmatpush.msra.mxu1 %v2328_v4 }
  0x8b   :  { %664 = vmatpush.msra.mxu1 %v2335_v5 }
  0x8d   :  { %665 = vmatpush.msra.mxu1 %v2342_v6 }
  0x8f   :  { %666 = vmatpush.msra.mxu1 %v2349_v7 }
  0x91   :  { %667 = vmatpush.msra.mxu1 %v2359_v8 }
  0x93   :  { %668 = vmatpush.msra.mxu1 %v2365_v9 }
 0x101   :  { %v124_v15 = vpop.f32.mrf.mxu1 }
 0x102   :  { %v125_v16 = vadd.f32 %v2408_v14, %v124_v15 }
 0x104   :  { %2013 = vtanh.f32 %v125_v16  ;;  %v1921_v18 = vmul.f32 -1.442695, %v125_v16 }
 0x106   :  { %2015 = vpow2.f32 %v1921_v18 }
 0x10a   :  { %v2014_v17 = vpop.eup %2013 }
 0x10b   :  { %149 = vrot.lane.b32.xlu0 %v2014_v17, %s2231_s30 }
 0x10c   :  { %v2016_v19 = vpop.eup %2015 }
 0x10d   :  { %v130_v20 = vadd.f32 1.0, %v2016_v19 }
 0x10f   :  { %2017 = vrcp.f32 %v130_v20  ;;  %v142_v26 = vand.u32 2147483648, %v130_v20  ;;  %vm136_vm4 = vweird.f32 %v130_v20  ;;  %v140_v27 = vand.u32 2147483647, %v130_v20 }
 0x111   :  { %v143_v29 = vor.u32 1.1754944e-38, %v142_v26  ;;  %vm141_vm6 = vcmp.eq.f32.partialorder %v140_v27, 8.507059e+37 }
 0x115   :  { %v2018_v21 = vpop.eup %2017 }
 0x116   :  { %v132_v22 = vmul.f32 %v2018_v21, %v130_v20  ;;  %vm137_vm3 = vweird.f32 %v2018_v21 }
 0x117   :  { %vm138_vm5 = vmor %vm136_vm4, %vm137_vm3 }
 0x118   :  { %v133_v23 = vsub.f32 1.0, %v132_v22 }
 0x11a   :  { %v134_v24 = vmul.f32 %v2018_v21, %v133_v23 }
 0x11c   :  { %v135_v25 = vadd.f32 %v2018_v21, %v134_v24 }
 0x11e   :  { %v139_v28 = vsel %vm138_vm5, %v2018_v21, %v135_v25 }
 0x11f   :  { %v144_v31 = vsel %vm141_vm6, %v143_v29, %v139_v28 }
 0x120   :  { %v147_v33 = vmul.f32 0.0, %v144_v31 }
 0x17d   :  { %v150_v30 = vpop.permute.xlu0 %149 }
 0x17e   :  { %v152_v32 = vmul.f32 %v150_v30, %v144_v31 }
 0x180   :  { %154 = vrot.lane.b32.xlu0 %v152_v32, %s2231_s30 }
 0x1f2   :  { %v155_v34 = vpop.permute.xlu0 %154 }
 0x1f3   :  { %v2413_v35 = vadd.f32 %v155_v34, %v147_v33 }
 0x1f5   :  { %2019 = vtanh.f32 %v2413_v35 }
 0x1fb   :  { %v2020_v36 = vpop.eup %2019 }
 0x1fc   :  { %160 = vrot.lane.b32.xlu1 %v2020_v36, %s2231_s30 }
 0x26e   :  { %v161_v44 = vpop.permute.xlu1 %160 }
 0x26f   :  { %v163_v45 = vmul.f32 %v161_v44, %v144_v31  ;;  %v46_v31 = vld [vmem:[%s3092_s0 + $0x8] sm:$0xff] }
 0x270   :  { %1918 = vmatmul.msk.f32.gmra.mxu0 %vm53_vm0, %v46_v31 }
 0x271   :  { %v243_v46 = vrot.slane %v163_v45, 4  ;;  %165 = vrot.lane.b32.xlu2 %v163_v45, %s2232_s27 }
 0x273   :  { %244 = vrot.lane.b32.xlu1 %v243_v46, %s2233_s28 }
 0x2cb   :  { %v166_v48 = vpop.permute.xlu2 %165 }
 0x2cc   :  { %v168_v49 = vsel %vm89_vm1, %v166_v48, 0.0 }
 0x2cd   :  { %1931 = vmatmul.msk.f32.vlgmr.msra.gmra.mxu2 %vm103_vm2, %v168_v49 }
 0x2ce   :  { %730 = vmatpush.msra.mxu2 %v2420_v37 }
 0x2d0   :  { %731 = vmatpush.msra.mxu2 %v2425_v38 }
 0x2d2   :  { %732 = vmatpush.msra.mxu2 %v2432_v39 }
 0x2d4   :  { %733 = vmatpush.msra.mxu2 %v2439_v40 }
 0x2d6   :  { %734 = vmatpush.msra.mxu2 %v2446_v41 }
 0x2d8   :  { %735 = vmatpush.msra.mxu2 %v2453_v42 }
 0x2da   :  { %736 = vmatpush.msra.mxu2 %v2460_v43 }
 0x2dc   :  { %737 = vmatpush.msra.mxu2 %v2471_v47 }
 0x2e5   :  { %v245_v50 = vpop.permute.xlu1 %244 }
 0x2e6   :  { %v247_v51 = vsel %vm89_vm1, %v2392_v12, %v245_v50 }
 0x2e7   :  { %v249_v52 = vrot.slane %v247_v51, 4 }
 0x2e9   :  { %1933 = vmatmul.msk.f32.vlgmr.msra.gmra.mxu3 %vm103_vm2, %v249_v52 }
 0x2ea   :  { %796 = vmatpush.msra.mxu3 %v2316_v2 }
 0x2ec   :  { %797 = vmatpush.msra.mxu3 %v2322_v3 }
 0x2ed   :  { %v83_v50 = vpop.f32.mrf.mxu0 }
 0x2ee   :  { %798 = vmatpush.msra.mxu3 %v2328_v4  ;;  %v2547_v51 = vadd.f32 %v2389_v10, %v83_v50 }
 0x2f0   :  { %799 = vmatpush.msra.mxu3 %v2335_v5 }
 0x2f2   :  { %800 = vmatpush.msra.mxu3 %v2342_v6 }
 0x2f4   :  { %801 = vmatpush.msra.mxu3 %v2349_v7 }
 0x2f6   :  { %802 = vmatpush.msra.mxu3 %v2359_v8 }
 0x2f8   :  { %803 = vmatpush.msra.mxu3 %v2365_v9 }
 0x350   :  { %v203_v54 = vpop.f32.mrf.mxu2 }
 0x351   :  { %v204_v55 = vadd.f32 %v2515_v53, %v203_v54 }
 0x353   :  { %2021 = vtanh.f32 %v204_v55  ;;  %v1932_v60 = vmul.f32 -1.442695, %v204_v55 }
 0x359   :  { %v2022_v56 = vpop.eup %2021 }
 0x35a   :  { %228 = vrot.lane.b32.xlu0 %v2022_v56, %s2231_s30 }
 0x36c   :  { %v269_v57 = vpop.f32.mrf.mxu3 }
 0x36d   :  { %v270_v58 = vadd.f32 %v2408_v14, %v269_v57 }
 0x36f   :  { %2023 = vtanh.f32 %v270_v58  ;;  %v1934_v61 = vmul.f32 -1.442695, %v270_v58 }
 0x370   :  { %2025 = vpow2.f32 %v1932_v60 }
 0x371   :  { %2027 = vpow2.f32 %v1934_v61 }
 0x375   :  { %v2024_v59 = vpop.eup %2023 }
 0x376   :  { %294 = vrot.lane.b32.xlu2 %v2024_v59, %s2231_s30  ;;  %v2026_v62 = vpop.eup %2025 }
 0x377   :  { %v209_v63 = vadd.f32 1.0, %v2026_v62  ;;  %v2028_v0 = vpop.eup %2027 }
 0x378   :  { %v275_v1 = vadd.f32 1.0, %v2028_v0 }
 0x379   :  { %2029 = vrcp.f32 %v209_v63  ;;  %v221_v12 = vand.u32 2147483648, %v209_v63  ;;  %vm215_vm8 = vweird.f32 %v209_v63  ;;  %v219_v13 = vand.u32 2147483647, %v209_v63 }
 0x37a   :  { %2031 = vrcp.f32 %v275_v1  ;;  %v287_v18 = vand.u32 2147483648, %v275_v1  ;;  %vm281_vm12 = vweird.f32 %v275_v1  ;;  %v285_v19 = vand.u32 2147483647, %v275_v1 }
 0x37b   :  { %v222_v17 = vor.u32 1.1754944e-38, %v221_v12  ;;  %vm220_vm11 = vcmp.eq.f32.partialorder %v219_v13, 8.507059e+37 }
 0x37c   :  { %v288_v24 = vor.u32 1.1754944e-38, %v287_v18  ;;  %vm286_vm14 = vcmp.eq.f32.partialorder %v285_v19, 8.507059e+37 }
 0x37f   :  { %v2030_v2 = vpop.eup %2029 }
 0x380   :  { %v211_v3 = vmul.f32 %v2030_v2, %v209_v63  ;;  %v2032_v4 = vpop.eup %2031  ;;  %vm216_vm7 = vweird.f32 %v2030_v2 }
 0x381   :  { %v277_v6 = vmul.f32 %v2032_v4, %v275_v1  ;;  %vm217_vm9 = vmor %vm215_vm8, %vm216_vm7  ;;  %vm282_vm10 = vweird.f32 %v2032_v4 }
 0x382   :  { %v212_v5 = vsub.f32 1.0, %v211_v3  ;;  %vm283_vm13 = vmor %vm281_vm12, %vm282_vm10 }
 0x383   :  { %v278_v8 = vsub.f32 1.0, %v277_v6 }
 0x384   :  { %v213_v7 = vmul.f32 %v2030_v2, %v212_v5 }
 0x385   :  { %v279_v11 = vmul.f32 %v2032_v4, %v278_v8 }
 0x386   :  { %v214_v9 = vadd.f32 %v2030_v2, %v213_v7 }
 0x387   :  { %v280_v16 = vadd.f32 %v2032_v4, %v279_v11 }
 0x388   :  { %v218_v15 = vsel %vm217_vm9, %v2030_v2, %v214_v9 }
 0x389   :  { %v223_v21 = vsel %vm220_vm11, %v222_v17, %v218_v15  ;;  %v284_v23 = vsel %vm283_vm13, %v2032_v4, %v280_v16 }
 0x38a   :  { %v289_v26 = vsel %vm286_vm14, %v288_v24, %v284_v23  ;;  %v226_v28 = vmul.f32 0.0, %v223_v21 }
 0x38b   :  { %v292_v33 = vmul.f32 %v289_v26, %v2413_v35  ;;  %v47_v35 = vld [vmem:[%s3092_s0 + $0x10] sm:$0xff] }
 0x38c   :  { %1919 = vmatmul.msk.f32.gmra.mxu0 %vm53_vm0, %v47_v35 }
 0x3cc   :  { %v229_v20 = vpop.permute.xlu0 %228 }
 0x3cd   :  { %v231_v22 = vmul.f32 %v229_v20, %v223_v21 }
 0x3cf   :  { %233 = vrot.lane.b32.xlu2 %v231_v22, %s2231_s30 }
 0x3d0   :  { %v295_v25 = vpop.permute.xlu2 %294 }
 0x3d1   :  { %v297_v27 = vmul.f32 %v295_v25, %v289_v26 }
 0x3d3   :  { %299 = vrot.lane.b32.xlu1 %v297_v27, %s2231_s30 }
 0x429   :  { %v234_v29 = vpop.permute.xlu2 %233 }
 0x42a   :  { %v2523_v30 = vadd.f32 %v234_v29, %v226_v28 }
 0x42c   :  { %2033 = vtanh.f32 %v2523_v30 }
 0x432   :  { %v2034_v32 = vpop.eup %2033 }
 0x433   :  { %239 = vrot.lane.b32.xlu1 %v2034_v32, %s2231_s30 }
 0x445   :  { %v300_v34 = vpop.permute.xlu1 %299 }
 0x446   :  { %v2532_v36 = vadd.f32 %v300_v34, %v292_v33 }
 0x448   :  { %2035 = vtanh.f32 %v2532_v36 }
 0x44e   :  { %v2036_v44 = vpop.eup %2035 }
 0x44f   :  { %305 = vrot.lane.b32.xlu0 %v2036_v44, %s2231_s30 }
 0x4a5   :  { %v240_v45 = vpop.permute.xlu1 %239 }
 0x4a6   :  { %v2536_v46 = vmul.f32 %v240_v45, %v223_v21 }
 0x4a8   :  { %314 = vrot.lane.b32.xlu1 %v2536_v46, %s2233_s28 }
 0x4c1   :  { %v306_v48 = vpop.permute.xlu0 %305 }
 0x4c2   :  { %v308_v49 = vmul.f32 %v306_v48, %v289_v26 }
 0x4c4   :  { %310 = vrot.lane.b32.xlu0 %v308_v49, %s2232_s27  ;;  %378 = vrot.lane.b32.xlu2 %v308_v49, %s2233_s28 }
 0x51a   :  { %v315_v55 = vpop.permute.xlu1 %314 }
 0x51e   :  { %v379_v52 = vpop.permute.xlu2 %378 }
 0x51f   :  { %v381_v54 = vsel %vm89_vm1, %v2547_v51, %v379_v52 }
 0x520   :  { %1937 = vmatmul.msk.f32.vlgmr.msrb.gmra.mxu1 %vm103_vm2, %v381_v54 }
 0x536   :  { %v311_v56 = vpop.permute.xlu0 %310 }
 0x537   :  { %v317_v57 = vsel %vm89_vm1, %v311_v56, %v315_v55 }
 0x538   :  { %1935 = vmatmul.msk.f32.vlgmr.msrb.gmra.mxu0 %vm103_vm2, %v317_v57 }
 0x539   :  { %865 = vmatpush.msrb.mxu0 %v2420_v37  ;;  %v2564_v37 = vpop.f32.mrf.mxu0 }
 0x53b   :  { %866 = vmatpush.msrb.mxu0 %v2425_v38 }
 0x53d   :  { %867 = vmatpush.msrb.mxu0 %v2432_v39 }
 0x53f   :  { %868 = vmatpush.msrb.mxu0 %v2439_v40 }
 0x541   :  { %869 = vmatpush.msrb.mxu0 %v2446_v41 }
 0x543   :  { %870 = vmatpush.msrb.mxu0 %v2453_v42 }
 0x545   :  { %871 = vmatpush.msrb.mxu0 %v2460_v43 }
 0x547   :  { %872 = vmatpush.msrb.mxu0 %v2471_v47 }
 0x59d   :  { %v402_v58 = vpop.f32.mrf.mxu1 }
 0x59e   :  { %v403_v59 = vadd.f32 %v2408_v14, %v402_v58 }
 0x5a0   :  { %2037 = vtanh.f32 %v403_v59  ;;  %v1938_v41 = vmul.f32 -1.442695, %v403_v59 }
 0x5a6   :  { %v2038_v60 = vpop.eup %2037 }
 0x5a7   :  { %427 = vrot.lane.b32.xlu2 %v2038_v60, %s2231_s30 }
 0x5b5   :  { %v338_v38 = vpop.f32.mrf.mxu0 }
 0x5b6   :  { %v339_v39 = vadd.f32 %v2515_v53, %v338_v38 }
 0x5b8   :  { %2039 = vtanh.f32 %v339_v39  ;;  %v1936_v8 = vmul.f32 -1.442695, %v339_v39 }
 0x5b9   :  { %2041 = vpow2.f32 %v1938_v41 }
 0x5be   :  { %v2040_v40 = vpop.eup %2039 }
 0x5bf   :  { %363 = vrot.lane.b32.xlu0 %v2040_v40, %s2231_s30  ;;  %v2042_v42 = vpop.eup %2041 }
 0x5c0   :  { %v408_v43 = vadd.f32 1.0, %v2042_v42 }
 0x5c2   :  { %2043 = vrcp.f32 %v408_v43  ;;  %v420_v1 = vand.u32 2147483648, %v408_v43  ;;  %vm414_vm0 = vweird.f32 %v408_v43  ;;  %v418_v2 = vand.u32 2147483647, %v408_v43 }
 0x5c3   :  { %2045 = vpow2.f32 %v1936_v8 }
 0x5c4   :  { %v421_v4 = vor.u32 1.1754944e-38, %v420_v1  ;;  %vm419_vm4 = vcmp.eq.f32.partialorder %v418_v2, 8.507059e+37 }
 0x5c8   :  { %v2044_v47 = vpop.eup %2043 }
 0x5c9   :  { %v410_v61 = vmul.f32 %v2044_v47, %v408_v43  ;;  %vm415_vm15 = vweird.f32 %v2044_v47  ;;  %v2046_v9 = vpop.eup %2045 }
 0x5ca   :  { %vm416_vm3 = vmor %vm414_vm0, %vm415_vm15  ;;  %v344_v11 = vadd.f32 1.0, %v2046_v9 }
 0x5cb   :  { %v411_v62 = vsub.f32 1.0, %v410_v61 }
 0x5cc   :  { %2047 = vrcp.f32 %v344_v11  ;;  %v356_v18 = vand.u32 2147483648, %v344_v11  ;;  %vm350_vm6 = vweird.f32 %v344_v11  ;;  %v354_v19 = vand.u32 2147483647, %v344_v11 }
 0x5cd   :  { %v412_v63 = vmul.f32 %v2044_v47, %v411_v62 }
 0x5ce   :  { %v357_v21 = vor.u32 1.1754944e-38, %v356_v18  ;;  %vm355_vm8 = vcmp.eq.f32.partialorder %v354_v19, 8.507059e+37 }
 0x5cf   :  { %v413_v0 = vadd.f32 %v2044_v47, %v412_v63 }
 0x5d1   :  { %v417_v3 = vsel %vm416_vm3, %v2044_v47, %v413_v0 }
 0x5d2   :  { %v422_v6 = vsel %vm419_vm4, %v421_v4, %v417_v3  ;;  %v2048_v12 = vpop.eup %2047 }
 0x5d3   :  { %v346_v13 = vmul.f32 %v2048_v12, %v344_v11  ;;  %vm351_vm5 = vweird.f32 %v2048_v12  ;;  %v425_v25 = vmul.f32 %v422_v6, %v2532_v36 }
 0x5d4   :  { %vm352_vm7 = vmor %vm350_vm6, %vm351_vm5 }
 0x5d5   :  { %v347_v15 = vsub.f32 1.0, %v346_v13 }
 0x5d7   :  { %v348_v16 = vmul.f32 %v2048_v12, %v347_v15 }
 0x5d9   :  { %v349_v17 = vadd.f32 %v2048_v12, %v348_v16 }
 0x5db   :  { %v353_v20 = vsel %vm352_vm7, %v2048_v12, %v349_v17 }
 0x5dc   :  { %v358_v23 = vsel %vm355_vm8, %v357_v21, %v353_v20 }
 0x5dd   :  { %v361_v29 = vmul.f32 %v358_v23, %v2523_v30 }
 0x601   :  { %v428_v5 = vpop.permute.xlu2 %427 }
 0x602   :  { %v430_v7 = vmul.f32 %v428_v5, %v422_v6 }
 0x604   :  { %432 = vrot.lane.b32.xlu1 %v430_v7, %s2231_s30 }
 0x631   :  { %v364_v22 = vpop.permute.xlu0 %363 }
 0x632   :  { %v366_v24 = vmul.f32 %v364_v22, %v358_v23 }
 0x634   :  { %368 = vrot.lane.b32.xlu2 %v366_v24, %s2231_s30 }
 0x676   :  { %v433_v26 = vpop.permute.xlu1 %432 }
 0x677   :  { %v2571_v27 = vadd.f32 %v433_v26, %v425_v25 }
 0x679   :  { %2049 = vtanh.f32 %v2571_v27 }
 0x67f   :  { %v2050_v28 = vpop.eup %2049 }
 0x680   :  { %438 = vrot.lane.b32.xlu0 %v2050_v28, %s2231_s30 }
 0x68e   :  { %v369_v31 = vpop.permute.xlu2 %368 }
 0x68f   :  { %v2576_v32 = vadd.f32 %v369_v31, %v361_v29 }
 0x691   :  { %2051 = vtanh.f32 %v2576_v32 }
 0x697   :  { %v2052_v33 = vpop.eup %2051 }
 0x698   :  { %374 = vrot.lane.b32.xlu1 %v2052_v33, %s2231_s30 }
 0x6f2   :  { %v439_v34 = vpop.permute.xlu0 %438 }
 0x6f3   :  { %v441_v36 = vmul.f32 %v439_v34, %v422_v6 }
 0x6f5   :  { %v511_v44 = vrot.slane %v441_v36, 4  ;;  %443 = vrot.lane.b32.xlu0 %v441_v36, %s2232_s27 }
 0x6f7   :  { %512 = vrot.lane.b32.xlu2 %v511_v44, %s2233_s28 }
 0x70a   :  { %v375_v45 = vpop.permute.xlu1 %374 }
 0x70b   :  { %v2582_v48 = vmul.f32 %v375_v45, %v358_v23 }
 0x70d   :  { %447 = vrot.lane.b32.xlu1 %v2582_v48, %s2233_s28 }
 0x751   :  { %v513_v30 = vpop.permute.xlu2 %512 }
 0x752   :  { %v515_v49 = vsel %vm89_vm1, %v2547_v51, %v513_v30 }
 0x753   :  { %v517_v35 = vrot.slane %v515_v49, 4 }
 0x755   :  { %1941 = vmatmul.msk.f32.vlgmr.msrb.gmra.mxu3 %vm103_vm2, %v517_v35 }
 0x767   :  { %v444_v50 = vpop.permute.xlu0 %443 }
 0x77f   :  { %v448_v52 = vpop.permute.xlu1 %447 }
 0x780   :  { %v450_v54 = vsel %vm89_vm1, %v444_v50, %v448_v52 }
 0x781   :  { %1939 = vmatmul.msk.f32.vlgmr.msrb.gmra.mxu2 %vm103_vm2, %v450_v54 }
 0x7d8   :  { %v537_v55 = vpop.f32.mrf.mxu3 }
 0x7d9   :  { %v538_v56 = vadd.f32 %v2408_v14, %v537_v55 }
 0x7db   :  { %2053 = vtanh.f32 %v538_v56  ;;  %v1942_v60 = vmul.f32 -1.442695, %v538_v56 }
 0x7e1   :  { %v2054_v57 = vpop.eup %2053 }
 0x7e2   :  { %562 = vrot.lane.b32.xlu2 %v2054_v57, %s2231_s30 }
 0x804   :  { %v471_v58 = vpop.f32.mrf.mxu2 }
 0x805   :  { %v472_v59 = vadd.f32 %v2515_v53, %v471_v58 }
 0x807   :  { %2055 = vtanh.f32 %v472_v59  ;;  %v1940_v4 = vmul.f32 -1.442695, %v472_v59 }
 0x808   :  { %2057 = vpow2.f32 %v1942_v60 }
 0x80d   :  { %v2056_v51 = vpop.eup %2055 }
 0x80e   :  { %496 = vrot.lane.b32.xlu0 %v2056_v51, %s2231_s30  ;;  %v2058_v38 = vpop.eup %2057 }
 0x80f   :  { %v543_v39 = vadd.f32 1.0, %v2058_v38 }
 0x811   :  { %2059 = vrcp.f32 %v543_v39  ;;  %v555_v61 = vand.u32 2147483648, %v543_v39  ;;  %vm549_vm10 = vweird.f32 %v543_v39  ;;  %v553_v62 = vand.u32 2147483647, %v543_v39 }
 0x812   :  { %2061 = vpow2.f32 %v1940_v4 }
 0x813   :  { %v556_v0 = vor.u32 1.1754944e-38, %v555_v61  ;;  %vm554_vm12 = vcmp.eq.f32.partialorder %v553_v62, 8.507059e+37 }
 0x817   :  { %v2060_v40 = vpop.eup %2059 }
 0x818   :  { %v545_v41 = vmul.f32 %v2060_v40, %v543_v39  ;;  %vm550_vm9 = vweird.f32 %v2060_v40  ;;  %v2062_v5 = vpop.eup %2061 }
 0x819   :  { %vm551_vm11 = vmor %vm549_vm10, %vm550_vm9  ;;  %v477_v6 = vadd.f32 1.0, %v2062_v5 }
 0x81a   :  { %v546_v42 = vsub.f32 1.0, %v545_v41 }
 0x81b   :  { %2063 = vrcp.f32 %v477_v6  ;;  %v489_v13 = vand.u32 2147483648, %v477_v6  ;;  %vm483_vm14 = vweird.f32 %v477_v6  ;;  %v487_v15 = vand.u32 2147483647, %v477_v6 }
 0x81c   :  { %v547_v43 = vmul.f32 %v2060_v40, %v546_v42 }
 0x81d   :  { %v490_v17 = vor.u32 1.1754944e-38, %v489_v13  ;;  %vm488_vm0 = vcmp.eq.f32.partialorder %v487_v15, 8.507059e+37 }
 0x81e   :  { %v548_v47 = vadd.f32 %v2060_v40, %v547_v43 }
 0x820   :  { %v552_v63 = vsel %vm551_vm11, %v2060_v40, %v548_v47 }
 0x821   :  { %v557_v2 = vsel %vm554_vm12, %v556_v0, %v552_v63  ;;  %v2064_v7 = vpop.eup %2063 }
 0x822   :  { %v479_v8 = vmul.f32 %v2064_v7, %v477_v6  ;;  %vm484_vm13 = vweird.f32 %v2064_v7  ;;  %v560_v21 = vmul.f32 %v557_v2, %v2571_v27 }
 0x823   :  { %vm485_vm15 = vmor %vm483_vm14, %vm484_vm13 }
 0x824   :  { %v480_v9 = vsub.f32 1.0, %v479_v8 }
 0x826   :  { %v481_v11 = vmul.f32 %v2064_v7, %v480_v9 }
 0x828   :  { %v482_v12 = vadd.f32 %v2064_v7, %v481_v11 }
 0x82a   :  { %v486_v16 = vsel %vm485_vm15, %v2064_v7, %v482_v12 }
 0x82b   :  { %v491_v19 = vsel %vm488_vm0, %v490_v17, %v486_v16 }
 0x82c   :  { %v494_v25 = vmul.f32 %v491_v19, %v2576_v32  ;;  %v2615_v32 = vadd.f32 %v2389_v10, %v2564_v37 }
 0x83c   :  { %v563_v1 = vpop.permute.xlu2 %562 }
 0x83d   :  { %v565_v3 = vmul.f32 %v563_v1, %v557_v2 }
 0x83f   :  { %567 = vrot.lane.b32.xlu1 %v565_v3, %s2231_s30 }
 0x880   :  { %v497_v18 = vpop.permute.xlu0 %496 }
 0x881   :  { %v499_v20 = vmul.f32 %v497_v18, %v491_v19 }
 0x883   :  { %501 = vrot.lane.b32.xlu2 %v499_v20, %s2231_s30 }
 0x8b1   :  { %v568_v22 = vpop.permute.xlu1 %567 }
 0x8b2   :  { %v2598_v23 = vadd.f32 %v568_v22, %v560_v21 }
 0x8b4   :  { %2065 = vtanh.f32 %v2598_v23 }
 0x8ba   :  { %v2066_v24 = vpop.eup %2065 }
 0x8bb   :  { %573 = vrot.lane.b32.xlu0 %v2066_v24, %s2231_s30 }
 0x8dd   :  { %v502_v26 = vpop.permute.xlu2 %501 }
 0x8de   :  { %v2603_v28 = vadd.f32 %v502_v26, %v494_v25 }
 0x8e0   :  { %2067 = vtanh.f32 %v2603_v28 }
 0x8e6   :  { %v2068_v29 = vpop.eup %2067 }
 0x8e7   :  { %507 = vrot.lane.b32.xlu1 %v2068_v29, %s2231_s30 }
 0x92d   :  { %v574_v31 = vpop.permute.xlu0 %573 }
 0x92e   :  { %v576_v27 = vmul.f32 %v574_v31, %v557_v2 }
 0x930   :  { %578 = vrot.lane.b32.xlu0 %v576_v27, %s2232_s27  ;;  %646 = vrot.lane.b32.xlu2 %v576_v27, %s2233_s28 }
 0x959   :  { %v508_v33 = vpop.permute.xlu1 %507 }
 0x95a   :  { %v2609_v34 = vmul.f32 %v508_v33, %v491_v19 }
 0x95c   :  { %582 = vrot.lane.b32.xlu1 %v2609_v34, %s2233_s28 }
 0x98a   :  { %v647_v36 = vpop.permute.xlu2 %646 }
 0x98b   :  { %v649_v44 = vsel %vm89_vm1, %v2615_v32, %v647_v36 }
 0x98c   :  { %1945 = vmatmul.msk.f32.vlgmr.msra.gmra.mxu1 %vm103_vm2, %v649_v44 }
 0x9a2   :  { %v579_v45 = vpop.permute.xlu0 %578 }
 0x9ce   :  { %v583_v30 = vpop.permute.xlu1 %582 }
 0x9cf   :  { %v585_v49 = vsel %vm89_vm1, %v579_v45, %v583_v30 }
 0x9d0   :  { %1943 = vmatmul.msk.f32.vlgmr.msra.gmra.mxu0 %vm103_vm2, %v585_v49 }
 0xa09   :  { %v670_v35 = vpop.f32.mrf.mxu1 }
 0xa0a   :  { %v671_v50 = vadd.f32 %v2408_v14, %v670_v35 }
 0xa0c   :  { %2069 = vtanh.f32 %v671_v50  ;;  %v1946_v10 = vmul.f32 -1.442695, %v671_v50 }
 0xa0e   :  { %2071 = vpow2.f32 %v1946_v10 }
 0xa12   :  { %v2070_v52 = vpop.eup %2069 }
 0xa13   :  { %695 = vrot.lane.b32.xlu2 %v2070_v52, %s2231_s30 }
 0xa14   :  { %v2072_v37 = vpop.eup %2071 }
 0xa15   :  { %v676_v54 = vadd.f32 1.0, %v2072_v37 }
 0xa17   :  { %v688_v39 = vand.u32 2147483648, %v676_v54  ;;  %vm682_vm4 = vweird.f32 %v676_v54  ;;  %v686_v40 = vand.u32 2147483647, %v676_v54 }
 0xa19   :  { %v689_v42 = vor.u32 1.1754944e-38, %v688_v39  ;;  %vm687_vm6 = vcmp.eq.f32.partialorder %v686_v40, 8.507059e+37 }
 0xa4d   :  { %v606_v55 = vpop.f32.mrf.mxu0 }
 0xa4e   :  { %v607_v56 = vadd.f32 %v2515_v53, %v606_v55 }
 0xa50   :  { %2073 = vtanh.f32 %v607_v56  ;;  %v1944_v62 = vmul.f32 -1.442695, %v607_v56 }
 0xa51   :  { %2075 = vrcp.f32 %v676_v54 }
 0xa52   :  { %2077 = vpow2.f32 %v1944_v62 }
 0xa56   :  { %v2074_v57 = vpop.eup %2073 }
 0xa57   :  { %v2076_v58 = vpop.eup %2075  ;;  %631 = vrot.lane.b32.xlu0 %v2074_v57, %s2231_s30 }
 0xa58   :  { %v678_v59 = vmul.f32 %v2076_v58, %v676_v54  ;;  %vm683_vm3 = vweird.f32 %v2076_v58  ;;  %v2078_v63 = vpop.eup %2077 }
 0xa59   :  { %vm684_vm5 = vmor %vm682_vm4, %vm683_vm3  ;;  %v612_v0 = vadd.f32 1.0, %v2078_v63 }
 0xa5a   :  { %v679_v51 = vsub.f32 1.0, %v678_v59 }
 0xa5b   :  { %2079 = vrcp.f32 %v612_v0  ;;  %v624_v6 = vand.u32 2147483648, %v612_v0  ;;  %vm618_vm8 = vweird.f32 %v612_v0  ;;  %v622_v7 = vand.u32 2147483647, %v612_v0 }
 0xa5c   :  { %v680_v60 = vmul.f32 %v2076_v58, %v679_v51 }
 0xa5d   :  { %v625_v9 = vor.u32 1.1754944e-38, %v624_v6  ;;  %vm623_vm10 = vcmp.eq.f32.partialorder %v622_v7, 8.507059e+37 }
 0xa5e   :  { %v681_v38 = vadd.f32 %v2076_v58, %v680_v60 }
 0xa60   :  { %v685_v41 = vsel %vm684_vm5, %v2076_v58, %v681_v38  ;;  %vm921_vm5 = vcmask 1043456  }
 0xa61   :  { %v690_v47 = vsel %vm687_vm6, %v689_v42, %v685_v41  ;;  %v2080_v1 = vpop.eup %2079 }
 0xa62   :  { %v614_v2 = vmul.f32 %v2080_v1, %v612_v0  ;;  %vm619_vm7 = vweird.f32 %v2080_v1  ;;  %v693_v15 = vmul.f32 %v690_v47, %v2598_v23 }
 0xa63   :  { %vm620_vm9 = vmor %vm618_vm8, %vm619_vm7 }
 0xa64   :  { %v615_v3 = vsub.f32 1.0, %v614_v2 }
 0xa66   :  { %v616_v4 = vmul.f32 %v2080_v1, %v615_v3 }
 0xa68   :  { %v617_v5 = vadd.f32 %v2080_v1, %v616_v4 }
 0xa6a   :  { %v621_v8 = vsel %vm620_vm9, %v2080_v1, %v617_v5 }
 0xa6b   :  { %v626_v12 = vsel %vm623_vm10, %v625_v9, %v621_v8  ;;  %vm980_vm10 = vcmask 130048  }
 0xa6c   :  { %v629_v19 = vmul.f32 %v626_v12, %v2603_v28 }
 0xa6d   :  { %v696_v43 = vpop.permute.xlu2 %695 }
 0xa6e   :  { %v698_v61 = vmul.f32 %v696_v43, %v690_v47 }
 0xa70   :  { %700 = vrot.lane.b32.xlu1 %v698_v61, %s2231_s30 }
 0xac9   :  { %v632_v11 = vpop.permute.xlu0 %631 }
 0xaca   :  { %v634_v13 = vmul.f32 %v632_v11, %v626_v12 }
 0xacc   :  { %636 = vrot.lane.b32.xlu2 %v634_v13, %s2231_s30 }
 0xae2   :  { %v701_v16 = vpop.permute.xlu1 %700 }
 0xae3   :  { %v2629_v17 = vadd.f32 %v701_v16, %v693_v15 }
 0xae5   :  { %2081 = vtanh.f32 %v2629_v17 }
 0xaeb   :  { %v2082_v18 = vpop.eup %2081 }
 0xaec   :  { %706 = vrot.lane.b32.xlu0 %v2082_v18, %s2231_s30 }
 0xb26   :  { %v637_v20 = vpop.permute.xlu2 %636 }
 0xb27   :  { %v2634_v21 = vadd.f32 %v637_v20, %v629_v19 }
 0xb29   :  { %2083 = vtanh.f32 %v2634_v21 }
 0xb2f   :  { %v2084_v22 = vpop.eup %2083 }
 0xb30   :  { %642 = vrot.lane.b32.xlu1 %v2084_v22, %s2231_s30 }
 0xb5e   :  { %v707_v24 = vpop.permute.xlu0 %706 }
 0xb5f   :  { %v709_v23 = vmul.f32 %v707_v24, %v690_v47 }
 0xb61   :  { %v779_v25 = vrot.slane %v709_v23, 4  ;;  %711 = vrot.lane.b32.xlu0 %v709_v23, %s2232_s27 }
 0xb63   :  { %780 = vrot.lane.b32.xlu2 %v779_v25, %s2233_s28 }
 0xba2   :  { %v643_v26 = vpop.permute.xlu1 %642 }
 0xba3   :  { %v2640_v29 = vmul.f32 %v643_v26, %v626_v12 }
 0xba5   :  { %715 = vrot.lane.b32.xlu1 %v2640_v29, %s2233_s28 }
 0xbbd   :  { %v781_v28 = vpop.permute.xlu2 %780 }
 0xbbe   :  { %v783_v31 = vsel %vm89_vm1, %v2615_v32, %v781_v28 }
 0xbbf   :  { %v785_v27 = vrot.slane %v783_v31, 4  ;;  %v914_v31 = vrot.slane %v2582_v48, 4  ;;  %v926_v48 = vld [vmem:[%s3097_s5 + $0x8] sm:$0xff] }
 0xbc1   :  { %1949 = vmatmul.msk.f32.vlgmr.msra.gmra.mxu3 %vm103_vm2, %v785_v27  ;;  %v922_v27 = vsel %vm921_vm5, %v2536_v46, %v914_v31  ;;  %v925_v46 = vld [vmem:[%s3097_s5] sm:$0xff] }
 0xbd3   :  { %v712_v33 = vpop.permute.xlu0 %711 }
 0xc17   :  { %v716_v36 = vpop.permute.xlu1 %715 }
 0xc18   :  { %v718_v44 = vsel %vm89_vm1, %v712_v33, %v716_v36 }
 0xc19   :  { %1947 = vmatmul.msk.f32.vlgmr.msra.gmra.mxu2 %vm103_vm2, %v718_v44 }
 0xc44   :  { %v805_v45 = vpop.f32.mrf.mxu3 }
 0xc45   :  { %v806_v30 = vadd.f32 %v2408_v14, %v805_v45  ;;  %v927_v45 = vld [vmem:[%s3097_s5 + $0x10] sm:$0xff] }
 0xc47   :  { %2085 = vtanh.f32 %v806_v30  ;;  %v1950_v35 = vmul.f32 -1.442695, %v806_v30 }
 0xc49   :  { %2087 = vpow2.f32 %v1950_v35 }
 0xc4d   :  { %v2086_v49 = vpop.eup %2085 }
 0xc4e   :  { %830 = vrot.lane.b32.xlu0 %v2086_v49, %s2231_s30 }
 0xc4f   :  { %v2088_v32 = vpop.eup %2087 }
 0xc50   :  { %v811_v10 = vadd.f32 1.0, %v2088_v32 }
 0xc52   :  { %v823_v58 = vand.u32 2147483648, %v811_v10  ;;  %vm817_vm12 = vweird.f32 %v811_v10  ;;  %v821_v59 = vand.u32 2147483647, %v811_v10 }
 0xc54   :  { %v824_v60 = vor.u32 1.1754944e-38, %v823_v58  ;;  %vm822_vm14 = vcmp.eq.f32.partialorder %v821_v59, 8.507059e+37 }
 0xc9c   :  { %v739_v50 = vpop.f32.mrf.mxu2 }
 0xc9d   :  { %v740_v52 = vadd.f32 %v2515_v53, %v739_v50 }
 0xc9f   :  { %2089 = vtanh.f32 %v740_v52  ;;  %v1948_v41 = vmul.f32 -1.442695, %v740_v52 }
 0xca0   :  { %2091 = vrcp.f32 %v811_v10 }
 0xca1   :  { %2093 = vpow2.f32 %v1948_v41 }
 0xca5   :  { %v2090_v37 = vpop.eup %2089 }
 0xca6   :  { %764 = vrot.lane.b32.xlu2 %v2090_v37, %s2231_s30  ;;  %v2092_v54 = vpop.eup %2091 }
 0xca7   :  { %v813_v55 = vmul.f32 %v2092_v54, %v811_v10  ;;  %vm818_vm11 = vweird.f32 %v2092_v54  ;;  %v2094_v42 = vpop.eup %2093 }
 0xca8   :  { %vm819_vm13 = vmor %vm817_vm12, %vm818_vm11  ;;  %v745_v43 = vadd.f32 1.0, %v2094_v42 }
 0xca9   :  { %v814_v56 = vsub.f32 1.0, %v813_v55 }
 0xcaa   :  { %2095 = vrcp.f32 %v745_v43  ;;  %v757_v1 = vand.u32 2147483648, %v745_v43  ;;  %vm751_vm0 = vweird.f32 %v745_v43  ;;  %v755_v2 = vand.u32 2147483647, %v745_v43 }
 0xcab   :  { %v815_v14 = vmul.f32 %v2092_v54, %v814_v56 }
 0xcac   :  { %v758_v4 = vor.u32 1.1754944e-38, %v757_v1  ;;  %vm756_vm4 = vcmp.eq.f32.partialorder %v755_v2, 8.507059e+37 }
 0xcad   :  { %v816_v57 = vadd.f32 %v2092_v54, %v815_v14 }
 0xcaf   :  { %v820_v51 = vsel %vm819_vm13, %v2092_v54, %v816_v57  ;;  %v916_v57 = vrot.slane %v2640_v29, 4  ;;  %v2008_v29 = vld [vmem:[%s3098_s6] ss:$0 sm:$0xff]  ;;  %s1905_s6 = sshll.u32 %s3105_s13, 4  ;;  %s1906_s6 = int_to_ptr.hbm [resolvable:$true] %s1905_s6 }
 0xcb0   :  { %v825_v39 = vsel %vm822_vm14, %v824_v60, %v820_v51  ;;  %v2096_v47 = vpop.eup %2095 }
 0xcb1   :  { %v747_v61 = vmul.f32 %v2096_v47, %v745_v43  ;;  %vm752_vm15 = vweird.f32 %v2096_v47  ;;  %v828_v8 = vmul.f32 %v825_v39, %v2629_v17  ;;  %v923_v59 = vsel %vm921_vm5, %v2609_v34, %v916_v57  ;;  %v974_v34 = vld [vmem:[%s3099_s7] sm:$0xff]  ;;  %v2844_v57 = vld [vmem:[%s3101_s9 + $0x58] sm:$0xff] }
 0xcb2   :  { %vm753_vm3 = vmor %vm751_vm0, %vm752_vm15 }
 0xcb3   :  { %v748_v62 = vsub.f32 1.0, %v747_v61 }
 0xcb5   :  { %v749_v63 = vmul.f32 %v2096_v47, %v748_v62 }
 0xcb7   :  { %v750_v0 = vadd.f32 %v2096_v47, %v749_v63 }
 0xcb9   :  { %v754_v3 = vsel %vm753_vm3, %v2096_v47, %v750_v0 }
 0xcba   :  { %v759_v5 = vsel %vm756_vm4, %v758_v4, %v754_v3  ;;  %v2710_v3 = vld [vmem:[%s3101_s9 + $0x38] sm:$0xff]  ;;  %v2715_v4 = vld [vmem:[%s3101_s9 + $0x30] sm:$0xff] }
 0xcbb   :  { %v762_v13 = vmul.f32 %v759_v5, %v2634_v21  ;;  %1041 = vmatpush.msrb.mxu3 %v2710_v3 }
 0xcbd   :  { %1042 = vmatpush.msrb.mxu3 %v2715_v4 }
 0xcc0   :  { %v831_v38 = vpop.permute.xlu0 %830 }
 0xcc1   :  { %v833_v40 = vmul.f32 %v831_v38, %v825_v39 }
 0xcc3   :  { %835 = vrot.lane.b32.xlu2 %v833_v40, %s2231_s30  ;;  %v975_v40 = vld [vmem:[%s3099_s7 + $0x8] sm:$0xff]  ;;  %s2236_s7 = smov 8  }
 0xcc4   :  { %1004 = vmatpush.msrb.mxu2 %v975_v40 }
 0xcc6   :  { %1005 = vmatpush.msrb.mxu2 %v974_v34 }
 0xd00   :  { %v765_v6 = vpop.permute.xlu2 %764 }
 0xd01   :  { %v767_v7 = vmul.f32 %v765_v6, %v759_v5  ;;  %v2729_v6 = vld [vmem:[%s3101_s9 + $0x20] sm:$0xff] }
 0xd03   :  { %769 = vrot.lane.b32.xlu1 %v767_v7, %s2231_s30  ;;  %v2736_v7 = vld [vmem:[%s3101_s9 + $0x18] sm:$0xff] }
 0xd1d   :  { %v836_v9 = vpop.permute.xlu2 %835 }
 0xd1e   :  { %v838_v11 = vadd.f32 %v836_v9, %v828_v8 }
 0xd20   :  { %2097 = vtanh.f32 %v838_v11  ;;  %v2746_v11 = vld [vmem:[%s3101_s9 + $0x10] sm:$0xff] }
 0xd26   :  { %v2098_v12 = vpop.eup %2097 }
 0xd27   :  { %841 = vrot.lane.b32.xlu1 %v2098_v12, %s2231_s30  ;;  %v2753_v12 = vld [vmem:[%s3101_s9 + $0x8] sm:$0xff] }
 0xd75   :  { %v770_v15 = vpop.permute.xlu1 %769 }
 0xd76   :  { %v772_v16 = vadd.f32 %v770_v15, %v762_v13  ;;  %v2760_v13 = vld [vmem:[%s3101_s9] sm:$0xff] }
 0xd78   :  { %2099 = vtanh.f32 %v772_v16 }
 0xd7e   :  { %v2100_v18 = vpop.eup %2099 }
 0xd7f   :  { %775 = vrot.lane.b32.xlu0 %v2100_v18, %s2231_s30  ;;  %v2787_v18 = vld [vmem:[%s3100_s8] ss:$0 sm:$0xff] }
 0xd99   :  { %v842_v19 = vpop.permute.xlu1 %841 }
 0xd9a   :  { %v844_v20 = vmul.f32 %v842_v19, %v825_v39 }
 0xd9c   :  { %846 = vrot.lane.b32.xlu2 %v844_v20, %s2232_s27 }
 0xdf1   :  { %v776_v22 = vpop.permute.xlu0 %775 }
 0xdf2   :  { %v2660_v17 = vmul.f32 %v776_v22, %v759_v5  ;;  %v2722_v5 = vld [vmem:[%s3101_s9 + $0x28] sm:$0xff] }
 0xdf3   :  { %1043 = vmatpush.msrb.mxu3 %v2722_v5 }
 0xdf4   :  { %850 = vrot.lane.b32.xlu0 %v2660_v17, %s2233_s28 }
 0xdf5   :  { %1044 = vmatpush.msrb.mxu3 %v2729_v6 }
 0xdf6   :  { %v847_v24 = vpop.permute.xlu2 %846 }
 0xdf7   :  { %1045 = vmatpush.msrb.mxu3 %v2736_v7 }
 0xdf9   :  { %1046 = vmatpush.msrb.mxu3 %v2746_v11 }
 0xdfb   :  { %1047 = vmatpush.msrb.mxu3 %v2753_v12 }
 0xdfd   :  { %1048 = vmatpush.msrb.mxu3 %v2760_v13 }
 0xdff   :  { %1319 = vmatpush.msra.mxu3 %v2710_v3 }
 0xe01   :  { %1320 = vmatpush.msra.mxu3 %v2715_v4 }
 0xe03   :  { %1321 = vmatpush.msra.mxu3 %v2722_v5 }
 0xe05   :  { %1322 = vmatpush.msra.mxu3 %v2729_v6 }
 0xe07   :  { %1323 = vmatpush.msra.mxu3 %v2736_v7 }
 0xe09   :  { %1324 = vmatpush.msra.mxu3 %v2746_v11 }
 0xe0b   :  { %1325 = vmatpush.msra.mxu3 %v2753_v12 }
 0xe0d   :  { %1326 = vmatpush.msra.mxu3 %v2760_v13 }
 0xe66   :  { %v851_v23 = vpop.permute.xlu0 %850 }
 0xe67   :  { %v853_v21 = vsel %vm89_vm1, %v847_v24, %v851_v23  ;;  %v2806_v24 = vld [vmem:[%s3102_s10] ss:$0 sm:$0xff] }
 0xe68   :  { %1951 = vmatmul.msk.f32.vlgmr.msrb.gmra.mxu0 %vm103_vm2, %v853_v21 }
 0xee5   :  { %v874_v25 = vpop.f32.mrf.mxu0 }
 0xee6   :  { %v875_v26 = vadd.f32 %v2515_v53, %v874_v25  ;;  %v928_v53 = vld [vmem:[%s3097_s5 + $0x18] sm:$0xff] }
 0xee7   :  { %960 = vmatpush.msrb.mxu1 %v928_v53 }
 0xee8   :  { %2101 = vtanh.f32 %v875_v26  ;;  %v1952_v33 = vmul.f32 -1.442695, %v875_v26 }
 0xee9   :  { %961 = vmatpush.msrb.mxu1 %v927_v45 }
 0xeea   :  { %2103 = vpow2.f32 %v1952_v33 }
 0xeeb   :  { %962 = vmatpush.msrb.mxu1 %v926_v48 }
 0xeed   :  { %963 = vmatpush.msrb.mxu1 %v925_v46 }
 0xeee   :  { %v2102_v28 = vpop.eup %2101 }
 0xeef   :  { %899 = vrot.lane.b32.xlu1 %v2102_v28, %s2231_s30  ;;  %1184 = vmatpush.msra.mxu1 %v2710_v3 }
 0xef0   :  { %v2104_v36 = vpop.eup %2103 }
 0xef1   :  { %v880_v44 = vadd.f32 1.0, %v2104_v36  ;;  %1185 = vmatpush.msra.mxu1 %v2715_v4 }
 0xef3   :  { %2105 = vrcp.f32 %v880_v44  ;;  %v892_v52 = vand.u32 2147483648, %v880_v44  ;;  %vm886_vm7 = vweird.f32 %v880_v44  ;;  %v890_v10 = vand.u32 2147483647, %v880_v44  ;;  %1186 = vmatpush.msra.mxu1 %v2722_v5 }
 0xef5   :  { %v893_v54 = vor.u32 1.1754944e-38, %v892_v52  ;;  %vm891_vm9 = vcmp.eq.f32.partialorder %v890_v10, 8.507059e+37  ;;  %1187 = vmatpush.msra.mxu1 %v2729_v6 }
 0xef7   :  { %936 = vrot.lane.b32.xlu1 %v922_v27, %s2232_s27  ;;  %1188 = vmatpush.msra.mxu1 %v2736_v7 }
 0xef9   :  { %v2106_v30 = vpop.eup %2105  ;;  %1189 = vmatpush.msra.mxu1 %v2746_v11 }
 0xefa   :  { %v882_v49 = vmul.f32 %v2106_v30, %v880_v44  ;;  %vm887_vm6 = vweird.f32 %v2106_v30 }
 0xefb   :  { %vm888_vm8 = vmor %vm886_vm7, %vm887_vm6  ;;  %1190 = vmatpush.msra.mxu1 %v2753_v12 }
 0xefc   :  { %v883_v35 = vsub.f32 1.0, %v882_v49 }
 0xefd   :  { %1191 = vmatpush.msra.mxu1 %v2760_v13 }
 0xefe   :  { %v884_v50 = vmul.f32 %v2106_v30, %v883_v35 }
 0xf00   :  { %v885_v32 = vadd.f32 %v2106_v30, %v884_v50 }
 0xf02   :  { %v889_v37 = vsel %vm888_vm8, %v2106_v30, %v885_v32 }
 0xf03   :  { %v894_v56 = vsel %vm891_vm9, %v893_v54, %v889_v37  ;;  %v2818_v54 = vld [vmem:[%s3101_s9 + $0x78] sm:$0xff] }
 0xf04   :  { %v897_v51 = vmul.f32 %v894_v56, %v772_v16  ;;  %1120 = vmatpush.msra.mxu0 %v2818_v54  ;;  %1253 = vmatpush.msra.mxu2 %v2818_v54 }
 0xf61   :  { %v900_v55 = vpop.permute.xlu1 %899 }
 0xf62   :  { %v902_v14 = vmul.f32 %v900_v55, %v894_v56  ;;  %v2823_v55 = vld [vmem:[%s3101_s9 + $0x70] sm:$0xff] }
 0xf63   :  { %1121 = vmatpush.msra.mxu0 %v2823_v55  ;;  %1254 = vmatpush.msra.mxu2 %v2823_v55 }
 0xf64   :  { %904 = vrot.lane.b32.xlu2 %v902_v14, %s2231_s30  ;;  %v2837_v14 = vld [vmem:[%s3101_s9 + $0x60] sm:$0xff] }
 0xf69   :  { %v937_v58 = vpop.permute.xlu1 %936 }
 0xf6a   :  { %1953 = vmatmul.msk.f32.vlgmr.msrb.gmra.mxu1 %vm89_vm1, %v937_v58  ;;  %v2851_v58 = vld [vmem:[%s3101_s9 + $0x50] sm:$0xff] }
 0xf6b   :  { %1452 = vmatpush.msrb.mxu1 %v2710_v3 }
 0xf6c   :  { %938 = vrot.lane.b32.xlu2 %v923_v59, %s2232_s27  ;;  %v2858_v59 = vld [vmem:[%s3101_s9 + $0x48] sm:$0xff] }
 0xf6d   :  { %1453 = vmatpush.msrb.mxu1 %v2715_v4 }
 0xf6f   :  { %1454 = vmatpush.msrb.mxu1 %v2722_v5 }
 0xf71   :  { %1455 = vmatpush.msrb.mxu1 %v2729_v6 }
 0xf73   :  { %1456 = vmatpush.msrb.mxu1 %v2736_v7 }
 0xf75   :  { %1457 = vmatpush.msrb.mxu1 %v2746_v11 }
 0xf77   :  { %1458 = vmatpush.msrb.mxu1 %v2753_v12 }
 0xf79   :  { %1459 = vmatpush.msrb.mxu1 %v2760_v13 }
 0xfbe   :  { %v905_v60 = vpop.permute.xlu2 %904 }
 0xfbf   :  { %v907_v38 = vadd.f32 %v905_v60, %v897_v51 }
 0xfc1   :  { %2107 = vtanh.f32 %v907_v38  ;;  %v2869_v38 = vld [vmem:[%s3101_s9 + $0x40] sm:$0xff] }
 0xfc6   :  { %v939_v39 = vpop.permute.xlu2 %938 }
 0xfc7   :  { %v2108_v41 = vpop.eup %2107  ;;  %1954 = vmatmul.msk.f32.gmra.mxu1 %vm89_vm1, %v939_v39 }
 0xfc8   :  { %910 = vrot.lane.b32.xlu0 %v2108_v41, %s2231_s30 }
 0xfe7   :  { %v965_v42 = vpop.f32.mrf.mxu1 }
 0xfe8   :  { %v966_v43 = vadd.f32 %v2008_v29, %v965_v42 }
 0xfea   :  { %1956 = vmatmul.msk.f32.vlgmr.msrb.gmra.mxu2 %vm980_vm10, %v966_v43 }
0x103a   :  { %v911_v47 = vpop.permute.xlu0 %910 }
0x103b   :  { %v913_v61 = vmul.f32 %v911_v47, %v894_v56  ;;  %v2830_v56 = vld [vmem:[%s3101_s9 + $0x68] sm:$0xff] }
0x103c   :  { %1122 = vmatpush.msra.mxu0 %v2830_v56  ;;  %1255 = vmatpush.msra.mxu2 %v2830_v56 }
0x103d   :  { %v919_v62 = vrot.slane %v913_v61, 4 }
0x103e   :  { %1123 = vmatpush.msra.mxu0 %v2837_v14  ;;  %1256 = vmatpush.msra.mxu2 %v2837_v14 }
0x103f   :  { %v924_v63 = vsel %vm921_vm5, %v2660_v17, %v919_v62 }
0x1040   :  { %940 = vrot.lane.b32.xlu0 %v924_v63, %s2232_s27  ;;  %1124 = vmatpush.msra.mxu0 %v2844_v57 }
0x1041   :  { %1257 = vmatpush.msra.mxu2 %v2844_v57 }
0x1042   :  { %1125 = vmatpush.msra.mxu0 %v2851_v58 }
0x1043   :  { %1258 = vmatpush.msra.mxu2 %v2851_v58 }
0x1044   :  { %v968_v0 = vpop.f32.mrf.mxu1  ;;  %1126 = vmatpush.msra.mxu0 %v2858_v59 }
0x1045   :  { %v969_v1 = vadd.f32 %v2008_v29, %v968_v0  ;;  %1259 = vmatpush.msra.mxu2 %v2858_v59 }
0x1046   :  { %1127 = vmatpush.msra.mxu0 %v2869_v38 }
0x1047   :  { %1957 = vmatmul.msk.f32.gmra.mxu2 %vm980_vm10, %v969_v1 }
0x1048   :  { %1260 = vmatpush.msra.mxu2 %v2869_v38  ;;  %1388 = vmatpush.msrb.mxu0 %v2818_v54 }
0x104a   :  { %1521 = vmatpush.msrb.mxu2 %v2818_v54  ;;  %1389 = vmatpush.msrb.mxu0 %v2823_v55 }
0x104c   :  { %1522 = vmatpush.msrb.mxu2 %v2823_v55  ;;  %1390 = vmatpush.msrb.mxu0 %v2830_v56 }
0x104e   :  { %1523 = vmatpush.msrb.mxu2 %v2830_v56  ;;  %1391 = vmatpush.msrb.mxu0 %v2837_v14 }
0x1050   :  { %1524 = vmatpush.msrb.mxu2 %v2837_v14  ;;  %1392 = vmatpush.msrb.mxu0 %v2844_v57 }
0x1052   :  { %1525 = vmatpush.msrb.mxu2 %v2844_v57  ;;  %1393 = vmatpush.msrb.mxu0 %v2851_v58 }
0x1054   :  { %1526 = vmatpush.msrb.mxu2 %v2851_v58  ;;  %1394 = vmatpush.msrb.mxu0 %v2858_v59 }
0x1056   :  { %1527 = vmatpush.msrb.mxu2 %v2858_v59  ;;  %1395 = vmatpush.msrb.mxu0 %v2869_v38 }
0x1058   :  { %1528 = vmatpush.msrb.mxu2 %v2869_v38 }
0x106d   :  { %v2774_v15 = vpop.f32.mrf.mxu2 }
0x10b2   :  { %v941_v2 = vpop.permute.xlu0 %940 }
0x10b3   :  { %1955 = vmatmul.msk.f32.gmra.mxu1 %vm89_vm1, %v941_v2 }
0x10ca   :  { %v2782_v16 = vpop.f32.mrf.mxu2 }
0x1130   :  { %v971_v8 = vpop.f32.mrf.mxu1 }
0x1131   :  { %v972_v9 = vadd.f32 %v2008_v29, %v971_v8  ;;  %v2913_v29 = vld [vmem:[%s3102_s10 + $0x1] ss:$0 sm:$0xff] }
0x1133   :  { %1958 = vmatmul.msk.f32.gmra.mxu2 %vm980_vm10, %v972_v9 }
0x11b6   :  { %v1013_v19 = vpop.f32.mrf.mxu2 }
0x11b7   :  { %v2790_v20 = vadd.f32 %v2787_v18, %v1013_v19 }
0x11b9   :  { %v1016_v22 = vsel %vm89_vm1, %v2790_v20, 0.0 }
0x11ba   :  { %v1030_v17 = vrot.slane %v1016_v22, 4 }
0x11bc   :  { %1959 = vmatmul.msk.f32.vlgmr.msrb.gmra.mxu3 %vm103_vm2, %v1030_v17 }
0x11bd   :  { %1587 = vmatpush.msrb.mxu3 %v2710_v3 }
0x11bf   :  { %1588 = vmatpush.msrb.mxu3 %v2715_v4 }
0x11c1   :  { %1589 = vmatpush.msrb.mxu3 %v2722_v5 }
0x11c3   :  { %1590 = vmatpush.msrb.mxu3 %v2729_v6 }
0x11c5   :  { %1591 = vmatpush.msrb.mxu3 %v2736_v7 }
0x11c7   :  { %1592 = vmatpush.msrb.mxu3 %v2746_v11 }
0x11c9   :  { %1593 = vmatpush.msrb.mxu3 %v2753_v12 }
0x11cb   :  { %1594 = vmatpush.msrb.mxu3 %v2760_v13 }
0x123f   :  { %v1050_v23 = vpop.f32.mrf.mxu3 }
0x1240   :  { %v1051_v21 = vadd.f32 %v2806_v24, %v1050_v23 }
0x1242   :  { %2109 = vtanh.f32 %v1051_v21  ;;  %v1960_v26 = vmul.f32 -1.442695, %v1051_v21 }
0x1244   :  { %2111 = vpow2.f32 %v1960_v26 }
0x1248   :  { %v2110_v25 = vpop.eup %2109 }
0x1249   :  { %1075 = vrot.lane.b32.xlu1 %v2110_v25, %s2231_s30 }
0x124a   :  { %v2112_v28 = vpop.eup %2111 }
0x124b   :  { %v1056_v31 = vadd.f32 1.0, %v2112_v28 }
0x124d   :  { %2113 = vrcp.f32 %v1056_v31  ;;  %v1068_v45 = vand.u32 2147483648, %v1056_v31  ;;  %vm1062_vm12 = vweird.f32 %v1056_v31  ;;  %v1066_v48 = vand.u32 2147483647, %v1056_v31 }
0x124f   :  { %v1069_v30 = vor.u32 1.1754944e-38, %v1068_v45  ;;  %vm1067_vm14 = vcmp.eq.f32.partialorder %v1066_v48, 8.507059e+37 }
0x1253   :  { %v2114_v27 = vpop.eup %2113 }
0x1254   :  { %v1058_v33 = vmul.f32 %v2114_v27, %v1056_v31  ;;  %vm1063_vm11 = vweird.f32 %v2114_v27 }
0x1255   :  { %vm1064_vm13 = vmor %vm1062_vm12, %vm1063_vm11 }
0x1256   :  { %v1059_v36 = vsub.f32 1.0, %v1058_v33 }
0x1258   :  { %v1060_v44 = vmul.f32 %v2114_v27, %v1059_v36 }
0x125a   :  { %v1061_v53 = vadd.f32 %v2114_v27, %v1060_v44 }
0x125c   :  { %v1065_v46 = vsel %vm1064_vm13, %v2114_v27, %v1061_v53 }
0x125d   :  { %v1070_v35 = vsel %vm1067_vm14, %v1069_v30, %v1065_v46 }
0x125e   :  { %v1073_v32 = vmul.f32 0.0, %v1070_v35 }
0x12bb   :  { %v1076_v49 = vpop.permute.xlu1 %1075 }
0x12bc   :  { %v1078_v50 = vmul.f32 %v1076_v49, %v1070_v35 }
0x12be   :  { %1080 = vrot.lane.b32.xlu2 %v1078_v50, %s2231_s30 }
0x1318   :  { %v1081_v52 = vpop.permute.xlu2 %1080 }
0x1319   :  { %v2811_v10 = vadd.f32 %v1081_v52, %v1073_v32 }
0x131b   :  { %2115 = vtanh.f32 %v2811_v10 }
0x1321   :  { %v2116_v37 = vpop.eup %2115 }
0x1322   :  { %1086 = vrot.lane.b32.xlu0 %v2116_v37, %s2231_s30 }
0x1394   :  { %v1087_v51 = vpop.permute.xlu0 %1086 }
0x1395   :  { %v1089_v60 = vmul.f32 %v1087_v51, %v1070_v35 }
0x1397   :  { %1091 = vrot.lane.b32.xlu2 %v1089_v60, %s2232_s27  ;;  %1169 = vrot.lane.b32.xlu1 %v1089_v60, %s2233_s28 }
0x13f1   :  { %v1092_v39 = vpop.permute.xlu2 %1091 }
0x13f2   :  { %v1094_v40 = vsel %vm89_vm1, %v1092_v39, 0.0 }
0x13f3   :  { %1970 = vmatmul.msk.f32.vlgmr.msra.gmra.mxu0 %vm103_vm2, %v1094_v40 }
0x13f4   :  { %1656 = vmatpush.msra.mxu0 %v2818_v54 }
0x13f6   :  { %1657 = vmatpush.msra.mxu0 %v2823_v55 }
0x13f8   :  { %1658 = vmatpush.msra.mxu0 %v2830_v56 }
0x13fa   :  { %1659 = vmatpush.msra.mxu0 %v2837_v14 }
0x13fc   :  { %1660 = vmatpush.msra.mxu0 %v2844_v57 }
0x13fe   :  { %1661 = vmatpush.msra.mxu0 %v2851_v58 }
0x1400   :  { %1662 = vmatpush.msra.mxu0 %v2858_v59 }
0x1402   :  { %1663 = vmatpush.msra.mxu0 %v2869_v38 }
0x1409   :  { %v1170_v41 = vpop.permute.xlu1 %1169 }
0x140a   :  { %v1172_v34 = vsel %vm89_vm1, %v2790_v20, %v1170_v41 }
0x140b   :  { %1972 = vmatmul.msk.f32.vlgmr.msra.gmra.mxu1 %vm103_vm2, %v1172_v34 }
0x140c   :  { %1720 = vmatpush.msra.mxu1 %v2710_v3 }
0x140e   :  { %1721 = vmatpush.msra.mxu1 %v2715_v4 }
0x1410   :  { %1722 = vmatpush.msra.mxu1 %v2722_v5 }
0x1412   :  { %1723 = vmatpush.msra.mxu1 %v2729_v6 }
0x1414   :  { %1724 = vmatpush.msra.mxu1 %v2736_v7 }
0x1416   :  { %1725 = vmatpush.msra.mxu1 %v2746_v11 }
0x1418   :  { %1726 = vmatpush.msra.mxu1 %v2753_v12 }
0x141a   :  { %1727 = vmatpush.msra.mxu1 %v2760_v13 }
0x1470   :  { %v1129_v42 = vpop.f32.mrf.mxu0 }
0x1471   :  { %v1130_v43 = vadd.f32 %v2913_v29, %v1129_v42  ;;  %v2938_v42 = vadd.f32 %v2787_v18, %v2782_v16 }
0x1473   :  { %2117 = vtanh.f32 %v1130_v43  ;;  %v1971_v0 = vmul.f32 -1.442695, %v1130_v43 }
0x1479   :  { %v2118_v47 = vpop.eup %2117 }
0x147a   :  { %1154 = vrot.lane.b32.xlu1 %v2118_v47, %s2231_s30 }
0x1488   :  { %v1193_v61 = vpop.f32.mrf.mxu1 }
0x1489   :  { %v1194_v62 = vadd.f32 %v2806_v24, %v1193_v61 }
0x148b   :  { %2119 = vtanh.f32 %v1194_v62  ;;  %v1973_v4 = vmul.f32 -1.442695, %v1194_v62 }
0x148c   :  { %2121 = vpow2.f32 %v1971_v0 }
0x1491   :  { %v2120_v63 = vpop.eup %2119 }
0x1492   :  { %1218 = vrot.lane.b32.xlu0 %v2120_v63, %s2231_s30  ;;  %v2122_v1 = vpop.eup %2121 }
0x1493   :  { %v1135_v2 = vadd.f32 1.0, %v2122_v1 }
0x1495   :  { %2123 = vrcp.f32 %v1135_v2  ;;  %v1147_v12 = vand.u32 2147483648, %v1135_v2  ;;  %vm1141_vm0 = vweird.f32 %v1135_v2  ;;  %v1145_v13 = vand.u32 2147483647, %v1135_v2 }
0x1496   :  { %2125 = vpow2.f32 %v1973_v4 }
0x1497   :  { %v1148_v20 = vor.u32 1.1754944e-38, %v1147_v12  ;;  %vm1146_vm4 = vcmp.eq.f32.partialorder %v1145_v13, 8.507059e+37 }
0x149b   :  { %v2124_v3 = vpop.eup %2123 }
0x149c   :  { %v1137_v5 = vmul.f32 %v2124_v3, %v1135_v2  ;;  %v2126_v7 = vpop.eup %2125  ;;  %vm1142_vm15 = vweird.f32 %v2124_v3 }
0x149d   :  { %v1199_v9 = vadd.f32 1.0, %v2126_v7  ;;  %vm1143_vm3 = vmor %vm1141_vm0, %vm1142_vm15 }
0x149e   :  { %v1138_v6 = vsub.f32 1.0, %v1137_v5 }
0x149f   :  { %2127 = vrcp.f32 %v1199_v9  ;;  %v1211_v27 = vand.u32 2147483648, %v1199_v9  ;;  %vm1205_vm7 = vweird.f32 %v1199_v9  ;;  %v1209_v33 = vand.u32 2147483647, %v1199_v9 }
0x14a0   :  { %v1139_v8 = vmul.f32 %v2124_v3, %v1138_v6 }
0x14a1   :  { %v1212_v44 = vor.u32 1.1754944e-38, %v1211_v27  ;;  %vm1210_vm9 = vcmp.eq.f32.partialorder %v1209_v33, 8.507059e+37 }
0x14a2   :  { %v1140_v11 = vadd.f32 %v2124_v3, %v1139_v8 }
0x14a4   :  { %v1144_v19 = vsel %vm1143_vm3, %v2124_v3, %v1140_v11 }
0x14a5   :  { %v1149_v22 = vsel %vm1146_vm4, %v1148_v20, %v1144_v19  ;;  %v2128_v21 = vpop.eup %2127 }
0x14a6   :  { %v1201_v25 = vmul.f32 %v2128_v21, %v1199_v9  ;;  %vm1206_vm6 = vweird.f32 %v2128_v21  ;;  %v1152_v30 = vmul.f32 0.0, %v1149_v22 }
0x14a7   :  { %vm1207_vm8 = vmor %vm1205_vm7, %vm1206_vm6 }
0x14a8   :  { %v1202_v26 = vsub.f32 1.0, %v1201_v25 }
0x14aa   :  { %v1203_v28 = vmul.f32 %v2128_v21, %v1202_v26 }
0x14ac   :  { %v1204_v31 = vadd.f32 %v2128_v21, %v1203_v28 }
0x14ae   :  { %v1208_v36 = vsel %vm1207_vm8, %v2128_v21, %v1204_v31 }
0x14af   :  { %v1213_v45 = vsel %vm1210_vm9, %v1212_v44, %v1208_v36 }
0x14b0   :  { %v1216_v46 = vmul.f32 %v1213_v45, %v2811_v10 }
0x14ec   :  { %v1155_v17 = vpop.permute.xlu1 %1154 }
0x14ed   :  { %v1157_v23 = vmul.f32 %v1155_v17, %v1149_v22 }
0x14ef   :  { %1159 = vrot.lane.b32.xlu0 %v1157_v23, %s2231_s30 }
0x1504   :  { %v1219_v53 = vpop.permute.xlu0 %1218 }
0x1505   :  { %v1221_v48 = vmul.f32 %v1219_v53, %v1213_v45 }
0x1507   :  { %1223 = vrot.lane.b32.xlu2 %v1221_v48, %s2231_s30 }
0x1561   :  { %v1224_v49 = vpop.permute.xlu2 %1223  ;;  %v1160_v35 = vpop.permute.xlu0 %1159 }
0x1562   :  { %v2922_v50 = vadd.f32 %v1224_v49, %v1216_v46  ;;  %v2924_v32 = vadd.f32 %v1160_v35, %v1152_v30 }
0x1564   :  { %2129 = vtanh.f32 %v2922_v50 }
0x1565   :  { %2131 = vtanh.f32 %v2924_v32 }
0x156a   :  { %v2130_v52 = vpop.eup %2129 }
0x156b   :  { %v2132_v37 = vpop.eup %2131  ;;  %1229 = vrot.lane.b32.xlu1 %v2130_v52, %s2231_s30 }
0x156c   :  { %1165 = vrot.lane.b32.xlu2 %v2132_v37, %s2231_s30 }
0x15c6   :  { %v1166_v51 = vpop.permute.xlu2 %1165 }
0x15c7   :  { %v2930_v60 = vmul.f32 %v1166_v51, %v1149_v22 }
0x15c9   :  { %1238 = vrot.lane.b32.xlu2 %v2930_v60, %s2233_s28 }
0x15dd   :  { %v1230_v10 = vpop.permute.xlu1 %1229 }
0x15de   :  { %v1232_v39 = vmul.f32 %v1230_v10, %v1213_v45 }
0x15e0   :  { %v1302_v40 = vrot.slane %v1232_v39, 4  ;;  %1234 = vrot.lane.b32.xlu1 %v1232_v39, %s2232_s27 }
0x15e2   :  { %1303 = vrot.lane.b32.xlu0 %v1302_v40, %s2233_s28 }
0x1623   :  { %v1239_v41 = vpop.permute.xlu2 %1238 }
0x1652   :  { %v1235_v34 = vpop.permute.xlu1 %1234 }
0x1653   :  { %v1241_v43 = vsel %vm89_vm1, %v1235_v34, %v1239_v41 }
0x1654   :  { %1974 = vmatmul.msk.f32.vlgmr.msra.gmra.mxu2 %vm103_vm2, %v1241_v43  ;;  %v1304_v47 = vpop.permute.xlu0 %1303 }
0x1655   :  { %v1306_v61 = vsel %vm89_vm1, %v2938_v42, %v1304_v47  ;;  %1789 = vmatpush.msra.mxu2 %v2818_v54 }
0x1656   :  { %v1308_v62 = vrot.slane %v1306_v61, 4 }
0x1657   :  { %1790 = vmatpush.msra.mxu2 %v2823_v55 }
0x1658   :  { %1976 = vmatmul.msk.f32.vlgmr.msra.gmra.mxu3 %vm103_vm2, %v1308_v62 }
0x1659   :  { %1791 = vmatpush.msra.mxu2 %v2830_v56 }
0x165b   :  { %1792 = vmatpush.msra.mxu2 %v2837_v14 }
0x165d   :  { %1793 = vmatpush.msra.mxu2 %v2844_v57 }
0x165f   :  { %1794 = vmatpush.msra.mxu2 %v2851_v58 }
0x1661   :  { %1795 = vmatpush.msra.mxu2 %v2858_v59 }
0x1663   :  { %1796 = vmatpush.msra.mxu2 %v2869_v38 }
0x16d7   :  { %v1262_v16 = vpop.f32.mrf.mxu2 }
0x16d8   :  { %v1263_v54 = vadd.f32 %v2913_v29, %v1262_v16 }
0x16da   :  { %2133 = vtanh.f32 %v1263_v54  ;;  %v1975_v14 = vmul.f32 -1.442695, %v1263_v54 }
0x16db   :  { %v1328_v63 = vpop.f32.mrf.mxu3 }
0x16dc   :  { %v1329_v55 = vadd.f32 %v2806_v24, %v1328_v63 }
0x16de   :  { %2135 = vtanh.f32 %v1329_v55  ;;  %v1977_v57 = vmul.f32 -1.442695, %v1329_v55 }
0x16df   :  { %2137 = vpow2.f32 %v1975_v14 }
0x16e0   :  { %v2134_v0 = vpop.eup %2133  ;;  %2139 = vpow2.f32 %v1977_v57 }
0x16e1   :  { %1287 = vrot.lane.b32.xlu1 %v2134_v0, %s2231_s30 }
0x16e4   :  { %v2136_v56 = vpop.eup %2135 }
0x16e5   :  { %1353 = vrot.lane.b32.xlu0 %v2136_v56, %s2231_s30  ;;  %v2138_v58 = vpop.eup %2137 }
0x16e6   :  { %v1268_v59 = vadd.f32 1.0, %v2138_v58  ;;  %v2140_v38 = vpop.eup %2139 }
0x16e7   :  { %v1334_v1 = vadd.f32 1.0, %v2140_v38 }
0x16e8   :  { %2141 = vrcp.f32 %v1268_v59  ;;  %v1280_v12 = vand.u32 2147483648, %v1268_v59  ;;  %vm1274_vm12 = vweird.f32 %v1268_v59  ;;  %v1278_v13 = vand.u32 2147483647, %v1268_v59 }
0x16e9   :  { %2143 = vrcp.f32 %v1334_v1  ;;  %v1346_v17 = vand.u32 2147483648, %v1334_v1  ;;  %vm1340_vm0 = vweird.f32 %v1334_v1  ;;  %v1344_v23 = vand.u32 2147483647, %v1334_v1 }
0x16ea   :  { %v1281_v22 = vor.u32 1.1754944e-38, %v1280_v12  ;;  %vm1279_vm15 = vcmp.eq.f32.partialorder %v1278_v13, 8.507059e+37 }
0x16eb   :  { %v1347_v31 = vor.u32 1.1754944e-38, %v1346_v17  ;;  %vm1345_vm4 = vcmp.eq.f32.partialorder %v1344_v23, 8.507059e+37 }
0x16ee   :  { %v2142_v2 = vpop.eup %2141 }
0x16ef   :  { %v1270_v3 = vmul.f32 %v2142_v2, %v1268_v59  ;;  %v2144_v4 = vpop.eup %2143  ;;  %vm1275_vm11 = vweird.f32 %v2142_v2 }
0x16f0   :  { %v1336_v6 = vmul.f32 %v2144_v4, %v1334_v1  ;;  %vm1276_vm13 = vmor %vm1274_vm12, %vm1275_vm11  ;;  %vm1341_vm14 = vweird.f32 %v2144_v4 }
0x16f1   :  { %v1271_v5 = vsub.f32 1.0, %v1270_v3  ;;  %vm1342_vm3 = vmor %vm1340_vm0, %vm1341_vm14 }
0x16f2   :  { %v1337_v8 = vsub.f32 1.0, %v1336_v6 }
0x16f3   :  { %v1272_v7 = vmul.f32 %v2142_v2, %v1271_v5 }
0x16f4   :  { %v1338_v11 = vmul.f32 %v2144_v4, %v1337_v8 }
0x16f5   :  { %v1273_v9 = vadd.f32 %v2142_v2, %v1272_v7 }
0x16f6   :  { %v1339_v20 = vadd.f32 %v2144_v4, %v1338_v11 }
0x16f7   :  { %v1277_v19 = vsel %vm1276_vm13, %v2142_v2, %v1273_v9 }
0x16f8   :  { %v1282_v25 = vsel %vm1279_vm15, %v1281_v22, %v1277_v19  ;;  %v1343_v28 = vsel %vm1342_vm3, %v2144_v4, %v1339_v20 }
0x16f9   :  { %v1348_v33 = vsel %vm1345_vm4, %v1347_v31, %v1343_v28  ;;  %v1285_v46 = vmul.f32 %v1282_v25, %v2924_v32 }
0x16fa   :  { %v1351_v44 = vmul.f32 %v1348_v33, %v2922_v50  ;;  %v1842_v50 = vrot.slane %v2930_v60, 4 }
0x1753   :  { %v1288_v21 = vpop.permute.xlu1 %1287 }
0x1754   :  { %v1290_v26 = vmul.f32 %v1288_v21, %v1282_v25 }
0x1756   :  { %1292 = vrot.lane.b32.xlu0 %v1290_v26, %s2231_s30 }
0x1757   :  { %v1354_v27 = vpop.permute.xlu0 %1353 }
0x1758   :  { %v1356_v36 = vmul.f32 %v1354_v27, %v1348_v33 }
0x175a   :  { %1358 = vrot.lane.b32.xlu2 %v1356_v36, %s2231_s30 }
0x17b4   :  { %v1359_v53 = vpop.permute.xlu2 %1358 }
0x17b5   :  { %v2960_v45 = vadd.f32 %v1359_v53, %v1351_v44 }
0x17b7   :  { %2145 = vtanh.f32 %v2960_v45 }
0x17bd   :  { %v2146_v48 = vpop.eup %2145 }
0x17be   :  { %1364 = vrot.lane.b32.xlu1 %v2146_v48, %s2231_s30 }
0x17c8   :  { %v1293_v30 = vpop.permute.xlu0 %1292 }
0x17c9   :  { %v2965_v49 = vadd.f32 %v1293_v30, %v1285_v46 }
0x17cb   :  { %2147 = vtanh.f32 %v2965_v49 }
0x17d1   :  { %v2148_v35 = vpop.eup %2147 }
0x17d2   :  { %1298 = vrot.lane.b32.xlu2 %v2148_v35, %s2231_s30 }
0x182c   :  { %v1299_v52 = vpop.permute.xlu2 %1298 }
0x182d   :  { %v1301_v37 = vmul.f32 %v1299_v52, %v1282_v25 }
0x182f   :  { %1373 = vrot.lane.b32.xlu2 %v1301_v37, %s2233_s28  ;;  %v2972_v51 = vsel %vm921_vm5, %v1301_v37, %v1842_v50  ;;  %v3005_v37 = vadd.f32 %v2787_v18, %v2774_v15 }
0x1830   :  { %v1365_v10 = vpop.permute.xlu1 %1364 }
0x1831   :  { %v1367_v39 = vmul.f32 %v1365_v10, %v1348_v33 }
0x1833   :  { %1369 = vrot.lane.b32.xlu1 %v1367_v39, %s2232_s27  ;;  %1437 = vrot.lane.b32.xlu0 %v1367_v39, %s2233_s28 }
0x1889   :  { %v1374_v32 = vpop.permute.xlu2 %1373 }
0x18a5   :  { %v1370_v40 = vpop.permute.xlu1 %1369  ;;  %v1438_v41 = vpop.permute.xlu0 %1437 }
0x18a6   :  { %v1376_v34 = vsel %vm89_vm1, %v1370_v40, %v1374_v32  ;;  %v1440_v60 = vsel %vm89_vm1, %v2938_v42, %v1438_v41 }
0x18a7   :  { %1978 = vmatmul.msk.f32.vlgmr.msrb.gmra.mxu0 %vm103_vm2, %v1376_v34  ;;  %1980 = vmatmul.msk.f32.vlgmr.msrb.gmra.mxu1 %vm103_vm2, %v1440_v60 }
0x1924   :  { %v1397_v43 = vpop.f32.mrf.mxu0  ;;  %v1461_v47 = vpop.f32.mrf.mxu1 }
0x1925   :  { %v1398_v61 = vadd.f32 %v2913_v29, %v1397_v43  ;;  %v1462_v62 = vadd.f32 %v2806_v24, %v1461_v47 }
0x1927   :  { %2149 = vtanh.f32 %v1398_v61  ;;  %v1979_v63 = vmul.f32 -1.442695, %v1398_v61  ;;  %v1981_v42 = vmul.f32 -1.442695, %v1462_v62 }
0x1928   :  { %2151 = vtanh.f32 %v1462_v62 }
0x1929   :  { %2153 = vpow2.f32 %v1979_v63 }
0x192a   :  { %2155 = vpow2.f32 %v1981_v42 }
0x192d   :  { %v2150_v16 = vpop.eup %2149 }
0x192e   :  { %v2152_v54 = vpop.eup %2151  ;;  %1422 = vrot.lane.b32.xlu1 %v2150_v16, %s2231_s30 }
0x192f   :  { %1486 = vrot.lane.b32.xlu0 %v2152_v54, %s2231_s30  ;;  %v2154_v55 = vpop.eup %2153 }
0x1930   :  { %v2156_v0 = vpop.eup %2155  ;;  %v1403_v56 = vadd.f32 1.0, %v2154_v55 }
0x1931   :  { %v1467_v14 = vadd.f32 1.0, %v2156_v0 }
0x1932   :  { %2157 = vrcp.f32 %v1403_v56  ;;  %v1415_v6 = vand.u32 2147483648, %v1403_v56  ;;  %vm1409_vm8 = vweird.f32 %v1403_v56  ;;  %v1413_v8 = vand.u32 2147483647, %v1403_v56 }
0x1933   :  { %2159 = vrcp.f32 %v1467_v14  ;;  %v1479_v9 = vand.u32 2147483648, %v1467_v14  ;;  %vm1473_vm11 = vweird.f32 %v1467_v14  ;;  %v1477_v11 = vand.u32 2147483647, %v1467_v14 }
0x1934   :  { %v1416_v13 = vor.u32 1.1754944e-38, %v1415_v6  ;;  %vm1414_vm13 = vcmp.eq.f32.partialorder %v1413_v8, 8.507059e+37 }
0x1935   :  { %v1480_v20 = vor.u32 1.1754944e-38, %v1479_v9  ;;  %vm1478_vm14 = vcmp.eq.f32.partialorder %v1477_v11, 8.507059e+37 }
0x1938   :  { %v2158_v57 = vpop.eup %2157 }
0x1939   :  { %v2160_v58 = vpop.eup %2159  ;;  %v1405_v59 = vmul.f32 %v2158_v57, %v1403_v56  ;;  %vm1410_vm6 = vweird.f32 %v2158_v57 }
0x193a   :  { %v1469_v38 = vmul.f32 %v2160_v58, %v1467_v14  ;;  %vm1474_vm7 = vweird.f32 %v2160_v58  ;;  %vm1411_vm9 = vmor %vm1409_vm8, %vm1410_vm6 }
0x193b   :  { %v1406_v1 = vsub.f32 1.0, %v1405_v59  ;;  %vm1475_vm12 = vmor %vm1473_vm11, %vm1474_vm7 }
0x193c   :  { %v1470_v2 = vsub.f32 1.0, %v1469_v38 }
0x193d   :  { %v1407_v3 = vmul.f32 %v2158_v57, %v1406_v1 }
0x193e   :  { %v1471_v4 = vmul.f32 %v2160_v58, %v1470_v2 }
0x193f   :  { %v1408_v5 = vadd.f32 %v2158_v57, %v1407_v3 }
0x1940   :  { %v1472_v7 = vadd.f32 %v2160_v58, %v1471_v4 }
0x1941   :  { %v1412_v12 = vsel %vm1411_vm9, %v2158_v57, %v1408_v5 }
0x1942   :  { %v1476_v19 = vsel %vm1475_vm12, %v2160_v58, %v1472_v7  ;;  %v1417_v17 = vsel %vm1414_vm13, %v1416_v13, %v1412_v12 }
0x1943   :  { %v1481_v25 = vsel %vm1478_vm14, %v1480_v20, %v1476_v19  ;;  %v1420_v36 = vmul.f32 %v1417_v17, %v2965_v49 }
0x1944   :  { %v1484_v28 = vmul.f32 %v1481_v25, %v2960_v45 }
0x19a0   :  { %v1423_v22 = vpop.permute.xlu1 %1422 }
0x19a1   :  { %v1425_v23 = vmul.f32 %v1423_v22, %v1417_v17  ;;  %v1487_v21 = vpop.permute.xlu0 %1486 }
0x19a2   :  { %v1489_v26 = vmul.f32 %v1487_v21, %v1481_v25 }
0x19a3   :  { %1427 = vrot.lane.b32.xlu0 %v1425_v23, %s2231_s30 }
0x19a4   :  { %1491 = vrot.lane.b32.xlu2 %v1489_v26, %s2231_s30 }
0x19fe   :  { %v1492_v31 = vpop.permute.xlu2 %1491 }
0x19ff   :  { %v2988_v27 = vadd.f32 %v1492_v31, %v1484_v28 }
0x1a01   :  { %2161 = vtanh.f32 %v2988_v27 }
0x1a07   :  { %v2162_v33 = vpop.eup %2161 }
0x1a08   :  { %1497 = vrot.lane.b32.xlu1 %v2162_v33, %s2231_s30 }
0x1a15   :  { %v1428_v44 = vpop.permute.xlu0 %1427 }
0x1a16   :  { %v2993_v53 = vadd.f32 %v1428_v44, %v1420_v36 }
0x1a18   :  { %2163 = vtanh.f32 %v2993_v53 }
0x1a1e   :  { %v2164_v48 = vpop.eup %2163 }
0x1a1f   :  { %1433 = vrot.lane.b32.xlu2 %v2164_v48, %s2231_s30 }
0x1a79   :  { %v1434_v46 = vpop.permute.xlu2 %1433 }
0x1a7a   :  { %v2997_v45 = vmul.f32 %v1434_v46, %v1417_v17  ;;  %v1498_v30 = vpop.permute.xlu1 %1497 }
0x1a7b   :  { %v1500_v35 = vmul.f32 %v1498_v30, %v1481_v25 }
0x1a7c   :  { %1506 = vrot.lane.b32.xlu2 %v2997_v45, %s2233_s28  ;;  %v1840_v44 = vrot.slane %v2997_v45, 4 }
0x1a7d   :  { %v1570_v52 = vrot.slane %v1500_v35, 4  ;;  %1502 = vrot.lane.b32.xlu1 %v1500_v35, %s2232_s27 }
0x1a7f   :  { %1571 = vrot.lane.b32.xlu0 %v1570_v52, %s2233_s28 }
0x1ad6   :  { %v1507_v49 = vpop.permute.xlu2 %1506 }
0x1aef   :  { %v1503_v50 = vpop.permute.xlu1 %1502 }
0x1af0   :  { %v1509_v10 = vsel %vm89_vm1, %v1503_v50, %v1507_v49 }
0x1af1   :  { %1982 = vmatmul.msk.f32.vlgmr.msrb.gmra.mxu2 %vm103_vm2, %v1509_v10  ;;  %v1572_v39 = vpop.permute.xlu0 %1571 }
0x1af2   :  { %v1574_v32 = vsel %vm89_vm1, %v3005_v37, %v1572_v39 }
0x1af3   :  { %v1576_v40 = vrot.slane %v1574_v32, 4 }
0x1af5   :  { %1984 = vmatmul.msk.f32.vlgmr.msrb.gmra.mxu3 %vm103_vm2, %v1576_v40 }
0x1b74   :  { %v1530_v41 = vpop.f32.mrf.mxu2 }
0x1b75   :  { %v1531_v34 = vadd.f32 %v2913_v29, %v1530_v41 }
0x1b77   :  { %2165 = vtanh.f32 %v1531_v34  ;;  %v1983_v47 = vmul.f32 -1.442695, %v1531_v34 }
0x1b78   :  { %v1596_v60 = vpop.f32.mrf.mxu3 }
0x1b79   :  { %v1597_v43 = vadd.f32 %v2806_v24, %v1596_v60 }
0x1b7b   :  { %2167 = vtanh.f32 %v1597_v43  ;;  %v1985_v61 = vmul.f32 -1.442695, %v1597_v43 }
0x1b7c   :  { %2169 = vpow2.f32 %v1983_v47 }
0x1b7d   :  { %v2166_v15 = vpop.eup %2165  ;;  %2171 = vpow2.f32 %v1985_v61 }
0x1b7e   :  { %1555 = vrot.lane.b32.xlu0 %v2166_v15, %s2231_s30 }
0x1b81   :  { %v2168_v18 = vpop.eup %2167 }
0x1b82   :  { %1621 = vrot.lane.b32.xlu1 %v2168_v18, %s2231_s30  ;;  %v2170_v62 = vpop.eup %2169 }
0x1b83   :  { %v1536_v16 = vadd.f32 1.0, %v2170_v62  ;;  %v2172_v54 = vpop.eup %2171 }
0x1b84   :  { %v1602_v63 = vadd.f32 1.0, %v2172_v54 }
0x1b85   :  { %2173 = vrcp.f32 %v1536_v16  ;;  %v1548_v1 = vand.u32 2147483648, %v1536_v16  ;;  %vm1542_vm0 = vweird.f32 %v1536_v16  ;;  %v1546_v2 = vand.u32 2147483647, %v1536_v16 }
0x1b86   :  { %2175 = vrcp.f32 %v1602_v63  ;;  %v1614_v6 = vand.u32 2147483648, %v1602_v63  ;;  %vm1608_vm7 = vweird.f32 %v1602_v63  ;;  %v1612_v7 = vand.u32 2147483647, %v1602_v63 }
0x1b87   :  { %v1549_v5 = vor.u32 1.1754944e-38, %v1548_v1  ;;  %vm1547_vm6 = vcmp.eq.f32.partialorder %v1546_v2, 8.507059e+37 }
0x1b88   :  { %v1615_v13 = vor.u32 1.1754944e-38, %v1614_v6  ;;  %vm1613_vm9 = vcmp.eq.f32.partialorder %v1612_v7, 8.507059e+37 }
0x1b8b   :  { %v2174_v42 = vpop.eup %2173 }
0x1b8c   :  { %v1538_v55 = vmul.f32 %v2174_v42, %v1536_v16  ;;  %v2176_v0 = vpop.eup %2175  ;;  %vm1543_vm15 = vweird.f32 %v2174_v42 }
0x1b8d   :  { %v1604_v14 = vmul.f32 %v2176_v0, %v1602_v63  ;;  %vm1544_vm3 = vmor %vm1542_vm0, %vm1543_vm15  ;;  %vm1609_vm4 = vweird.f32 %v2176_v0 }
0x1b8e   :  { %v1539_v56 = vsub.f32 1.0, %v1538_v55  ;;  %vm1610_vm8 = vmor %vm1608_vm7, %vm1609_vm4 }
0x1b8f   :  { %v1605_v58 = vsub.f32 1.0, %v1604_v14 }
0x1b90   :  { %v1540_v57 = vmul.f32 %v2174_v42, %v1539_v56 }
0x1b91   :  { %v1606_v38 = vmul.f32 %v2176_v0, %v1605_v58 }
0x1b92   :  { %v1541_v59 = vadd.f32 %v2174_v42, %v1540_v57 }
0x1b93   :  { %v1607_v4 = vadd.f32 %v2176_v0, %v1606_v38 }
0x1b94   :  { %v1545_v3 = vsel %vm1544_vm3, %v2174_v42, %v1541_v59 }
0x1b95   :  { %v1550_v8 = vsel %vm1547_vm6, %v1549_v5, %v1545_v3  ;;  %v1611_v12 = vsel %vm1610_vm8, %v2176_v0, %v1607_v4 }
0x1b96   :  { %v1616_v20 = vsel %vm1613_vm9, %v1615_v13, %v1611_v12  ;;  %v1553_v17 = vmul.f32 %v1550_v8, %v2993_v53 }
0x1b97   :  { %v1619_v26 = vmul.f32 %v1616_v20, %v2988_v27 }
0x1bf0   :  { %v1556_v9 = vpop.permute.xlu0 %1555 }
0x1bf1   :  { %v1558_v11 = vmul.f32 %v1556_v9, %v1550_v8 }
0x1bf3   :  { %1560 = vrot.lane.b32.xlu2 %v1558_v11, %s2231_s30 }
0x1bf4   :  { %v1622_v19 = vpop.permute.xlu1 %1621 }
0x1bf5   :  { %v1624_v22 = vmul.f32 %v1622_v19, %v1616_v20 }
0x1bf7   :  { %1626 = vrot.lane.b32.xlu0 %v1624_v22, %s2231_s30 }
0x1c4d   :  { %v1561_v23 = vpop.permute.xlu2 %1560 }
0x1c4e   :  { %v3019_v21 = vadd.f32 %v1561_v23, %v1553_v17 }
0x1c50   :  { %2177 = vtanh.f32 %v3019_v21 }
0x1c56   :  { %v2178_v25 = vpop.eup %2177 }
0x1c57   :  { %1566 = vrot.lane.b32.xlu1 %v2178_v25, %s2231_s30 }
0x1c69   :  { %v1627_v28 = vpop.permute.xlu0 %1626 }
0x1c6a   :  { %v3024_v31 = vadd.f32 %v1627_v28, %v1619_v26 }
0x1c6c   :  { %2179 = vtanh.f32 %v3024_v31 }
0x1c72   :  { %v2180_v33 = vpop.eup %2179 }
0x1c73   :  { %1632 = vrot.lane.b32.xlu2 %v2180_v33, %s2231_s30 }
0x1cc9   :  { %v1567_v36 = vpop.permute.xlu1 %1566 }
0x1cca   :  { %v1569_v53 = vmul.f32 %v1567_v36, %v1550_v8 }
0x1ccc   :  { %1641 = vrot.lane.b32.xlu1 %v1569_v53, %s2233_s28  ;;  %v3031_v48 = vsel %vm921_vm5, %v1569_v53, %v1840_v44 }
0x1ccd   :  { %v1633_v46 = vpop.permute.xlu2 %1632 }
0x1cce   :  { %v1635_v30 = vmul.f32 %v1633_v46, %v1616_v20 }
0x1cd0   :  { %1705 = vrot.lane.b32.xlu2 %v1635_v30, %s2233_s28  ;;  %1637 = vrot.lane.b32.xlu0 %v1635_v30, %s2232_s27 }
0x1d2a   :  { %v1706_v27 = vpop.permute.xlu2 %1705 }
0x1d2b   :  { %v1708_v35 = vsel %vm89_vm1, %v3005_v37, %v1706_v27 }
0x1d2c   :  { %1988 = vmatmul.msk.f32.vlgmr.msra.gmra.mxu1 %vm103_vm2, %v1708_v35  ;;  %v1850_v35 = vld [vmem:[%s3103_s11 + $0x18] sm:$0xff] }
0x1d2d   :  { %1995 = vmatpush.msra.mxu3 %v1850_v35  ;;  %1882 = vmatpush.msrb.mxu0 %v1850_v35 }
0x1d3e   :  { %v1642_v52 = vpop.permute.xlu1 %1641 }
0x1d42   :  { %v1638_v45 = vpop.permute.xlu0 %1637 }
0x1d43   :  { %v1644_v49 = vsel %vm89_vm1, %v1638_v45, %v1642_v52  ;;  %v1848_v52 = vld [vmem:[%s3103_s11 + $0x8] sm:$0xff] }
0x1d44   :  { %1986 = vmatmul.msk.f32.vlgmr.msra.gmra.mxu0 %vm103_vm2, %v1644_v49 }
0x1da9   :  { %v1729_v50 = vpop.f32.mrf.mxu1 }
0x1daa   :  { %v1730_v10 = vadd.f32 %v2806_v24, %v1729_v50 }
0x1dac   :  { %2181 = vtanh.f32 %v1730_v10  ;;  %v1989_v41 = vmul.f32 -1.442695, %v1730_v10 }
0x1db2   :  { %v2182_v39 = vpop.eup %2181 }
0x1db3   :  { %1754 = vrot.lane.b32.xlu1 %v2182_v39, %s2231_s30 }
0x1dc1   :  { %v1665_v32 = vpop.f32.mrf.mxu0 }
0x1dc2   :  { %v1666_v40 = vadd.f32 %v2913_v29, %v1665_v32 }
0x1dc4   :  { %2183 = vtanh.f32 %v1666_v40  ;;  %v1987_v15 = vmul.f32 -1.442695, %v1666_v40 }
0x1dc5   :  { %2185 = vpow2.f32 %v1989_v41 }
0x1dca   :  { %v2184_v37 = vpop.eup %2183 }
0x1dcb   :  { %1690 = vrot.lane.b32.xlu0 %v2184_v37, %s2231_s30  ;;  %v2186_v34 = vpop.eup %2185 }
0x1dcc   :  { %v1735_v60 = vadd.f32 1.0, %v2186_v34 }
0x1dce   :  { %2187 = vrcp.f32 %v1735_v60  ;;  %v1747_v54 = vand.u32 2147483648, %v1735_v60  ;;  %vm1741_vm12 = vweird.f32 %v1735_v60  ;;  %v1745_v63 = vand.u32 2147483647, %v1735_v60 }
0x1dcf   :  { %2189 = vpow2.f32 %v1987_v15 }
0x1dd0   :  { %v1748_v55 = vor.u32 1.1754944e-38, %v1747_v54  ;;  %vm1746_vm14 = vcmp.eq.f32.partialorder %v1745_v63, 8.507059e+37 }
0x1dd4   :  { %v2188_v43 = vpop.eup %2187 }
0x1dd5   :  { %v1737_v18 = vmul.f32 %v2188_v43, %v1735_v60  ;;  %v2190_v47 = vpop.eup %2189  ;;  %vm1742_vm11 = vweird.f32 %v2188_v43 }
0x1dd6   :  { %v1671_v62 = vadd.f32 1.0, %v2190_v47  ;;  %vm1743_vm13 = vmor %vm1741_vm12, %vm1742_vm11 }
0x1dd7   :  { %v1738_v24 = vsub.f32 1.0, %v1737_v18 }
0x1dd8   :  { %2191 = vrcp.f32 %v1671_v62  ;;  %v1683_v2 = vand.u32 2147483648, %v1671_v62  ;;  %vm1677_vm0 = vweird.f32 %v1671_v62  ;;  %v1681_v3 = vand.u32 2147483647, %v1671_v62 }
0x1dd9   :  { %v1739_v61 = vmul.f32 %v2188_v43, %v1738_v24 }
0x1dda   :  { %v1684_v5 = vor.u32 1.1754944e-38, %v1683_v2  ;;  %vm1682_vm4 = vcmp.eq.f32.partialorder %v1681_v3, 8.507059e+37 }
0x1ddb   :  { %v1740_v16 = vadd.f32 %v2188_v43, %v1739_v61 }
0x1ddd   :  { %v1744_v42 = vsel %vm1743_vm13, %v2188_v43, %v1740_v16  ;;  %v2012_v16 = vld [vmem:[%s3104_s12] ss:$0 sm:$0xff]  ;;  %s2234_s12 = smov [#allocation2]  }
0x1dde   :  { %v1749_v56 = vsel %vm1746_vm14, %v1748_v55, %v1744_v42  ;;  %v2192_v57 = vpop.eup %2191 }
0x1ddf   :  { %v1673_v58 = vmul.f32 %v2192_v57, %v1671_v62  ;;  %vm1678_vm15 = vweird.f32 %v2192_v57  ;;  %v1752_v9 = vmul.f32 %v1749_v56, %v3024_v31 }
0x1de0   :  { %vm1679_vm3 = vmor %vm1677_vm0, %vm1678_vm15 }
0x1de1   :  { %v1674_v59 = vsub.f32 1.0, %v1673_v58 }
0x1de3   :  { %v1675_v38 = vmul.f32 %v2192_v57, %v1674_v59 }
0x1de5   :  { %v1676_v1 = vadd.f32 %v2192_v57, %v1675_v38 }
0x1de7   :  { %v1680_v4 = vsel %vm1679_vm3, %v2192_v57, %v1676_v1 }
0x1de8   :  { %v1685_v7 = vsel %vm1682_vm4, %v1684_v5, %v1680_v4 }
0x1de9   :  { %v1688_v11 = vmul.f32 %v1685_v7, %v3019_v21 }
0x1e25   :  { %v1755_v0 = vpop.permute.xlu1 %1754 }
0x1e26   :  { %v1757_v14 = vmul.f32 %v1755_v0, %v1749_v56 }
0x1e28   :  { %1759 = vrot.lane.b32.xlu0 %v1757_v14, %s2231_s30 }
0x1e3d   :  { %v1691_v6 = vpop.permute.xlu0 %1690 }
0x1e3e   :  { %v1693_v8 = vmul.f32 %v1691_v6, %v1685_v7 }
0x1e40   :  { %1695 = vrot.lane.b32.xlu2 %v1693_v8, %s2231_s30 }
0x1e9a   :  { %v1760_v12 = vpop.permute.xlu0 %1759  ;;  %v1696_v13 = vpop.permute.xlu2 %1695 }
0x1e9b   :  { %v1762_v19 = vadd.f32 %v1760_v12, %v1752_v9  ;;  %v1698_v20 = vadd.f32 %v1696_v13, %v1688_v11 }
0x1e9d   :  { %2193 = vtanh.f32 %v1762_v19 }
0x1e9e   :  { %2195 = vtanh.f32 %v1698_v20 }
0x1ea3   :  { %v2194_v22 = vpop.eup %2193 }
0x1ea4   :  { %v2196_v17 = vpop.eup %2195  ;;  %1765 = vrot.lane.b32.xlu2 %v2194_v22, %s2231_s30 }
0x1ea5   :  { %1701 = vrot.lane.b32.xlu1 %v2196_v17, %s2231_s30 }
0x1efe   :  { %v1766_v23 = vpop.permute.xlu2 %1765 }
0x1eff   :  { %v1768_v25 = vmul.f32 %v1766_v23, %v1749_v56 }
0x1f01   :  { %1770 = vrot.lane.b32.xlu0 %v1768_v25, %s2232_s27 }
0x1f17   :  { %v1702_v26 = vpop.permute.xlu1 %1701 }
0x1f18   :  { %v3051_v28 = vmul.f32 %v1702_v26, %v1685_v7 }
0x1f1a   :  { %1774 = vrot.lane.b32.xlu1 %v3051_v28, %s2233_s28 }
0x1f73   :  { %v1771_v21 = vpop.permute.xlu0 %1770 }
0x1f8c   :  { %v1775_v31 = vpop.permute.xlu1 %1774 }
0x1f8d   :  { %v1777_v33 = vsel %vm89_vm1, %v1771_v21, %v1775_v31 }
0x1f8e   :  { %1990 = vmatmul.msk.f32.vlgmr.msra.gmra.mxu2 %vm103_vm2, %v1777_v33 }
0x2011   :  { %v1798_v36 = vpop.f32.mrf.mxu2 }
0x2012   :  { %v1799_v44 = vadd.f32 %v2913_v29, %v1798_v36  ;;  %v1849_v29 = vld [vmem:[%s3103_s11 + $0x10] sm:$0xff] }
0x2013   :  { %1996 = vmatpush.msra.mxu3 %v1849_v29  ;;  %1883 = vmatpush.msrb.mxu0 %v1849_v29 }
0x2014   :  { %2197 = vtanh.f32 %v1799_v44  ;;  %v1991_v46 = vmul.f32 -1.442695, %v1799_v44 }
0x2015   :  { %1997 = vmatpush.msra.mxu3 %v1848_v52  ;;  %1884 = vmatpush.msrb.mxu0 %v1848_v52 }
0x2016   :  { %2199 = vpow2.f32 %v1991_v46 }
0x201a   :  { %v2198_v53 = vpop.eup %2197 }
0x201b   :  { %1823 = vrot.lane.b32.xlu2 %v2198_v53, %s2231_s30 }
0x201c   :  { %v2200_v30 = vpop.eup %2199 }
0x201d   :  { %v1804_v27 = vadd.f32 1.0, %v2200_v30 }
0x201f   :  { %2201 = vrcp.f32 %v1804_v27  ;;  %v1816_v32 = vand.u32 2147483648, %v1804_v27  ;;  %vm1810_vm6 = vweird.f32 %v1804_v27  ;;  %v1814_v40 = vand.u32 2147483647, %v1804_v27 }
0x2021   :  { %v1817_v41 = vor.u32 1.1754944e-38, %v1816_v32  ;;  %vm1815_vm8 = vcmp.eq.f32.partialorder %v1814_v40, 8.507059e+37 }
0x2023   :  { %1860 = vrot.lane.b32.xlu2 %v3031_v48, %s2232_s27  ;;  %v1847_v48 = vld [vmem:[%s3103_s11] sm:$0xff] }
0x2024   :  { %1998 = vmatpush.msra.mxu3 %v1847_v48  ;;  %1885 = vmatpush.msrb.mxu0 %v1847_v48 }
0x2025   :  { %v2202_v45 = vpop.eup %2201 }
0x2026   :  { %v1806_v49 = vmul.f32 %v2202_v45, %v1804_v27  ;;  %vm1811_vm2 = vweird.f32 %v2202_v45 }
0x2027   :  { %vm1812_vm7 = vmor %vm1810_vm6, %vm1811_vm2 }
0x2028   :  { %v1807_v50 = vsub.f32 1.0, %v1806_v49 }
0x202a   :  { %v1808_v10 = vmul.f32 %v2202_v45, %v1807_v50 }
0x202c   :  { %v1809_v39 = vadd.f32 %v2202_v45, %v1808_v10 }
0x202e   :  { %v1813_v37 = vsel %vm1812_vm7, %v2202_v45, %v1809_v39 }
0x202f   :  { %v1818_v60 = vsel %vm1815_vm8, %v1817_v41, %v1813_v37 }
0x2030   :  { %v1821_v18 = vmul.f32 %v1818_v60, %v1698_v20 }
0x2075   :  { %v1824_v34 = vpop.permute.xlu2 %1823 }
0x2076   :  { %v1826_v43 = vmul.f32 %v1824_v34, %v1818_v60 }
0x2078   :  { %1828 = vrot.lane.b32.xlu0 %v1826_v43, %s2231_s30 }
0x207d   :  { %v1861_v15 = vpop.permute.xlu2 %1860 }
0x207e   :  { %1993 = vmatmul.msk.f32.vlgmr.msra.gmra.mxu3 %vm89_vm1, %v1861_v15 }
0x2080   :  { %1862 = vrot.lane.b32.xlu0 %v2972_v51, %s2232_s27  ;;  %v1838_v51 = vrot.slane %v3051_v28, 4 }
0x20ea   :  { %v1829_v24 = vpop.permute.xlu0 %1828 }
0x20eb   :  { %v1831_v47 = vadd.f32 %v1829_v24, %v1821_v18 }
0x20ed   :  { %2203 = vtanh.f32 %v1831_v47 }
0x20f2   :  { %v1863_v61 = vpop.permute.xlu0 %1862 }
0x20f3   :  { %v2204_v62 = vpop.eup %2203  ;;  %1994 = vmatmul.msk.f32.gmra.mxu3 %vm89_vm1, %v1863_v61 }
0x20f4   :  { %1834 = vrot.lane.b32.xlu1 %v2204_v62, %s2231_s30  ;;  %s1903_s30 = sshll.u32 %s2234_s12, 4  ;;  %s1904_s30 = int_to_ptr.vmem [resolvable:$true] %s1903_s30 }
0x2101   :  { %v1890_v54 = vpop.f32.mrf.mxu3 }
0x2102   :  { %v1891_v63 = vadd.f32 %v2012_v16, %v1890_v54 }
0x2104   :  { %1897 = vst.msk [vmem:[#allocation2 + $0x8] sm:$0xff] %vm980_vm10, %v1891_v63 }
0x2166   :  { %v1835_v42 = vpop.permute.xlu1 %1834 }
0x2167   :  { %v1837_v55 = vmul.f32 %v1835_v42, %v1818_v60 }
0x2169   :  { %v1844_v0 = vsel %vm921_vm5, %v1837_v55, %v1838_v51 }
0x216a   :  { %1858 = vrot.lane.b32.xlu1 %v1844_v0, %s2232_s27  ;;  %s2235_s27 = smov 128  }
0x2176   :  { %v1893_v56 = vpop.f32.mrf.mxu3 }
0x2177   :  { %v1894_v14 = vadd.f32 %v2012_v16, %v1893_v56 }
0x2179   :  { %1898 = vst.msk [vmem:[#allocation2 + $0x10] sm:$0xff] %vm980_vm10, %v1894_v14 }
0x21dc   :  { %v1859_v57 = vpop.permute.xlu1 %1858 }
0x21dd   :  { %1992 = vmatmul.msk.f32.vlgmr.msrb.gmra.mxu0 %vm89_vm1, %v1859_v57 }
0x225a   :  { %v1887_v58 = vpop.f32.mrf.mxu0 }
0x225b   :  { %v1888_v59 = vadd.f32 %v2012_v16, %v1887_v58 }
0x225d   :  { %1896 = vst.msk [vmem:[#allocation2] sm:$0xff] %vm980_vm10, %v1888_v59 }
0x225e   :  { %1911 = dma.vmem_to_hbm [thread:$0]  %s1904_s30, 384, %s1906_s6, [#allocation3], %s2235_s27, %s2235_s27, %s2236_s7  }
0x225f   :  { %2229 = dma.done.wait [#allocation3], 384  }
0x2260   :  { %2230 = vsyncadd [#allocation3], 4294966912 }
0x2261   :  { %1916 = vsyncpa [#allocation3], 1 }

</bundles_post_ra>
